<compile_context>
chip_gen: v5e
topology: v5e:2x2
jax: 0.10.0
libtpu: 0.0.40
codegen_flags: <defaults>
</compile_context>

<pallas_src>
import functools

import jax
import jax.numpy as jnp
from jax import lax
from jax.experimental import pallas as pl
from jax.experimental.pallas import tpu as pltpu

BN_EPS = 1e-5
MXU_DTYPE = jnp.bfloat16   # MXU operand dtype; accumulation is always float32.


# ---------------------------------------------------------------------------
# Pallas kernels
# ---------------------------------------------------------------------------
def _bn_relu_pool(conv, g, beta, m):
    """Training-mode BatchNorm (batch stats, biased var) + ReLU + 2x2 max-pool.

    conv : [4*m, C] f32 conv outputs, rows ordered pool-window-position major.
    Returns pooled [m, C] f32.

    Stats are taken over the full pre-pool conv output (exact BN semantics);
    the affine + ReLU is applied after pooling, with a min/max select that
    keeps the result exact for negative BN scales.
    """
    inv_cnt = 1.0 / (4 * m)                        # count = N*OH*OW conv outputs
    mean = jnp.sum(conv, axis=0, keepdims=True) * inv_cnt
    var = jnp.sum(conv * conv, axis=0, keepdims=True) * inv_cnt - mean * mean
    var = jnp.maximum(var, 0.0)                    # guard single-pass cancellation
    scale = g * lax.rsqrt(var + BN_EPS)
    shift = beta - mean * scale

    # MaxPool2d(2): rows j*m:(j+1)*m hold the j-th position of each 2x2 window.
    a, b, c, d = conv[0 * m:1 * m], conv[1 * m:2 * m], conv[2 * m:3 * m], conv[3 * m:4 * m]
    pmax = jnp.maximum(jnp.maximum(a, b), jnp.maximum(c, d))
    pmin = jnp.minimum(jnp.minimum(a, b), jnp.minimum(c, d))
    pre = jnp.where(scale >= 0.0, pmax, pmin)      # window-extremum matching sign
    return jnp.maximum(pre * scale + shift, 0.0)   # BN affine + ReLU on [m, C]


def _conv_block_kernel(p_ref, w_ref, g_ref, beta_ref, o_ref, *, m):
    """Fused Conv2d(3x3, s=2, p=1) + BatchNorm2d(batch stats) + ReLU + MaxPool2d(2).

    p_ref : [4*m, K] bf16 im2col slab (K = 3*3*Cin; feature order kh,kw,cin)
    w_ref : [K, Cout] bf16 conv weight
    g_ref, beta_ref : [1, Cout] f32 BN affine params
    o_ref : [m, Cout]  pooled activation (bf16) for the next block
    """
    conv = jnp.dot(p_ref[...], w_ref[...], preferred_element_type=jnp.float32)
    pooled = _bn_relu_pool(conv, g_ref[...], beta_ref[...], m)
    o_ref[...] = pooled.astype(o_ref.dtype)


def _conv_block_head_kernel(p_ref, w_ref, g_ref, beta_ref,
                            w1_ref, b1_ref, w2_ref, b2_ref, o_ref,
                            *, m, n, s_spatial):
    """Third conv block fused with Linear(flat->10) -> Softmax(dim=1) -> Linear(10->2).

    Slab rows are ordered (pool-pos, spatial, batch), so each spatial position
    of the pooled result is a contiguous [n, Cout] row block; w1_ref rows were
    pre-permuted in the wrapper so the PyTorch CHW flatten order is preserved.
    """
    conv = jnp.dot(p_ref[...], w_ref[...], preferred_element_type=jnp.float32)
    pooled = _bn_relu_pool(conv, g_ref[...], beta_ref[...], m)    # [m, Cout]

    cout = w_ref.shape[1]
    h = jnp.dot(pooled[0:n], w1_ref[0:cout],
                preferred_element_type=jnp.float32)
    for s in range(1, s_spatial):                  # static unroll (s_spatial = PH*PW)
        h = h + jnp.dot(pooled[s * n:(s + 1) * n],
                        w1_ref[s * cout:(s + 1) * cout],
                        preferred_element_type=jnp.float32)
    h = h + b1_ref[...]

    # nn.Softmax() on a 2-D input -> softmax over dim 1.
    e = jnp.exp(h - jnp.max(h, axis=1, keepdims=True))
    p = e / jnp.sum(e, axis=1, keepdims=True)

    o_ref[...] = (jnp.dot(p, w2_ref[...], preferred_element_type=jnp.float32)
                  + b2_ref[...]).astype(o_ref.dtype)


# ---------------------------------------------------------------------------
# Wrapper glue (im2col slab construction, parameter plumbing) in plain JAX
# ---------------------------------------------------------------------------
def _vmem_specs(n):
    return [pl.BlockSpec(memory_space=pltpu.MemorySpace.VMEM) for _ in range(n)]


def _im2col_pool_slab(x_nhwc, *, k=3, stride=2, pad=1, spatial_major=False):
    """3x3/stride-2 patches grouped by 2x2 pool-window position, as ONE slab.

    Returns (slab [4*M, k*k*C], (N, PH, PW)).  Row order inside each of the 4
    pool-position groups is (n, ph, pw) by default, or (ph, pw, n) when
    spatial_major=True (used by the final block so the fused head can consume
    contiguous per-spatial-position row blocks).

    Taps are taken directly from the padded input with stride 2*stride, so no
    full-resolution [N, OH, OW, k*k*C] intermediate is materialized.
    """
    N, H, W, C = x_nhwc.shape
    OH = (H + 2 * pad - k) // stride + 1
    OW = (W + 2 * pad - k) // stride + 1
    PH, PW = OH // 2, OW // 2                      # floor-mode MaxPool2d(2)
    xp = jnp.pad(x_nhwc, ((0, 0), (pad, pad), (pad, pad), (0, 0)))
    K = k * k * C
    step = 2 * stride                              # conv stride * pool stride
    slabs = []
    for dy in range(2):
        for dx in range(2):
            taps = []
            for kh in range(k):
                for kw in range(k):
                    r0 = stride * dy + kh
                    c0 = stride * dx + kw
                    taps.append(xp[:, r0:r0 + step * (PH - 1) + 1:step,
                                      c0:c0 + step * (PW - 1) + 1:step, :])
            s = jnp.concatenate(taps, axis=-1)     # [N, PH, PW, K]
            if spatial_major:
                s = jnp.transpose(s, (1, 2, 0, 3))  # [PH, PW, N, K]
            slabs.append(s.reshape(-1, K))
    return jnp.concatenate(slabs, axis=0), (N, PH, PW)            # [4*M, K]


def _conv_block(x_nhwc, w, gamma, beta):
    kH, kW, Cin, Cout = w.shape
    slab, (N, PH, PW) = _im2col_pool_slab(x_nhwc)
    M = N * PH * PW
    out = pl.pallas_call(
        functools.partial(_conv_block_kernel, m=M),
        out_shape=jax.ShapeDtypeStruct((M, Cout), MXU_DTYPE),
        in_specs=_vmem_specs(4),
        out_specs=pl.BlockSpec(memory_space=pltpu.MemorySpace.VMEM),
    )(slab.astype(MXU_DTYPE),
      w.reshape(kH * kW * Cin, Cout).astype(MXU_DTYPE),
      gamma.reshape(1, Cout).astype(jnp.float32),
      beta.reshape(1, Cout).astype(jnp.float32))
    return out.reshape(N, PH, PW, Cout)


def model_cnn_forward(x_nchw, params):
    # NCHW -> NHWC; bf16 activations feed the MXU, accumulation stays f32.
    x = jnp.transpose(x_nchw, (0, 2, 3, 1)).astype(MXU_DTYPE)

    blocks = params["blocks"]
    # Conv biases are intentionally unused: with training-mode (batch-stat)
    # BatchNorm a per-channel constant cancels exactly in (x - mean).
    for (w, _bias, g, be) in blocks[:2]:
        x = _conv_block(x, w, g, be)

    # ---- Block 3 fused with the classifier head --------------------------
    w3, _bias3, g3, be3 = blocks[2]
    kH, kW, Cin3, Cout3 = w3.shape
    slab, (N, PH, PW) = _im2col_pool_slab(x, spatial_major=True)
    S = PH * PW
    M = S * N

    w1, b1, w2, b2 = params["head"]
    # Permute w1 rows from PyTorch CHW-flatten order (c*S + s) to the kernel's
    # (s*Cout3 + c) order -> no in-kernel transpose/reshape of the features.
    w1r = (w1.reshape(Cout3, S, w1.shape[1])
             .transpose(1, 0, 2)
             .reshape(S * Cout3, w1.shape[1]))

    return pl.pallas_call(
        functools.partial(_conv_block_head_kernel, m=M, n=N, s_spatial=S),
        out_shape=jax.ShapeDtypeStruct((N, w2.shape[1]), jnp.float32),
        in_specs=_vmem_specs(8),
        out_specs=pl.BlockSpec(memory_space=pltpu.MemorySpace.VMEM),
    )(slab.astype(MXU_DTYPE),
      w3.reshape(kH * kW * Cin3, Cout3).astype(MXU_DTYPE),
      g3.reshape(1, Cout3).astype(jnp.float32),
      be3.reshape(1, Cout3).astype(jnp.float32),
      w1r.astype(jnp.float32),
      b1.reshape(1, -1).astype(jnp.float32),
      w2.astype(jnp.float32),
      b2.reshape(1, -1).astype(jnp.float32))


# ---------------------------------------------------------------------------
# Deterministic parameter initialization (shapes mirror modelCNN.__init__)
# ---------------------------------------------------------------------------
def init_params(key, height, width, channels):
    ks = jax.random.split(key, 7)

    def conv_p(k, cin, cout):
        kw_, kb_ = jax.random.split(k)
        w = jax.random.normal(kw_, (3, 3, cin, cout), jnp.float32) / float((9 * cin) ** 0.5)
        # Conv bias exists in the module but has no effect on the output
        # (cancelled by batch-statistic BatchNorm); kept for shape fidelity.
        b = jax.random.normal(kb_, (cout,), jnp.float32) * 0.05
        gamma = jnp.ones((cout,), jnp.float32)      # BatchNorm2d default init
        beta = jnp.zeros((cout,), jnp.float32)
        return (w, b, gamma, beta)

    blocks = [conv_p(ks[0], channels, 16),
              conv_p(ks[1], 16, 32),
              conv_p(ks[2], 32, 64)]

    # Mirror the spatial-size arithmetic from modelCNN.__init__.
    h, w = height, width
    for _ in range(3):
        h = (h + 2 - 3) // 2 + 1
        w = (w + 2 - 3) // 2 + 1
        h = (h - 2) // 2 + 1
        w = (w - 2) // 2 + 1
    flat = h * w * 64

    w1 = jax.random.normal(ks[3], (flat, 10), jnp.float32) / float(flat ** 0.5)
    b1 = jax.random.normal(ks[4], (10,), jnp.float32) * 0.05
    w2 = jax.random.normal(ks[5], (10, 2), jnp.float32) / float(10 ** 0.5)
    b2 = jax.random.normal(ks[6], (2,), jnp.float32) * 0.05
    return {"blocks": blocks, "head": (w1, b1, w2, b2)}


if __name__ == "__main__":
    # Small shapes consistent with the module: HEIGHT=WIDTH=64, CHANNELS=3, batch=2.
    HEIGHT = WIDTH = 64
    CHANNELS = 3
    N = 2

    key = jax.random.PRNGKey(0)
    kp, kx = jax.random.split(key)
    params = init_params(kp, HEIGHT, WIDTH, CHANNELS)
    x = jax.random.normal(kx, (N, CHANNELS, HEIGHT, WIDTH), jnp.float32)  # NCHW like PyTorch

    out = jax.jit(model_cnn_forward)(x, params)
    out = jax.block_until_ready(out)
    assert out.shape == (N, 2), out.shape
    print("KERNEL_OK")
</pallas_src>

<mosaic_0001>
module attributes {stable_mosaic.version = 11 : i64} {
  func.func @_conv_block_kernel(%arg0: memref<2048x27xbf16, #tpu.memory_space<vmem>>, %arg1: memref<27x16xbf16, #tpu.memory_space<vmem>>, %arg2: memref<1x16xf32, #tpu.memory_space<vmem>>, %arg3: memref<1x16xf32, #tpu.memory_space<vmem>>, %arg4: memref<512x16xbf16, #tpu.memory_space<vmem>>) attributes {dimension_semantics = [], scalar_prefetch = 0 : i64, scratch_operands = 0 : i64, tpu.core_type = #tpu.core_type<tc>} {
    %c0 = arith.constant 0 : index
    %c0_0 = arith.constant 0 : index
    %0 = vector.load %arg0[%c0, %c0_0] : memref<2048x27xbf16, #tpu.memory_space<vmem>>, vector<2048x27xbf16>
    %c0_1 = arith.constant 0 : index
    %c0_2 = arith.constant 0 : index
    %1 = vector.load %arg1[%c0_1, %c0_2] : memref<27x16xbf16, #tpu.memory_space<vmem>>, vector<27x16xbf16>
    %cst = arith.constant dense<0.000000e+00> : vector<2048x16xf32>
    %2 = tpu.matmul %0, %1, %cst {dimension_numbers = #tpu.dot_dimension_numbers<[1], [0], [0], [1], [0, 0, 1, 1], [], []>} : vector<2048x27xbf16>, vector<27x16xbf16>, vector<2048x16xf32> -> vector<2048x16xf32>
    %c0_3 = arith.constant 0 : index
    %c0_4 = arith.constant 0 : index
    %3 = vector.load %arg2[%c0_3, %c0_4] : memref<1x16xf32, #tpu.memory_space<vmem>>, vector<1x16xf32>
    %c0_5 = arith.constant 0 : index
    %c0_6 = arith.constant 0 : index
    %4 = vector.load %arg3[%c0_5, %c0_6] : memref<1x16xf32, #tpu.memory_space<vmem>>, vector<1x16xf32>
    %cst_7 = arith.constant dense<0.000000e+00> : vector<16xf32>
    %5 = vector.multi_reduction <add>, %2, %cst_7 [0] : vector<2048x16xf32> to vector<16xf32>
    %6 = vector.shape_cast %5 : vector<16xf32> to vector<1x16xf32>
    %cst_8 = arith.constant 4.8828125E-4 : f32
    %7 = vector.broadcast %cst_8 : f32 to vector<1x16xf32>
    %8 = arith.mulf %6, %7 : vector<1x16xf32>
    %9 = arith.mulf %2, %2 : vector<2048x16xf32>
    %cst_9 = arith.constant dense<0.000000e+00> : vector<16xf32>
    %10 = vector.multi_reduction <add>, %9, %cst_9 [0] : vector<2048x16xf32> to vector<16xf32>
    %11 = vector.shape_cast %10 : vector<16xf32> to vector<1x16xf32>
    %cst_10 = arith.constant 4.8828125E-4 : f32
    %12 = vector.broadcast %cst_10 : f32 to vector<1x16xf32>
    %13 = arith.mulf %11, %12 : vector<1x16xf32>
    %14 = arith.mulf %8, %8 : vector<1x16xf32>
    %15 = arith.subf %13, %14 : vector<1x16xf32>
    %cst_11 = arith.constant 0.000000e+00 : f32
    %16 = vector.broadcast %cst_11 : f32 to vector<1x16xf32>
    %17 = arith.maximumf %15, %16 : vector<1x16xf32>
    %cst_12 = arith.constant 9.99999974E-6 : f32
    %18 = vector.broadcast %cst_12 : f32 to vector<1x16xf32>
    %19 = arith.addf %17, %18 : vector<1x16xf32>
    %20 = math.rsqrt %19 : vector<1x16xf32>
    %21 = arith.mulf %3, %20 : vector<1x16xf32>
    %22 = arith.mulf %8, %21 : vector<1x16xf32>
    %23 = arith.subf %4, %22 : vector<1x16xf32>
    %24 = vector.extract_strided_slice %2 {offsets = [0, 0], sizes = [512, 16], strides = [1, 1]} : vector<2048x16xf32> to vector<512x16xf32>
    %25 = vector.extract_strided_slice %2 {offsets = [512, 0], sizes = [512, 16], strides = [1, 1]} : vector<2048x16xf32> to vector<512x16xf32>
    %26 = vector.extract_strided_slice %2 {offsets = [1024, 0], sizes = [512, 16], strides = [1, 1]} : vector<2048x16xf32> to vector<512x16xf32>
    %27 = vector.extract_strided_slice %2 {offsets = [1536, 0], sizes = [512, 16], strides = [1, 1]} : vector<2048x16xf32> to vector<512x16xf32>
    %28 = arith.maximumf %24, %25 : vector<512x16xf32>
    %29 = arith.maximumf %26, %27 : vector<512x16xf32>
    %30 = arith.maximumf %28, %29 : vector<512x16xf32>
    %31 = arith.minimumf %24, %25 : vector<512x16xf32>
    %32 = arith.minimumf %26, %27 : vector<512x16xf32>
    %33 = arith.minimumf %31, %32 : vector<512x16xf32>
    %cst_13 = arith.constant 0.000000e+00 : f32
    %34 = vector.broadcast %cst_13 : f32 to vector<1x16xf32>
    %35 = arith.cmpf oge, %21, %34 : vector<1x16xf32>
    %36 = vector.shape_cast %35 : vector<1x16xi1> to vector<1x16xi1>
    %37 = vector.broadcast %36 : vector<1x16xi1> to vector<512x16xi1>
    %38 = arith.select %37, %30, %33 : vector<512x16xi1>, vector<512x16xf32>
    %39 = vector.broadcast %21 : vector<1x16xf32> to vector<512x16xf32>
    %40 = arith.mulf %38, %39 : vector<512x16xf32>
    %41 = vector.broadcast %23 : vector<1x16xf32> to vector<512x16xf32>
    %42 = arith.addf %40, %41 : vector<512x16xf32>
    %cst_14 = arith.constant 0.000000e+00 : f32
    %43 = vector.broadcast %cst_14 : f32 to vector<512x16xf32>
    %44 = arith.maximumf %42, %43 : vector<512x16xf32>
    %45 = arith.truncf %44 : vector<512x16xf32> to vector<512x16xbf16>
    %c0_15 = arith.constant 0 : index
    %c0_16 = arith.constant 0 : index
    %46 = vector.load %arg4[%c0_15, %c0_16] : memref<512x16xbf16, #tpu.memory_space<vmem>>, vector<512x16xbf16>
    tpu.vector_store %arg4[%c0_15, %c0_16], %45 {strides = array<i32>} : memref<512x16xbf16, #tpu.memory_space<vmem>>, vector<512x16xbf16>,
    return
  }
}

module attributes {stable_mosaic.version = 11 : i64} {
  func.func @_conv_block_kernel(%arg0: memref<128x144xbf16, #tpu.memory_space<vmem>>, %arg1: memref<144x32xbf16, #tpu.memory_space<vmem>>, %arg2: memref<1x32xf32, #tpu.memory_space<vmem>>, %arg3: memref<1x32xf32, #tpu.memory_space<vmem>>, %arg4: memref<32x32xbf16, #tpu.memory_space<vmem>>) attributes {dimension_semantics = [], scalar_prefetch = 0 : i64, scratch_operands = 0 : i64, tpu.core_type = #tpu.core_type<tc>} {
    %c0 = arith.constant 0 : index
    %c0_0 = arith.constant 0 : index
    %0 = vector.load %arg0[%c0, %c0_0] : memref<128x144xbf16, #tpu.memory_space<vmem>>, vector<128x144xbf16>
    %c0_1 = arith.constant 0 : index
    %c0_2 = arith.constant 0 : index
    %1 = vector.load %arg1[%c0_1, %c0_2] : memref<144x32xbf16, #tpu.memory_space<vmem>>, vector<144x32xbf16>
    %cst = arith.constant dense<0.000000e+00> : vector<128x32xf32>
    %2 = tpu.matmul %0, %1, %cst {dimension_numbers = #tpu.dot_dimension_numbers<[1], [0], [0], [1], [0, 0, 1, 1], [], []>} : vector<128x144xbf16>, vector<144x32xbf16>, vector<128x32xf32> -> vector<128x32xf32>
    %c0_3 = arith.constant 0 : index
    %c0_4 = arith.constant 0 : index
    %3 = vector.load %arg2[%c0_3, %c0_4] : memref<1x32xf32, #tpu.memory_space<vmem>>, vector<1x32xf32>
    %c0_5 = arith.constant 0 : index
    %c0_6 = arith.constant 0 : index
    %4 = vector.load %arg3[%c0_5, %c0_6] : memref<1x32xf32, #tpu.memory_space<vmem>>, vector<1x32xf32>
    %cst_7 = arith.constant dense<0.000000e+00> : vector<32xf32>
    %5 = vector.multi_reduction <add>, %2, %cst_7 [0] : vector<128x32xf32> to vector<32xf32>
    %6 = vector.shape_cast %5 : vector<32xf32> to vector<1x32xf32>
    %cst_8 = arith.constant 7.812500e-03 : f32
    %7 = vector.broadcast %cst_8 : f32 to vector<1x32xf32>
    %8 = arith.mulf %6, %7 : vector<1x32xf32>
    %9 = arith.mulf %2, %2 : vector<128x32xf32>
    %cst_9 = arith.constant dense<0.000000e+00> : vector<32xf32>
    %10 = vector.multi_reduction <add>, %9, %cst_9 [0] : vector<128x32xf32> to vector<32xf32>
    %11 = vector.shape_cast %10 : vector<32xf32> to vector<1x32xf32>
    %cst_10 = arith.constant 7.812500e-03 : f32
    %12 = vector.broadcast %cst_10 : f32 to vector<1x32xf32>
    %13 = arith.mulf %11, %12 : vector<1x32xf32>
    %14 = arith.mulf %8, %8 : vector<1x32xf32>
    %15 = arith.subf %13, %14 : vector<1x32xf32>
    %cst_11 = arith.constant 0.000000e+00 : f32
    %16 = vector.broadcast %cst_11 : f32 to vector<1x32xf32>
    %17 = arith.maximumf %15, %16 : vector<1x32xf32>
    %cst_12 = arith.constant 9.99999974E-6 : f32
    %18 = vector.broadcast %cst_12 : f32 to vector<1x32xf32>
    %19 = arith.addf %17, %18 : vector<1x32xf32>
    %20 = math.rsqrt %19 : vector<1x32xf32>
    %21 = arith.mulf %3, %20 : vector<1x32xf32>
    %22 = arith.mulf %8, %21 : vector<1x32xf32>
    %23 = arith.subf %4, %22 : vector<1x32xf32>
    %24 = vector.extract_strided_slice %2 {offsets = [0, 0], sizes = [32, 32], strides = [1, 1]} : vector<128x32xf32> to vector<32x32xf32>
    %25 = vector.extract_strided_slice %2 {offsets = [32, 0], sizes = [32, 32], strides = [1, 1]} : vector<128x32xf32> to vector<32x32xf32>
    %26 = vector.extract_strided_slice %2 {offsets = [64, 0], sizes = [32, 32], strides = [1, 1]} : vector<128x32xf32> to vector<32x32xf32>
    %27 = vector.extract_strided_slice %2 {offsets = [96, 0], sizes = [32, 32], strides = [1, 1]} : vector<128x32xf32> to vector<32x32xf32>
    %28 = arith.maximumf %24, %25 : vector<32x32xf32>
    %29 = arith.maximumf %26, %27 : vector<32x32xf32>
    %30 = arith.maximumf %28, %29 : vector<32x32xf32>
    %31 = arith.minimumf %24, %25 : vector<32x32xf32>
    %32 = arith.minimumf %26, %27 : vector<32x32xf32>
    %33 = arith.minimumf %31, %32 : vector<32x32xf32>
    %cst_13 = arith.constant 0.000000e+00 : f32
    %34 = vector.broadcast %cst_13 : f32 to vector<1x32xf32>
    %35 = arith.cmpf oge, %21, %34 : vector<1x32xf32>
    %36 = vector.shape_cast %35 : vector<1x32xi1> to vector<1x32xi1>
    %37 = vector.broadcast %36 : vector<1x32xi1> to vector<32x32xi1>
    %38 = arith.select %37, %30, %33 : vector<32x32xi1>, vector<32x32xf32>
    %39 = vector.broadcast %21 : vector<1x32xf32> to vector<32x32xf32>
    %40 = arith.mulf %38, %39 : vector<32x32xf32>
    %41 = vector.broadcast %23 : vector<1x32xf32> to vector<32x32xf32>
    %42 = arith.addf %40, %41 : vector<32x32xf32>
    %cst_14 = arith.constant 0.000000e+00 : f32
    %43 = vector.broadcast %cst_14 : f32 to vector<32x32xf32>
    %44 = arith.maximumf %42, %43 : vector<32x32xf32>
    %45 = arith.truncf %44 : vector<32x32xf32> to vector<32x32xbf16>
    %c0_15 = arith.constant 0 : index
    %c0_16 = arith.constant 0 : index
    %46 = vector.load %arg4[%c0_15, %c0_16] : memref<32x32xbf16, #tpu.memory_space<vmem>>, vector<32x32xbf16>
    tpu.vector_store %arg4[%c0_15, %c0_16], %45 {strides = array<i32>} : memref<32x32xbf16, #tpu.memory_space<vmem>>, vector<32x32xbf16>,
    return
  }
}

module attributes {stable_mosaic.version = 11 : i64} {
  func.func @_conv_block_head_kernel(%arg0: memref<8x288xbf16, #tpu.memory_space<vmem>>, %arg1: memref<288x64xbf16, #tpu.memory_space<vmem>>, %arg2: memref<1x64xf32, #tpu.memory_space<vmem>>, %arg3: memref<1x64xf32, #tpu.memory_space<vmem>>, %arg4: memref<64x10xf32, #tpu.memory_space<vmem>>, %arg5: memref<1x10xf32, #tpu.memory_space<vmem>>, %arg6: memref<10x2xf32, #tpu.memory_space<vmem>>, %arg7: memref<1x2xf32, #tpu.memory_space<vmem>>, %arg8: memref<2x2xf32, #tpu.memory_space<vmem>>) attributes {dimension_semantics = [], scalar_prefetch = 0 : i64, scratch_operands = 0 : i64, tpu.core_type = #tpu.core_type<tc>} {
    %c0 = arith.constant 0 : index
    %c0_0 = arith.constant 0 : index
    %0 = vector.load %arg0[%c0, %c0_0] : memref<8x288xbf16, #tpu.memory_space<vmem>>, vector<8x288xbf16>
    %c0_1 = arith.constant 0 : index
    %c0_2 = arith.constant 0 : index
    %1 = vector.load %arg1[%c0_1, %c0_2] : memref<288x64xbf16, #tpu.memory_space<vmem>>, vector<288x64xbf16>
    %cst = arith.constant dense<0.000000e+00> : vector<8x64xf32>
    %2 = tpu.matmul %0, %1, %cst {dimension_numbers = #tpu.dot_dimension_numbers<[1], [0], [0], [1], [0, 0, 1, 1], [], []>} : vector<8x288xbf16>, vector<288x64xbf16>, vector<8x64xf32> -> vector<8x64xf32>
    %c0_3 = arith.constant 0 : index
    %c0_4 = arith.constant 0 : index
    %3 = vector.load %arg2[%c0_3, %c0_4] : memref<1x64xf32, #tpu.memory_space<vmem>>, vector<1x64xf32>
    %c0_5 = arith.constant 0 : index
    %c0_6 = arith.constant 0 : index
    %4 = vector.load %arg3[%c0_5, %c0_6] : memref<1x64xf32, #tpu.memory_space<vmem>>, vector<1x64xf32>
    %cst_7 = arith.constant dense<0.000000e+00> : vector<64xf32>
    %5 = vector.multi_reduction <add>, %2, %cst_7 [0] : vector<8x64xf32> to vector<64xf32>
    %6 = vector.shape_cast %5 : vector<64xf32> to vector<1x64xf32>
    %cst_8 = arith.constant 1.250000e-01 : f32
    %7 = vector.broadcast %cst_8 : f32 to vector<1x64xf32>
    %8 = arith.mulf %6, %7 : vector<1x64xf32>
    %9 = arith.mulf %2, %2 : vector<8x64xf32>
    %cst_9 = arith.constant dense<0.000000e+00> : vector<64xf32>
    %10 = vector.multi_reduction <add>, %9, %cst_9 [0] : vector<8x64xf32> to vector<64xf32>
    %11 = vector.shape_cast %10 : vector<64xf32> to vector<1x64xf32>
    %cst_10 = arith.constant 1.250000e-01 : f32
    %12 = vector.broadcast %cst_10 : f32 to vector<1x64xf32>
    %13 = arith.mulf %11, %12 : vector<1x64xf32>
    %14 = arith.mulf %8, %8 : vector<1x64xf32>
    %15 = arith.subf %13, %14 : vector<1x64xf32>
    %cst_11 = arith.constant 0.000000e+00 : f32
    %16 = vector.broadcast %cst_11 : f32 to vector<1x64xf32>
    %17 = arith.maximumf %15, %16 : vector<1x64xf32>
    %cst_12 = arith.constant 9.99999974E-6 : f32
    %18 = vector.broadcast %cst_12 : f32 to vector<1x64xf32>
    %19 = arith.addf %17, %18 : vector<1x64xf32>
    %20 = math.rsqrt %19 : vector<1x64xf32>
    %21 = arith.mulf %3, %20 : vector<1x64xf32>
    %22 = arith.mulf %8, %21 : vector<1x64xf32>
    %23 = arith.subf %4, %22 : vector<1x64xf32>
    %24 = vector.extract_strided_slice %2 {offsets = [0, 0], sizes = [2, 64], strides = [1, 1]} : vector<8x64xf32> to vector<2x64xf32>
    %25 = vector.extract_strided_slice %2 {offsets = [2, 0], sizes = [2, 64], strides = [1, 1]} : vector<8x64xf32> to vector<2x64xf32>
    %26 = vector.extract_strided_slice %2 {offsets = [4, 0], sizes = [2, 64], strides = [1, 1]} : vector<8x64xf32> to vector<2x64xf32>
    %27 = vector.extract_strided_slice %2 {offsets = [6, 0], sizes = [2, 64], strides = [1, 1]} : vector<8x64xf32> to vector<2x64xf32>
    %28 = arith.maximumf %24, %25 : vector<2x64xf32>
    %29 = arith.maximumf %26, %27 : vector<2x64xf32>
    %30 = arith.maximumf %28, %29 : vector<2x64xf32>
    %31 = arith.minimumf %24, %25 : vector<2x64xf32>
    %32 = arith.minimumf %26, %27 : vector<2x64xf32>
    %33 = arith.minimumf %31, %32 : vector<2x64xf32>
    %cst_13 = arith.constant 0.000000e+00 : f32
    %34 = vector.broadcast %cst_13 : f32 to vector<1x64xf32>
    %35 = arith.cmpf oge, %21, %34 : vector<1x64xf32>
    %36 = vector.shape_cast %35 : vector<1x64xi1> to vector<1x64xi1>
    %37 = vector.broadcast %36 : vector<1x64xi1> to vector<2x64xi1>
    %38 = arith.select %37, %30, %33 : vector<2x64xi1>, vector<2x64xf32>
    %39 = vector.broadcast %21 : vector<1x64xf32> to vector<2x64xf32>
    %40 = arith.mulf %38, %39 : vector<2x64xf32>
    %41 = vector.broadcast %23 : vector<1x64xf32> to vector<2x64xf32>
    %42 = arith.addf %40, %41 : vector<2x64xf32>
    %cst_14 = arith.constant 0.000000e+00 : f32
    %43 = vector.broadcast %cst_14 : f32 to vector<2x64xf32>
    %44 = arith.maximumf %42, %43 : vector<2x64xf32>
    %c0_15 = arith.constant 0 : index
    %c0_16 = arith.constant 0 : index
    %45 = vector.load %arg4[%c0_15, %c0_16] : memref<64x10xf32, #tpu.memory_space<vmem>>, vector<64x10xf32>
    %cst_17 = arith.constant dense<0.000000e+00> : vector<2x10xf32>
    %46 = tpu.matmul %44, %45, %cst_17 {dimension_numbers = #tpu.dot_dimension_numbers<[1], [0], [0], [1], [0, 0, 1, 1], [], []>} : vector<2x64xf32>, vector<64x10xf32>, vector<2x10xf32> -> vector<2x10xf32>
    %c0_18 = arith.constant 0 : index
    %c0_19 = arith.constant 0 : index
    %47 = vector.load %arg5[%c0_18, %c0_19] : memref<1x10xf32, #tpu.memory_space<vmem>>, vector<1x10xf32>
    %48 = vector.broadcast %47 : vector<1x10xf32> to vector<2x10xf32>
    %49 = arith.addf %46, %48 : vector<2x10xf32>
    %cst_20 = arith.constant dense<0xFF800000> : vector<2xf32>
    %50 = vector.multi_reduction <maximumf>, %49, %cst_20 [1] : vector<2x10xf32> to vector<2xf32>
    %51 = vector.shape_cast %50 : vector<2xf32> to vector<2x1xf32>
    %52 = vector.broadcast %51 : vector<2x1xf32> to vector<2x10xf32>
    %53 = arith.subf %49, %52 : vector<2x10xf32>
    %54 = math.exp %53 : vector<2x10xf32>
    %cst_21 = arith.constant dense<0.000000e+00> : vector<2xf32>
    %55 = vector.multi_reduction <add>, %54, %cst_21 [1] : vector<2x10xf32> to vector<2xf32>
    %56 = vector.shape_cast %55 : vector<2xf32> to vector<2x1xf32>
    %57 = vector.broadcast %56 : vector<2x1xf32> to vector<2x10xf32>
    %58 = arith.divf %54, %57 : vector<2x10xf32>
    %c0_22 = arith.constant 0 : index
    %c0_23 = arith.constant 0 : index
    %59 = vector.load %arg6[%c0_22, %c0_23] : memref<10x2xf32, #tpu.memory_space<vmem>>, vector<10x2xf32>
    %cst_24 = arith.constant dense<0.000000e+00> : vector<2x2xf32>
    %60 = tpu.matmul %58, %59, %cst_24 {dimension_numbers = #tpu.dot_dimension_numbers<[1], [0], [0], [1], [0, 0, 1, 1], [], []>} : vector<2x10xf32>, vector<10x2xf32>, vector<2x2xf32> -> vector<2x2xf32>
    %c0_25 = arith.constant 0 : index
    %c0_26 = arith.constant 0 : index
    %61 = vector.load %arg7[%c0_25, %c0_26] : memref<1x2xf32, #tpu.memory_space<vmem>>, vector<1x2xf32>
    %62 = vector.broadcast %61 : vector<1x2xf32> to vector<2x2xf32>
    %63 = arith.addf %60, %62 : vector<2x2xf32>
    %c0_27 = arith.constant 0 : index
    %c0_28 = arith.constant 0 : index
    %64 = vector.load %arg8[%c0_27, %c0_28] : memref<2x2xf32, #tpu.memory_space<vmem>>, vector<2x2xf32>
    tpu.vector_store %arg8[%c0_27, %c0_28], %63 {strides = array<i32>} : memref<2x2xf32, #tpu.memory_space<vmem>>, vector<2x2xf32>,
    return
  }
}

</mosaic_0001>

<bundles_post_ra>
// kernel: model_cnn_forward.4
= control target key start
LH: loop header
LB: loop body
LE: loop exit
PB: predicated region body
PF: predicated region fallthrough
CT: control target
= control target key end

     0   :  { %vm178_vm0 = vcmask 130048   ;;  %vm303_vm1 = vcmask 261120   ;;  %vm467_vm7 = vcmask 257024   ;;  %s988_s1 = inlined_call_operand.vmem [shape: bf16[144,32], index: 1, kind: input, shape index: {}]   ;;  %s989_s0 = inlined_call_operand.vmem [shape: bf16[128,144], index: 0, kind: input, shape index: {}]   ;;  %s990_s2 = inlined_call_operand.vmem [shape: f32[1,32], index: 2, kind: input, shape index: {}]   ;;  %s991_s3 = inlined_call_operand.vmem [shape: f32[1,32], index: 3, kind: input, shape index: {}]   ;;  %s992_s4 = inlined_call_operand.vmem [shape: bf16[32,32], index: 4, kind: output, shape index: {}]  }
   0x1   :  { %v607_v0 = vld [vmem:[%s988_s1 + $0x38] sm:$0xff]  ;;  %v608_v1 = vld [vmem:[%s988_s1 + $0x40] sm:$0xff]  ;;  %v480_v3 = vld [vmem:[%s989_s0 + $0x8] sm:$0xf0] }
   0x2   :  { %v584_v2 = vld [vmem:[%s989_s0 + $0x4] sm:$0xf]  ;;  %203 = vmatpush.bf16.msra.mxu0 %v607_v0  ;;  %609 = vmatpush.bf16.msra.mxu2 %v607_v0  ;;  %v606_v5 = vld [vmem:[%s988_s1 + $0x30] sm:$0xff]  ;;  %v605_v6 = vld [vmem:[%s988_s1 + $0x28] sm:$0xff] }
   0x3   :  { %v483_v4 = vor.u32 %v584_v2, %v480_v3  ;;  %259 = vmatpush.bf16.msra.mxu1 %v608_v1  ;;  %617 = vmatpush.bf16.msra.mxu3 %v608_v1  ;;  %v604_v7 = vld [vmem:[%s988_s1 + $0x20] sm:$0xff]  ;;  %v603_v8 = vld [vmem:[%s988_s1 + $0x18] sm:$0xff]  ;;  %v586_v9 = vld [vmem:[%s989_s0 + $0x14] sm:$0xf] }
   0x4   :  { %v488_v10 = vld [vmem:[%s989_s0 + $0x18] sm:$0xf0]  ;;  %v594_v11 = vld [vmem:[%s989_s0 + $0x54] sm:$0xf]  ;;  %v601_v16 = vld [vmem:[%s988_s1 + $0x8] sm:$0xff] }
   0x5   :  { %v520_v12 = vld [vmem:[%s989_s0 + $0x58] sm:$0xf0]  ;;  %v491_v14 = vor.u32 %v586_v9, %v488_v10  ;;  %v602_v15 = vld [vmem:[%s988_s1 + $0x10] sm:$0xff]  ;;  %v600_v17 = vld [vmem:[%s988_s1] sm:$0xff] }
   0x6   :  { %576 = vmatmul.msk.bf16.vlgmr.msra.gmra.mxu1 %vm178_vm0, %v483_v4  ;;  %204 = vmatpush.bf16.msra.mxu0 %v606_v5  ;;  %v523_v13 = vor.u32 %v594_v11, %v520_v12  ;;  %v478_v18 = vld [vmem:[%s989_s0] sm:$0xf]  ;;  %v585_v19 = vld [vmem:[%s989_s0 + $0x4] sm:$0xf0]  ;;  %v588_v24 = vld [vmem:[%s989_s0 + $0x24] sm:$0xf] }
   0x7   :  { %610 = vmatpush.bf16.msra.mxu2 %v606_v5  ;;  %v510_v20 = vld [vmem:[%s989_s0 + $0x40] sm:$0xf]  ;;  %v593_v21 = vld [vmem:[%s989_s0 + $0x44] sm:$0xf0]  ;;  %v479_v22 = vor.u32 %v585_v19, %v478_v18  ;;  %v496_v25 = vld [vmem:[%s989_s0 + $0x28] sm:$0xf0] }
   0x8   :  { %581 = vmatmul.msk.bf16.vlgmr.msra.gmra.mxu3 %vm178_vm0, %v523_v13  ;;  %v511_v23 = vor.u32 %v593_v21, %v510_v20  ;;  %v596_v26 = vld [vmem:[%s989_s0 + $0x64] sm:$0xf]  ;;  %v528_v27 = vld [vmem:[%s989_s0 + $0x68] sm:$0xf0]  ;;  %v499_v29 = vor.u32 %v588_v24, %v496_v25  ;;  %v486_v30 = vld [vmem:[%s989_s0 + $0x10] sm:$0xf] }
   0x9   :  { %v531_v28 = vor.u32 %v596_v26, %v528_v27  ;;  %v587_v31 = vld [vmem:[%s989_s0 + $0x14] sm:$0xf0]  ;;  %v518_v32 = vld [vmem:[%s989_s0 + $0x50] sm:$0xf]  ;;  %v590_v36 = vld [vmem:[%s989_s0 + $0x34] sm:$0xf] }
   0xa   :  { %205 = vmatpush.bf16.msra.mxu0 %v605_v6  ;;  %v595_v33 = vld [vmem:[%s989_s0 + $0x54] sm:$0xf0]  ;;  %v487_v34 = vor.u32 %v587_v31, %v486_v30  ;;  %v504_v37 = vld [vmem:[%s989_s0 + $0x38] sm:$0xf0]  ;;  %v598_v38 = vld [vmem:[%s989_s0 + $0x74] sm:$0xf] }
   0xb   :  { %611 = vmatpush.bf16.msra.mxu2 %v605_v6  ;;  %v519_v35 = vor.u32 %v595_v33, %v518_v32  ;;  %v536_v39 = vld [vmem:[%s989_s0 + $0x78] sm:$0xf0]  ;;  %v507_v41 = vor.u32 %v590_v36, %v504_v37  ;;  %v494_v42 = vld [vmem:[%s989_s0 + $0x20] sm:$0xf]  ;;  %v589_v43 = vld [vmem:[%s989_s0 + $0x24] sm:$0xf0] }
   0xc   :  { %v539_v40 = vor.u32 %v598_v38, %v536_v39  ;;  %v526_v44 = vld [vmem:[%s989_s0 + $0x60] sm:$0xf]  ;;  %v597_v45 = vld [vmem:[%s989_s0 + $0x64] sm:$0xf0]  ;;  %v495_v46 = vor.u32 %v589_v43, %v494_v42  ;;  %v592_v48 = vld [vmem:[%s989_s0 + $0x44] sm:$0xf] }
   0xd   :  { %v527_v47 = vor.u32 %v597_v45, %v526_v44  ;;  %v512_v49 = vld [vmem:[%s989_s0 + $0x48] sm:$0xf0]  ;;  %v502_v51 = vld [vmem:[%s989_s0 + $0x30] sm:$0xf]  ;;  %v591_v52 = vld [vmem:[%s989_s0 + $0x34] sm:$0xf0] }
   0xe   :  { %206 = vmatpush.bf16.msra.mxu0 %v604_v7  ;;  %v515_v50 = vor.u32 %v592_v48, %v512_v49  ;;  %v534_v53 = vld [vmem:[%s989_s0 + $0x70] sm:$0xf]  ;;  %v599_v54 = vld [vmem:[%s989_s0 + $0x74] sm:$0xf0]  ;;  %v503_v55 = vor.u32 %v591_v52, %v502_v51 }
   0xf   :  { %612 = vmatpush.bf16.msra.mxu2 %v604_v7  ;;  %v535_v56 = vor.u32 %v599_v54, %v534_v53 }
  0x12   :  { %207 = vmatpush.bf16.msra.mxu0 %v603_v8 }
  0x13   :  { %613 = vmatpush.bf16.msra.mxu2 %v603_v8 }
  0x16   :  { %577 = vmatmul.msk.bf16.gmra.mxu1 %vm178_vm0, %v491_v14  ;;  %208 = vmatpush.bf16.msra.mxu0 %v602_v15 }
  0x17   :  { %614 = vmatpush.bf16.msra.mxu2 %v602_v15 }
  0x18   :  { %582 = vmatmul.msk.bf16.gmra.mxu3 %vm178_vm0, %v531_v28 }
  0x1a   :  { %209 = vmatpush.bf16.msra.mxu0 %v601_v16 }
  0x1b   :  { %615 = vmatpush.bf16.msra.mxu2 %v601_v16 }
  0x1e   :  { %210 = vmatpush.bf16.msra.mxu0 %v600_v17 }
  0x1f   :  { %616 = vmatpush.bf16.msra.mxu2 %v600_v17 }
  0x21   :  { %211 = vmatmul.bf16.vlgmr.msra.gmra.mxu0 %v479_v22 }
  0x22   :  { %231 = vmatmul.bf16.vlgmr.msra.gmra.mxu2 %v511_v23 }
  0x26   :  { %578 = vmatmul.msk.bf16.gmra.mxu1 %vm178_vm0, %v499_v29 }
  0x28   :  { %583 = vmatmul.msk.bf16.gmra.mxu3 %vm178_vm0, %v539_v40 }
  0x31   :  { %216 = vmatmul.bf16.gmra.mxu0 %v487_v34 }
  0x32   :  { %236 = vmatmul.bf16.gmra.mxu2 %v519_v35 }
  0x36   :  { %579 = vmatmul.msk.bf16.gmra.mxu1 %vm178_vm0, %v507_v41 }
  0x41   :  { %221 = vmatmul.bf16.gmra.mxu0 %v495_v46 }
  0x42   :  { %241 = vmatmul.bf16.gmra.mxu2 %v527_v47 }
  0x46   :  { %580 = vmatmul.msk.bf16.gmra.mxu1 %vm178_vm0, %v515_v50 }
  0x51   :  { %226 = vmatmul.bf16.gmra.mxu0 %v503_v55 }
  0x52   :  { %246 = vmatmul.bf16.gmra.mxu2 %v535_v56 }
  0x83   :  { %v261_v57 = vpop.f32.mrf.mxu1 }
  0x8b   :  { %v263_v58 = vpop.f32.mrf.mxu1  ;;  %v780_v4 = vpop.f32.mrf.mxu3 }
  0x93   :  { %v266_v59 = vpop.f32.mrf.mxu1  ;;  %v784_v8 = vpop.f32.mrf.mxu3 }
  0x9b   :  { %v268_v60 = vpop.f32.mrf.mxu1  ;;  %v796_v16 = vpop.f32.mrf.mxu3 }
  0x9e   :  { %v212_v61 = vpop.f32.mrf.mxu0 }
  0x9f   :  { %v788_v11 = vadd.f32 %v261_v57, %v212_v61 }
  0xa1   :  { %v342_v25 = vmul.f32 %v788_v11, %v788_v11  ;;  %v304_v30 = vsel %vm303_vm1, %v788_v11, 0.0 }
  0xa3   :  { %v271_v62 = vpop.f32.mrf.mxu1  ;;  %v827_v34 = vpop.f32.mrf.mxu3  ;;  %v358_v35 = vsel %vm303_vm1, %v342_v25, 0.0 }
  0xa5   :  { %v232_v63 = vpop.f32.mrf.mxu2 }
  0xa6   :  { %v214_v0 = vpop.f32.mrf.mxu0 }
  0xa7   :  { %v798_v17 = vadd.f32 %v263_v58, %v214_v0 }
  0xa9   :  { %v343_v22 = vmul.f32 %v798_v17, %v798_v17  ;;  %v305_v28 = vsel %vm303_vm1, %v798_v17, 0.0 }
  0xaa   :  { %v306_v36 = vadd.f32 %v305_v28, %v304_v30 }
  0xab   :  { %v273_v1 = vpop.f32.mrf.mxu1  ;;  %v359_v31 = vsel %vm303_vm1, %v343_v22, 0.0  ;;  %v296_v25 = vpop.f32.mrf.mxu3 }
  0xac   :  { %v360_v43 = vadd.f32 %v359_v31, %v358_v35 }
  0xad   :  { %v778_v2 = vpop.f32.mrf.mxu2 }
  0xae   :  { %v217_v3 = vpop.f32.mrf.mxu0 }
  0xaf   :  { %v802_v20 = vadd.f32 %v266_v59, %v217_v3 }
  0xb1   :  { %v344_v29 = vmul.f32 %v802_v20, %v802_v20  ;;  %v307_v32 = vsel %vm303_vm1, %v802_v20, 0.0 }
  0xb2   :  { %v308_v44 = vadd.f32 %v307_v32, %v306_v36 }
  0xb3   :  { %v276_v6 = vpop.f32.mrf.mxu1  ;;  %v361_v39 = vsel %vm303_vm1, %v344_v29, 0.0 }
  0xb4   :  { %v362_v49 = vadd.f32 %v361_v39, %v360_v43 }
  0xb5   :  { %v782_v5 = vpop.f32.mrf.mxu2 }
  0xb6   :  { %v219_v7 = vpop.f32.mrf.mxu0 }
  0xb7   :  { %v808_v23 = vadd.f32 %v268_v60, %v219_v7 }
  0xb9   :  { %v345_v33 = vmul.f32 %v808_v23, %v808_v23  ;;  %v309_v40 = vsel %vm303_vm1, %v808_v23, 0.0 }
  0xba   :  { %v310_v50 = vadd.f32 %v309_v40, %v308_v44 }
  0xbb   :  { %v278_v13 = vpop.f32.mrf.mxu1  ;;  %v363_v45 = vsel %vm303_vm1, %v345_v33, 0.0 }
  0xbc   :  { %v364_v55 = vadd.f32 %v363_v45, %v362_v49 }
  0xbd   :  { %v786_v9 = vpop.f32.mrf.mxu2 }
  0xbe   :  { %v222_v10 = vpop.f32.mrf.mxu0  ;;  %v878_v29 = vadd.f32 %v784_v8, %v786_v9 }
  0xbf   :  { %v790_v12 = vadd.f32 %v271_v62, %v222_v10 }
  0xc0   :  { %v325_v49 = vsel %vm303_vm1, %v878_v29, 0.0 }
  0xc1   :  { %v413_v14 = vmax.f32 %v788_v11, %v790_v12  ;;  %v425_v15 = vmin.f32 %v788_v11, %v790_v12  ;;  %v346_v41 = vmul.f32 %v790_v12, %v790_v12  ;;  %v311_v46 = vsel %vm303_vm1, %v790_v12, 0.0 }
  0xc2   :  { %v312_v56 = vadd.f32 %v311_v46, %v310_v50 }
  0xc3   :  { %v281_v26 = vpop.f32.mrf.mxu1  ;;  %v365_v52 = vsel %vm303_vm1, %v346_v41, 0.0  ;;  %v353_v41 = vmul.f32 %v878_v29, %v878_v29 }
  0xc4   :  { %v851_v57 = vadd.f32 %v281_v26, %v232_v63  ;;  %v366_v61 = vadd.f32 %v365_v52, %v364_v55  ;;  %v864_v63 = vadd.f32 %v780_v4, %v782_v5  ;;  %v298_v55 = vpop.f32.mrf.mxu3 }
  0xc5   :  { %v800_v18 = vpop.f32.mrf.mxu2 }
  0xc6   :  { %v224_v19 = vpop.f32.mrf.mxu0  ;;  %v350_v7 = vmul.f32 %v851_v57, %v851_v57  ;;  %v319_v30 = vsel %vm303_vm1, %v851_v57, 0.0  ;;  %v352_v36 = vmul.f32 %v864_v63, %v864_v63  ;;  %v323_v40 = vsel %vm303_vm1, %v864_v63, 0.0 }
  0xc7   :  { %v804_v21 = vadd.f32 %v273_v1, %v224_v19  ;;  %v896_v43 = vadd.f32 %v796_v16, %v800_v18  ;;  %v379_v18 = vsel %vm303_vm1, %v353_v41, 0.0 }
  0xc9   :  { %v414_v24 = vmax.f32 %v798_v17, %v804_v21  ;;  %v426_v27 = vmin.f32 %v798_v17, %v804_v21  ;;  %v347_v47 = vmul.f32 %v804_v21, %v804_v21  ;;  %v313_v53 = vsel %vm303_vm1, %v804_v21, 0.0 }
  0xca   :  { %v314_v62 = vadd.f32 %v313_v53, %v312_v56  ;;  %v354_v50 = vmul.f32 %v896_v43, %v896_v43  ;;  %v327_v56 = vsel %vm303_vm1, %v896_v43, 0.0 }
  0xcb   :  { %v283_v58 = vpop.f32.mrf.mxu1  ;;  %v367_v59 = vsel %vm303_vm1, %v347_v47, 0.0  ;;  %v377_v47 = vsel %vm303_vm1, %v352_v36, 0.0 }
  0xcc   :  { %v857_v1 = vadd.f32 %v283_v58, %v778_v2  ;;  %v368_v10 = vadd.f32 %v367_v59, %v366_v61 }
  0xcd   :  { %v244_v37 = vpop.f32.mrf.mxu2 }
  0xce   :  { %v227_v38 = vpop.f32.mrf.mxu0  ;;  %v351_v31 = vmul.f32 %v857_v1, %v857_v1  ;;  %v321_v39 = vsel %vm303_vm1, %v857_v1, 0.0  ;;  %v905_v52 = vadd.f32 %v827_v34, %v244_v37 }
  0xcf   :  { %v835_v42 = vadd.f32 %v276_v6, %v227_v38  ;;  %v373_v38 = vsel %vm303_vm1, %v350_v7, 0.0 }
  0xd0   :  { %v375_v44 = vsel %vm303_vm1, %v351_v31, 0.0  ;;  %v355_v58 = vmul.f32 %v905_v52, %v905_v52  ;;  %v329_v34 = vsel %vm303_vm1, %v905_v52, 0.0 }
  0xd1   :  { %v415_v48 = vmax.f32 %v802_v20, %v835_v42  ;;  %v427_v51 = vmin.f32 %v802_v20, %v835_v42  ;;  %v348_v54 = vmul.f32 %v835_v42, %v835_v42  ;;  %v315_v60 = vsel %vm303_vm1, %v835_v42, 0.0 }
  0xd2   :  { %v316_v19 = vadd.f32 %v315_v60, %v314_v62  ;;  %v381_v62 = vsel %vm303_vm1, %v354_v50, 0.0 }
  0xd3   :  { %v369_v3 = vsel %vm303_vm1, %v348_v54, 0.0 }
  0xd4   :  { %v370_v5 = vadd.f32 %v369_v3, %v368_v10  ;;  %v383_v10 = vsel %vm303_vm1, %v355_v58, 0.0 }
  0xd5   :  { %v247_v22 = vpop.f32.mrf.mxu2 }
  0xd6   :  { %v229_v0 = vpop.f32.mrf.mxu0  ;;  %v912_v59 = vadd.f32 %v296_v25, %v247_v22 }
  0xd7   :  { %v860_v6 = vadd.f32 %v278_v13, %v229_v0 }
  0xd8   :  { %v356_v37 = vmul.f32 %v912_v59, %v912_v59 }
  0xd9   :  { %v317_v26 = vsel %vm303_vm1, %v860_v6, 0.0  ;;  %v349_v2 = vmul.f32 %v860_v6, %v860_v6  ;;  %v416_v13 = vmax.f32 %v808_v23, %v860_v6  ;;  %v428_v4 = vmin.f32 %v808_v23, %v860_v6 }
  0xda   :  { %v318_v28 = vadd.f32 %v317_v26, %v316_v19  ;;  %v331_v19 = vsel %vm303_vm1, %v912_v59, 0.0 }
  0xdb   :  { %v371_v32 = vsel %vm303_vm1, %v349_v2, 0.0  ;;  %v385_v2 = vsel %vm303_vm1, %v356_v37, 0.0  ;;  %v429_v37 = vmin.f32 %v851_v57, %v896_v43 }
  0xdc   :  { %v320_v33 = vadd.f32 %v319_v30, %v318_v28  ;;  %v372_v35 = vadd.f32 %v371_v32, %v370_v5 }
  0xdd   :  { %v249_v54 = vpop.f32.mrf.mxu2 }
  0xde   :  { %v322_v8 = vadd.f32 %v321_v39, %v320_v33  ;;  %v374_v9 = vadd.f32 %v373_v38, %v372_v35  ;;  %v919_v0 = vadd.f32 %v298_v55, %v249_v54 }
  0xe0   :  { %v324_v45 = vadd.f32 %v323_v40, %v322_v8  ;;  %v376_v46 = vadd.f32 %v375_v44, %v374_v9  ;;  %v357_v22 = vmul.f32 %v919_v0, %v919_v0  ;;  %v333_v5 = vsel %vm303_vm1, %v919_v0, 0.0 }
  0xe2   :  { %v378_v53 = vadd.f32 %v377_v47, %v376_v46  ;;  %v326_v16 = vadd.f32 %v325_v49, %v324_v45  ;;  %v387_v31 = vsel %vm303_vm1, %v357_v22, 0.0  ;;  %v419_v22 = vmax.f32 %v864_v63, %v912_v59 }
  0xe4   :  { %v328_v60 = vadd.f32 %v327_v56, %v326_v16  ;;  %v380_v61 = vadd.f32 %v379_v18, %v378_v53 }
  0xe6   :  { %v330_v3 = vadd.f32 %v329_v34, %v328_v60  ;;  %v382_v7 = vadd.f32 %v381_v62, %v380_v61  ;;  %v301_v61 = vld [vmem:[%s990_s2] sm:$0x1]  ;;  %v417_v34 = vmax.f32 %v851_v57, %v896_v43  ;;  %v420_v57 = vmax.f32 %v878_v29, %v919_v0 }
  0xe7   :  { %v432_v43 = vmin.f32 %v878_v29, %v919_v0 }
  0xe8   :  { %v332_v25 = vadd.f32 %v331_v19, %v330_v3  ;;  %v384_v26 = vadd.f32 %v383_v10, %v382_v7  ;;  %v418_v7 = vmax.f32 %v857_v1, %v905_v52  ;;  %v430_v10 = vmin.f32 %v857_v1, %v905_v52 }
  0xe9   :  { %v421_v1 = vmax.f32 %v413_v14, %v417_v34  ;;  %v621_v52 = vmov 0   ;;  %v423_v14 = vmax.f32 %v415_v48, %v419_v22  ;;  %v424_v12 = vmax.f32 %v416_v13, %v420_v57 }
  0xea   :  { %v334_v28 = vadd.f32 %v333_v5, %v332_v25  ;;  %v386_v30 = vadd.f32 %v385_v2, %v384_v26  ;;  %v431_v25 = vmin.f32 %v864_v63, %v912_v59  ;;  %v302_v26 = vld [vmem:[%s991_s3] sm:$0x1]  ;;  %v433_v63 = vmin.f32 %v425_v15, %v429_v37 }
  0xeb   :  { %v422_v5 = vmax.f32 %v414_v24, %v418_v7  ;;  %v434_v29 = vmin.f32 %v426_v27, %v430_v10  ;;  %v436_v15 = vmin.f32 %v428_v4, %v432_v43 }
  0xec   :  { %v335_v32 = vrot.slane %v334_v28, 4  ;;  %v388_v33 = vadd.f32 %v387_v31, %v386_v30  ;;  %v435_v11 = vmin.f32 %v427_v51, %v431_v25 }
  0xee   :  { %v336_v35 = vadd.f32 %v335_v32, %v334_v28  ;;  %v389_v36 = vrot.slane %v388_v33, 4 }
  0xf0   :  { %v337_v38 = vrot.slane %v336_v35, 2  ;;  %v390_v39 = vadd.f32 %v389_v36, %v388_v33 }
  0xf2   :  { %v338_v8 = vadd.f32 %v337_v38, %v336_v35  ;;  %v391_v9 = vrot.slane %v390_v39, 2 }
  0xf4   :  { %v339_v40 = vrot.slane %v338_v8, 1  ;;  %v392_v41 = vadd.f32 %v391_v9, %v390_v39 }
  0xf6   :  { %v340_v44 = vadd.f32 %v339_v40, %v338_v8  ;;  %v393_v45 = vrot.slane %v392_v41, 1 }
  0xf8   :  { %v341_v46 = vmul.f32 0.0078125, %v340_v44  ;;  %v394_v47 = vadd.f32 %v393_v45, %v392_v41 }
  0xfa   :  { %v395_v49 = vmul.f32 0.0078125, %v394_v47  ;;  %v396_v50 = vmul.f32 %v341_v46, %v341_v46 }
  0xfc   :  { %v397_v53 = vsub.f32 %v395_v49, %v396_v50 }
  0xfe   :  { %v398_v54 = vmax.f32 %v397_v53, 0.0 }
 0x100   :  { %v399_v55 = vadd.f32 1e-05, %v398_v54 }
 0x102   :  { %619 = vrsqrt.f32 %v399_v55  ;;  %vm406_vm3 = vweird.f32 %v399_v55 }
 0x108   :  { %v620_v16 = vpop.eup %619 }
 0x109   :  { %v401_v18 = vmul.f32 %v620_v16, %v399_v55  ;;  %vm407_vm2 = vweird.f32 %v620_v16 }
 0x10a   :  { %vm408_vm4 = vmor %vm406_vm3, %vm407_vm2 }
 0x10b   :  { %v402_v56 = vmul.f32 %v620_v16, %v401_v18 }
 0x10d   :  { %v403_v58 = vmul.f32 0.5, %v402_v56 }
 0x10f   :  { %v404_v60 = vsub.f32 1.5, %v403_v58 }
 0x111   :  { %v405_v62 = vmul.f32 %v620_v16, %v404_v60 }
 0x113   :  { %v409_v3 = vsel %vm408_vm4, %v620_v16, %v405_v62 }
 0x114   :  { %v410_v19 = vmul.f32 %v409_v3, %v301_v61 }
 0x116   :  { %v411_v2 = vmul.f32 %v410_v19, %v341_v46  ;;  %vm437_vm5 = vcmp.ge.f32.partialorder %v410_v19, 0.0  ;;  %v446_v17 = vperm.slane %v410_v19, 0 }
 0x117   :  { %v438_v59 = vsel %vm437_vm5, 1, %v621_v52 }
 0x118   :  { %v412_v0 = vsub.f32 %v302_v26, %v411_v2  ;;  %v439_v28 = vperm.slane %v438_v59, 0 }
 0x11a   :  { %vm440_vm6 = vcmp.eq.s32.totalorder %v439_v28, 1  ;;  %v453_v21 = vperm.slane %v412_v0, 0 }
 0x11b   :  { %v441_v24 = vsel %vm440_vm6, %v421_v1, %v433_v63  ;;  %v442_v27 = vsel %vm440_vm6, %v422_v5, %v434_v29  ;;  %v443_v30 = vsel %vm440_vm6, %v423_v14, %v435_v11  ;;  %v444_v31 = vsel %vm440_vm6, %v424_v12, %v436_v15 }
 0x11c   :  { %v448_v48 = vmul.f32 %v446_v17, %v441_v24  ;;  %v449_v32 = vmul.f32 %v446_v17, %v442_v27  ;;  %v450_v33 = vmul.f32 %v446_v17, %v443_v30  ;;  %v451_v20 = vmul.f32 %v446_v17, %v444_v31 }
 0x11e   :  { %v455_v42 = vadd.f32 %v453_v21, %v448_v48  ;;  %v456_v51 = vadd.f32 %v453_v21, %v449_v32  ;;  %v457_v35 = vadd.f32 %v453_v21, %v450_v33  ;;  %v458_v36 = vadd.f32 %v453_v21, %v451_v20 }
 0x120   :  { %v459_v13 = vmax.f32 %v455_v42, 0.0  ;;  %v460_v38 = vmax.f32 %v456_v51, 0.0  ;;  %v461_v39 = vmax.f32 %v457_v35, 0.0  ;;  %v462_v23 = vmax.f32 %v458_v36, 0.0 }
 0x122   :  { %v463_v6 = vpack.c.bf16 %v459_v13, %v459_v13  ;;  %v464_v4 = vpack.c.bf16 %v460_v38, %v460_v38  ;;  %v465_v8 = vpack.c.bf16 %v461_v39, %v461_v39  ;;  %v466_v9 = vpack.c.bf16 %v462_v23, %v462_v23 }
 0x124   :  { %468 = vst.msk [vmem:[%s992_s4] sm:$0xf] %vm467_vm7, %v463_v6 }
 0x125   :  { %469 = vst.msk [vmem:[%s992_s4 + $0x4] sm:$0xf] %vm467_vm7, %v464_v4 }
 0x126   :  { %470 = vst.msk [vmem:[%s992_s4 + $0x8] sm:$0xf] %vm467_vm7, %v465_v8 }
 0x127   :  { %471 = vst.msk [vmem:[%s992_s4 + $0xc] sm:$0xf] %vm467_vm7, %v466_v9 }

// kernel: model_cnn_forward.3
= control target key start
LH: loop header
LB: loop body
LE: loop exit
PB: predicated region body
PF: predicated region fallthrough
CT: control target
= control target key end

     0   :  { %vm1314_vm0 = vcmask 1044480   ;;  %vm1315_vm1 = vcmask 1045504   ;;  %v4853_v2 = vmov 65535   ;;  %vm929_vm2 = vcmask 220160   ;;  %s8912_s1 = inlined_call_operand.vmem [shape: bf16[27,16], index: 1, kind: input, shape index: {}]   ;;  %s8913_s0 = inlined_call_operand.vmem [shape: bf16[2048,27], index: 0, kind: input, shape index: {}]   ;;  %s8914_s2 = inlined_call_operand.vmem [shape: f32[1,16], index: 2, kind: input, shape index: {}]   ;;  %s8915_s3 = inlined_call_operand.vmem [shape: f32[1,16], index: 3, kind: input, shape index: {}]   ;;  %s8916_s4 = inlined_call_operand.vmem [shape: bf16[512,16], index: 4, kind: output, shape index: {}]  }
   0x1   :  { %v4583_v0 = vld [vmem:[%s8912_s1 + $0x8] sm:$0xf]  ;;  %v4842_v1 = vld [vmem:[%s8912_s1 + $0x8] sm:$0x30]  ;;  %v1316_v3 = vsel %vm1314_vm0, 4294967295, %v4853_v2  ;;  %v4841_v7 = vld [vmem:[%s8912_s1] sm:$0xff] }
   0x2   :  { %v4584_v4 = vor.u32 %v4842_v1, %v4583_v0  ;;  %v1317_v5 = vsel %vm1315_vm1, %v1316_v3, 0  ;;  %v4713_v8 = vld [vmem:[%s8913_s0] sm:$0xff]  ;;  %v4714_v12 = vld [vmem:[%s8913_s0 + $0x8] sm:$0xff]  ;;  %v4715_v16 = vld [vmem:[%s8913_s0 + $0x10] sm:$0xff]  ;;  %vm1972_vm3 = vcmask 130048   ;;  %vm3996_vm9 = vcmask 125952  }
   0x3   :  { %v4745_v9 = vld [vmem:[%s8913_s0 + $0x100] sm:$0xff]  ;;  %v4746_v13 = vld [vmem:[%s8913_s0 + $0x108] sm:$0xff]  ;;  %v4747_v17 = vld [vmem:[%s8913_s0 + $0x110] sm:$0xff] }
   0x4   :  { %v1319_v6 = vand.u32 %v4584_v4, %v1317_v5  ;;  %v4777_v10 = vld [vmem:[%s8913_s0 + $0x200] sm:$0xff]  ;;  %v4778_v14 = vld [vmem:[%s8913_s0 + $0x208] sm:$0xff]  ;;  %v4779_v18 = vld [vmem:[%s8913_s0 + $0x210] sm:$0xff] }
   0x5   :  { %v4809_v11 = vld [vmem:[%s8913_s0 + $0x300] sm:$0xff]  ;;  %v4810_v15 = vld [vmem:[%s8913_s0 + $0x308] sm:$0xff]  ;;  %v4811_v19 = vld [vmem:[%s8913_s0 + $0x310] sm:$0xff] }
   0x6   :  { %1327 = vmatpush.bf16.msra.mxu0 %v1319_v6  ;;  %4843 = vmatpush.bf16.msra.mxu1 %v1319_v6  ;;  %v4716_v20 = vld [vmem:[%s8913_s0 + $0x18] sm:$0xff]  ;;  %v4717_v24 = vld [vmem:[%s8913_s0 + $0x20] sm:$0xff]  ;;  %v4718_v28 = vld [vmem:[%s8913_s0 + $0x28] sm:$0xff] }
   0x7   :  { %4844 = vmatpush.bf16.msra.mxu2 %v1319_v6  ;;  %4845 = vmatpush.bf16.msra.mxu3 %v1319_v6  ;;  %v4748_v21 = vld [vmem:[%s8913_s0 + $0x118] sm:$0xff]  ;;  %v4749_v25 = vld [vmem:[%s8913_s0 + $0x120] sm:$0xff]  ;;  %v4750_v29 = vld [vmem:[%s8913_s0 + $0x128] sm:$0xff] }
   0x8   :  { %v4780_v22 = vld [vmem:[%s8913_s0 + $0x218] sm:$0xff]  ;;  %v4781_v26 = vld [vmem:[%s8913_s0 + $0x220] sm:$0xff]  ;;  %v4782_v30 = vld [vmem:[%s8913_s0 + $0x228] sm:$0xff] }
   0x9   :  { %v4812_v23 = vld [vmem:[%s8913_s0 + $0x318] sm:$0xff]  ;;  %v4813_v27 = vld [vmem:[%s8913_s0 + $0x320] sm:$0xff]  ;;  %v4814_v31 = vld [vmem:[%s8913_s0 + $0x328] sm:$0xff] }
   0xa   :  { %1328 = vmatpush.bf16.msra.mxu0 %v4841_v7  ;;  %4846 = vmatpush.bf16.msra.mxu1 %v4841_v7  ;;  %v4719_v32 = vld [vmem:[%s8913_s0 + $0x30] sm:$0xff]  ;;  %v4720_v36 = vld [vmem:[%s8913_s0 + $0x38] sm:$0xff]  ;;  %v4721_v40 = vld [vmem:[%s8913_s0 + $0x40] sm:$0xff] }
   0xb   :  { %4847 = vmatpush.bf16.msra.mxu2 %v4841_v7  ;;  %4848 = vmatpush.bf16.msra.mxu3 %v4841_v7  ;;  %v4751_v33 = vld [vmem:[%s8913_s0 + $0x130] sm:$0xff]  ;;  %v4752_v37 = vld [vmem:[%s8913_s0 + $0x138] sm:$0xff]  ;;  %v4753_v41 = vld [vmem:[%s8913_s0 + $0x140] sm:$0xff] }
   0xc   :  { %v4783_v34 = vld [vmem:[%s8913_s0 + $0x230] sm:$0xff]  ;;  %v4784_v38 = vld [vmem:[%s8913_s0 + $0x238] sm:$0xff]  ;;  %v4785_v44 = vld [vmem:[%s8913_s0 + $0x240] sm:$0xff] }
   0xd   :  { %4585 = vmatmul.msk.bf16.vlgmr.msra.gmra.mxu0 %vm929_vm2, %v4713_v8  ;;  %4617 = vmatmul.msk.bf16.vlgmr.msra.gmra.mxu1 %vm929_vm2, %v4745_v9  ;;  %v4815_v35 = vld [vmem:[%s8913_s0 + $0x330] sm:$0xff]  ;;  %v4816_v39 = vld [vmem:[%s8913_s0 + $0x338] sm:$0xff]  ;;  %v4817_v45 = vld [vmem:[%s8913_s0 + $0x340] sm:$0xff] }
   0xe   :  { %4649 = vmatmul.msk.bf16.vlgmr.msra.gmra.mxu2 %vm929_vm2, %v4777_v10  ;;  %4681 = vmatmul.msk.bf16.vlgmr.msra.gmra.mxu3 %vm929_vm2, %v4809_v11  ;;  %v4722_v4 = vld [vmem:[%s8913_s0 + $0x48] sm:$0xff] }
   0xf   :  { %v4754_v5 = vld [vmem:[%s8913_s0 + $0x148] sm:$0xff] }
  0x10   :  { %v4786_v8 = vld [vmem:[%s8913_s0 + $0x248] sm:$0xff] }
  0x11   :  { %v4818_v9 = vld [vmem:[%s8913_s0 + $0x348] sm:$0xff] }
  0x1d   :  { %4586 = vmatmul.msk.bf16.gmra.mxu0 %vm929_vm2, %v4714_v12  ;;  %4618 = vmatmul.msk.bf16.gmra.mxu1 %vm929_vm2, %v4746_v13 }
  0x1e   :  { %4650 = vmatmul.msk.bf16.gmra.mxu2 %vm929_vm2, %v4778_v14  ;;  %4682 = vmatmul.msk.bf16.gmra.mxu3 %vm929_vm2, %v4810_v15 }
  0x2d   :  { %4587 = vmatmul.msk.bf16.gmra.mxu0 %vm929_vm2, %v4715_v16  ;;  %4619 = vmatmul.msk.bf16.gmra.mxu1 %vm929_vm2, %v4747_v17 }
  0x2e   :  { %4651 = vmatmul.msk.bf16.gmra.mxu2 %vm929_vm2, %v4779_v18  ;;  %4683 = vmatmul.msk.bf16.gmra.mxu3 %vm929_vm2, %v4811_v19 }
  0x3d   :  { %4588 = vmatmul.msk.bf16.gmra.mxu0 %vm929_vm2, %v4716_v20  ;;  %4620 = vmatmul.msk.bf16.gmra.mxu1 %vm929_vm2, %v4748_v21 }
  0x3e   :  { %4652 = vmatmul.msk.bf16.gmra.mxu2 %vm929_vm2, %v4780_v22  ;;  %4684 = vmatmul.msk.bf16.gmra.mxu3 %vm929_vm2, %v4812_v23 }
  0x4d   :  { %4589 = vmatmul.msk.bf16.gmra.mxu0 %vm929_vm2, %v4717_v24  ;;  %4621 = vmatmul.msk.bf16.gmra.mxu1 %vm929_vm2, %v4749_v25 }
  0x4e   :  { %4653 = vmatmul.msk.bf16.gmra.mxu2 %vm929_vm2, %v4781_v26  ;;  %4685 = vmatmul.msk.bf16.gmra.mxu3 %vm929_vm2, %v4813_v27 }
  0x5d   :  { %4590 = vmatmul.msk.bf16.gmra.mxu0 %vm929_vm2, %v4718_v28  ;;  %4622 = vmatmul.msk.bf16.gmra.mxu1 %vm929_vm2, %v4750_v29 }
  0x5e   :  { %4654 = vmatmul.msk.bf16.gmra.mxu2 %vm929_vm2, %v4782_v30  ;;  %4686 = vmatmul.msk.bf16.gmra.mxu3 %vm929_vm2, %v4814_v31 }
  0x6d   :  { %4591 = vmatmul.msk.bf16.gmra.mxu0 %vm929_vm2, %v4719_v32  ;;  %4623 = vmatmul.msk.bf16.gmra.mxu1 %vm929_vm2, %v4751_v33 }
  0x6e   :  { %4655 = vmatmul.msk.bf16.gmra.mxu2 %vm929_vm2, %v4783_v34  ;;  %4687 = vmatmul.msk.bf16.gmra.mxu3 %vm929_vm2, %v4815_v35 }
  0x7d   :  { %4592 = vmatmul.msk.bf16.gmra.mxu0 %vm929_vm2, %v4720_v36  ;;  %4624 = vmatmul.msk.bf16.gmra.mxu1 %vm929_vm2, %v4752_v37 }
  0x7e   :  { %4656 = vmatmul.msk.bf16.gmra.mxu2 %vm929_vm2, %v4784_v38  ;;  %4688 = vmatmul.msk.bf16.gmra.mxu3 %vm929_vm2, %v4816_v39  ;;  %v4723_v38 = vld [vmem:[%s8913_s0 + $0x50] sm:$0xff] }
  0x7f   :  { %v4755_v39 = vld [vmem:[%s8913_s0 + $0x150] sm:$0xff] }
  0x8a   :  { %v1330_v42 = vpop.f32.mrf.mxu0  ;;  %v5023_v43 = vpop.f32.mrf.mxu1 }
  0x8b   :  { %v3282_v46 = vmax.f32 %v1330_v42, %v5023_v43  ;;  %v3474_v47 = vmin.f32 %v1330_v42, %v5023_v43  ;;  %v2491_v48 = vmul.f32 %v1330_v42, %v1330_v42  ;;  %v1973_v51 = vsel %vm1972_vm3, %v1330_v42, 0.0  ;;  %v4787_v42 = vld [vmem:[%s8913_s0 + $0x250] sm:$0xff] }
  0x8d   :  { %4593 = vmatmul.msk.bf16.gmra.mxu0 %vm929_vm2, %v4721_v40  ;;  %4625 = vmatmul.msk.bf16.gmra.mxu1 %vm929_vm2, %v4753_v41  ;;  %v2747_v59 = vsel %vm1972_vm3, %v2491_v48, 0.0 }
  0x8e   :  { %4657 = vmatmul.msk.bf16.gmra.mxu2 %vm929_vm2, %v4785_v44  ;;  %4689 = vmatmul.msk.bf16.gmra.mxu3 %vm929_vm2, %v4817_v45  ;;  %v4819_v44 = vld [vmem:[%s8913_s0 + $0x350] sm:$0xff] }
  0x91   :  { %v5037_v49 = vpop.f32.mrf.mxu2  ;;  %v5039_v50 = vpop.f32.mrf.mxu3 }
  0x92   :  { %9339 = vst [vmem:[#allocation2_spill] sm:$0xff] %v5037_v49  ;;  %v1332_v52 = vpop.f32.mrf.mxu0  ;;  %v5042_v53 = vpop.f32.mrf.mxu1  ;;  %v3346_v54 = vmax.f32 %v5037_v49, %v5039_v50  ;;  %v3538_v55 = vmin.f32 %v5037_v49, %v5039_v50 }
  0x93   :  { %9340 = vst [vmem:[#allocation3_spill] sm:$0xff] %v5039_v50  ;;  %v1974_v56 = vsel %vm1972_vm3, %v1332_v52, 0.0  ;;  %v2492_v57 = vmul.f32 %v1332_v52, %v1332_v52  ;;  %v3283_v0 = vmax.f32 %v1332_v52, %v5042_v53  ;;  %v3475_v1 = vmin.f32 %v1332_v52, %v5042_v53 }
  0x94   :  { %v1975_v58 = vadd.f32 %v1974_v56, %v1973_v51  ;;  %v5050_v60 = vmax.f32 %v3282_v46, %v3346_v54  ;;  %v5052_v61 = vmin.f32 %v3474_v47, %v3538_v55 }
  0x95   :  { %v2748_v62 = vsel %vm1972_vm3, %v2492_v57, 0.0 }
  0x96   :  { %9341 = vst [vmem:[#allocation4_spill] sm:$0xff] %v5050_v60  ;;  %v2749_v63 = vadd.f32 %v2748_v62, %v2747_v59 }
  0x97   :  { %9342 = vst [vmem:[#allocation5_spill] sm:$0xff] %v5052_v61 }
  0x99   :  { %v5057_v2 = vpop.f32.mrf.mxu2  ;;  %v5059_v3 = vpop.f32.mrf.mxu3 }
  0x9a   :  { %9343 = vst [vmem:[#allocation6_spill] sm:$0xff] %v5057_v2  ;;  %v1335_v6 = vpop.f32.mrf.mxu0  ;;  %v5067_v7 = vpop.f32.mrf.mxu1  ;;  %v3347_v10 = vmax.f32 %v5057_v2, %v5059_v3  ;;  %v3539_v11 = vmin.f32 %v5057_v2, %v5059_v3 }
  0x9b   :  { %9344 = vst [vmem:[#allocation7_spill] sm:$0xff] %v5059_v3  ;;  %v1976_v12 = vsel %vm1972_vm3, %v1335_v6, 0.0  ;;  %v2493_v13 = vmul.f32 %v1335_v6, %v1335_v6  ;;  %v3284_v19 = vmax.f32 %v1335_v6, %v5067_v7  ;;  %v3476_v20 = vmin.f32 %v1335_v6, %v5067_v7 }
  0x9c   :  { %v1977_v14 = vadd.f32 %v1976_v12, %v1975_v58  ;;  %v5080_v15 = vmax.f32 %v3283_v0, %v3347_v10  ;;  %v5082_v16 = vmin.f32 %v3475_v1, %v3539_v11 }
  0x9d   :  { %v2750_v17 = vsel %vm1972_vm3, %v2493_v13, 0.0  ;;  %4594 = vmatmul.msk.bf16.gmra.mxu0 %vm929_vm2, %v4722_v4  ;;  %4626 = vmatmul.msk.bf16.gmra.mxu1 %vm929_vm2, %v4754_v5 }
  0x9e   :  { %9345 = vst [vmem:[#allocation8_spill] sm:$0xff] %v5080_v15  ;;  %v2751_v18 = vadd.f32 %v2750_v17, %v2749_v63  ;;  %4658 = vmatmul.msk.bf16.gmra.mxu2 %vm929_vm2, %v4786_v8  ;;  %4690 = vmatmul.msk.bf16.gmra.mxu3 %vm929_vm2, %v4818_v9 }
  0x9f   :  { %9346 = vst [vmem:[#allocation9_spill] sm:$0xff] %v5082_v16 }
  0xa1   :  { %v5091_v21 = vpop.f32.mrf.mxu2  ;;  %v5093_v22 = vpop.f32.mrf.mxu3 }
  0xa2   :  { %9347 = vst [vmem:[#allocation10_spill] sm:$0xff] %v5091_v21  ;;  %v1337_v23 = vpop.f32.mrf.mxu0  ;;  %v5095_v24 = vpop.f32.mrf.mxu1  ;;  %v3348_v25 = vmax.f32 %v5091_v21, %v5093_v22  ;;  %v3540_v26 = vmin.f32 %v5091_v21, %v5093_v22 }
  0xa3   :  { %9348 = vst [vmem:[#allocation11_spill] sm:$0xff] %v5093_v22  ;;  %v1978_v27 = vsel %vm1972_vm3, %v1337_v23, 0.0  ;;  %v2494_v28 = vmul.f32 %v1337_v23, %v1337_v23  ;;  %v3285_v34 = vmax.f32 %v1337_v23, %v5095_v24  ;;  %v3477_v35 = vmin.f32 %v1337_v23, %v5095_v24 }
  0xa4   :  { %v1979_v29 = vadd.f32 %v1978_v27, %v1977_v14  ;;  %v5102_v30 = vmax.f32 %v3284_v19, %v3348_v25  ;;  %v5104_v31 = vmin.f32 %v3476_v20, %v3540_v26  ;;  %v4724_v19 = vld [vmem:[%s8913_s0 + $0x58] sm:$0xff] }
  0xa5   :  { %v2752_v32 = vsel %vm1972_vm3, %v2494_v28, 0.0  ;;  %v4756_v20 = vld [vmem:[%s8913_s0 + $0x158] sm:$0xff] }
  0xa6   :  { %9349 = vst [vmem:[#allocation12_spill] sm:$0xff] %v5102_v30  ;;  %v2753_v33 = vadd.f32 %v2752_v32, %v2751_v18  ;;  %v4788_v26 = vld [vmem:[%s8913_s0 + $0x258] sm:$0xff] }
  0xa7   :  { %9350 = vst [vmem:[#allocation13_spill] sm:$0xff] %v5104_v31  ;;  %v4820_v27 = vld [vmem:[%s8913_s0 + $0x358] sm:$0xff] }
  0xa8   :  { %v4728_v30 = vld [vmem:[%s8913_s0 + $0x78] sm:$0xff] }
  0xa9   :  { %v5109_v36 = vpop.f32.mrf.mxu2  ;;  %v5111_v37 = vpop.f32.mrf.mxu3 }
  0xaa   :  { %9351 = vst [vmem:[#allocation14_spill] sm:$0xff] %v5109_v36  ;;  %v1340_v40 = vpop.f32.mrf.mxu0  ;;  %v5119_v41 = vpop.f32.mrf.mxu1  ;;  %v3349_v45 = vmax.f32 %v5109_v36, %v5111_v37  ;;  %v3541_v46 = vmin.f32 %v5109_v36, %v5111_v37 }
  0xab   :  { %9352 = vst [vmem:[#allocation15_spill] sm:$0xff] %v5111_v37  ;;  %v1980_v47 = vsel %vm1972_vm3, %v1340_v40, 0.0  ;;  %v2495_v48 = vmul.f32 %v1340_v40, %v1340_v40  ;;  %v3286_v57 = vmax.f32 %v1340_v40, %v5119_v41  ;;  %v3478_v58 = vmin.f32 %v1340_v40, %v5119_v41 }
  0xac   :  { %v1981_v51 = vadd.f32 %v1980_v47, %v1979_v29  ;;  %v5132_v52 = vmax.f32 %v3285_v34, %v3349_v45  ;;  %v5134_v54 = vmin.f32 %v3477_v35, %v3541_v46 }
  0xad   :  { %v2754_v55 = vsel %vm1972_vm3, %v2495_v48, 0.0  ;;  %4595 = vmatmul.msk.bf16.gmra.mxu0 %vm929_vm2, %v4723_v38  ;;  %4627 = vmatmul.msk.bf16.gmra.mxu1 %vm929_vm2, %v4755_v39 }
  0xae   :  { %9353 = vst [vmem:[#allocation16_spill] sm:$0xff] %v5132_v52  ;;  %v2755_v56 = vadd.f32 %v2754_v55, %v2753_v33  ;;  %4659 = vmatmul.msk.bf16.gmra.mxu2 %vm929_vm2, %v4787_v42  ;;  %4691 = vmatmul.msk.bf16.gmra.mxu3 %vm929_vm2, %v4819_v44 }
  0xaf   :  { %9354 = vst [vmem:[#allocation17_spill] sm:$0xff] %v5134_v54 }
  0xb1   :  { %v5143_v59 = vpop.f32.mrf.mxu2  ;;  %v5145_v62 = vpop.f32.mrf.mxu3 }
  0xb2   :  { %9355 = vst [vmem:[#allocation18_spill] sm:$0xff] %v5143_v59  ;;  %v1342_v63 = vpop.f32.mrf.mxu0  ;;  %v5147_v0 = vpop.f32.mrf.mxu1  ;;  %v3350_v1 = vmax.f32 %v5143_v59, %v5145_v62  ;;  %v3542_v4 = vmin.f32 %v5143_v59, %v5145_v62 }
  0xb3   :  { %9356 = vst [vmem:[#allocation19_spill] sm:$0xff] %v5145_v62  ;;  %v1982_v5 = vsel %vm1972_vm3, %v1342_v63, 0.0  ;;  %v2496_v6 = vmul.f32 %v1342_v63, %v1342_v63  ;;  %v3287_v13 = vmax.f32 %v1342_v63, %v5147_v0  ;;  %v3479_v14 = vmin.f32 %v1342_v63, %v5147_v0 }
  0xb4   :  { %v1983_v8 = vadd.f32 %v1982_v5, %v1981_v51  ;;  %v5154_v9 = vmax.f32 %v3286_v57, %v3350_v1  ;;  %v5156_v10 = vmin.f32 %v3478_v58, %v3542_v4 }
  0xb5   :  { %v2756_v11 = vsel %vm1972_vm3, %v2496_v6, 0.0 }
  0xb6   :  { %9357 = vst [vmem:[#allocation20_spill] sm:$0xff] %v5154_v9  ;;  %v2757_v12 = vadd.f32 %v2756_v11, %v2755_v56 }
  0xb7   :  { %9358 = vst [vmem:[#allocation21_spill] sm:$0xff] %v5156_v10 }
  0xb9   :  { %v5161_v17 = vpop.f32.mrf.mxu2  ;;  %v5163_v18 = vpop.f32.mrf.mxu3 }
  0xba   :  { %9359 = vst [vmem:[#allocation22_spill] sm:$0xff] %v5161_v17  ;;  %v1345_v23 = vpop.f32.mrf.mxu0  ;;  %v5171_v25 = vpop.f32.mrf.mxu1  ;;  %v3351_v28 = vmax.f32 %v5161_v17, %v5163_v18  ;;  %v3543_v29 = vmin.f32 %v5161_v17, %v5163_v18 }
  0xbb   :  { %9360 = vst [vmem:[#allocation23_spill] sm:$0xff] %v5163_v18  ;;  %v1984_v32 = vsel %vm1972_vm3, %v1345_v23, 0.0  ;;  %v2497_v33 = vmul.f32 %v1345_v23, %v1345_v23  ;;  %v3288_v42 = vmax.f32 %v1345_v23, %v5171_v25  ;;  %v3480_v44 = vmin.f32 %v1345_v23, %v5171_v25  ;;  %v4789_v23 = vld [vmem:[%s8913_s0 + $0x260] sm:$0xff] }
  0xbc   :  { %v1985_v34 = vadd.f32 %v1984_v32, %v1983_v8  ;;  %v5184_v35 = vmax.f32 %v3287_v13, %v3351_v28  ;;  %v5186_v38 = vmin.f32 %v3479_v14, %v3543_v29  ;;  %v4725_v13 = vld [vmem:[%s8913_s0 + $0x60] sm:$0xff] }
  0xbd   :  { %v2758_v39 = vsel %vm1972_vm3, %v2497_v33, 0.0  ;;  %4596 = vmatmul.msk.bf16.gmra.mxu0 %vm929_vm2, %v4724_v19  ;;  %4628 = vmatmul.msk.bf16.gmra.mxu1 %vm929_vm2, %v4756_v20  ;;  %v4757_v14 = vld [vmem:[%s8913_s0 + $0x160] sm:$0xff] }
  0xbe   :  { %9361 = vst [vmem:[#allocation24_spill] sm:$0xff] %v5184_v35  ;;  %v2759_v40 = vadd.f32 %v2758_v39, %v2757_v12  ;;  %4660 = vmatmul.msk.bf16.gmra.mxu2 %vm929_vm2, %v4788_v26  ;;  %4692 = vmatmul.msk.bf16.gmra.mxu3 %vm929_vm2, %v4820_v27  ;;  %v4821_v26 = vld [vmem:[%s8913_s0 + $0x360] sm:$0xff]  ;;  %v4727_v35 = vld [vmem:[%s8913_s0 + $0x70] sm:$0xff] }
  0xbf   :  { %9362 = vst [vmem:[#allocation25_spill] sm:$0xff] %v5186_v38 }
  0xc1   :  { %v5195_v45 = vpop.f32.mrf.mxu2  ;;  %v5197_v46 = vpop.f32.mrf.mxu3 }
  0xc2   :  { %9363 = vst [vmem:[#allocation26_spill] sm:$0xff] %v5195_v45  ;;  %v1347_v47 = vpop.f32.mrf.mxu0  ;;  %v5199_v48 = vpop.f32.mrf.mxu1  ;;  %v3352_v51 = vmax.f32 %v5195_v45, %v5197_v46  ;;  %v3544_v55 = vmin.f32 %v5195_v45, %v5197_v46 }
  0xc3   :  { %9364 = vst [vmem:[#allocation27_spill] sm:$0xff] %v5197_v46  ;;  %v1986_v56 = vsel %vm1972_vm3, %v1347_v47, 0.0  ;;  %v2498_v57 = vmul.f32 %v1347_v47, %v1347_v47  ;;  %v3289_v6 = vmax.f32 %v1347_v47, %v5199_v48  ;;  %v3481_v8 = vmin.f32 %v1347_v47, %v5199_v48 }
  0xc4   :  { %v1987_v58 = vadd.f32 %v1986_v56, %v1985_v34  ;;  %v5206_v63 = vmax.f32 %v3288_v42, %v3352_v51  ;;  %v5208_v1 = vmin.f32 %v3480_v44, %v3544_v55 }
  0xc5   :  { %v2760_v4 = vsel %vm1972_vm3, %v2498_v57, 0.0 }
  0xc6   :  { %9365 = vst [vmem:[#allocation28_spill] sm:$0xff] %v5206_v63  ;;  %v2761_v5 = vadd.f32 %v2760_v4, %v2759_v40 }
  0xc7   :  { %9366 = vst [vmem:[#allocation29_spill] sm:$0xff] %v5208_v1 }
  0xc9   :  { %v5213_v11 = vpop.f32.mrf.mxu2  ;;  %v5215_v12 = vpop.f32.mrf.mxu3 }
  0xca   :  { %9367 = vst [vmem:[#allocation30_spill] sm:$0xff] %v5213_v11  ;;  %v1350_v19 = vpop.f32.mrf.mxu0  ;;  %v5223_v20 = vpop.f32.mrf.mxu1  ;;  %v3353_v27 = vmax.f32 %v5213_v11, %v5215_v12  ;;  %v3545_v28 = vmin.f32 %v5213_v11, %v5215_v12 }
  0xcb   :  { %9368 = vst [vmem:[#allocation31_spill] sm:$0xff] %v5215_v12  ;;  %v1988_v29 = vsel %vm1972_vm3, %v1350_v19, 0.0  ;;  %v2499_v32 = vmul.f32 %v1350_v19, %v1350_v19  ;;  %v3290_v44 = vmax.f32 %v1350_v19, %v5223_v20  ;;  %v3482_v47 = vmin.f32 %v1350_v19, %v5223_v20 }
  0xcc   :  { %v1989_v33 = vadd.f32 %v1988_v29, %v1987_v58  ;;  %v5236_v34 = vmax.f32 %v3289_v6, %v3353_v27  ;;  %v5238_v39 = vmin.f32 %v3481_v8, %v3545_v28 }
  0xcd   :  { %v2762_v40 = vsel %vm1972_vm3, %v2499_v32, 0.0  ;;  %4597 = vmatmul.msk.bf16.gmra.mxu0 %vm929_vm2, %v4725_v13  ;;  %4629 = vmatmul.msk.bf16.gmra.mxu1 %vm929_vm2, %v4757_v14  ;;  %v4726_v32 = vld [vmem:[%s8913_s0 + $0x68] sm:$0xff] }
  0xce   :  { %9369 = vst [vmem:[#allocation32_spill] sm:$0xff] %v5236_v34  ;;  %v2763_v42 = vadd.f32 %v2762_v40, %v2761_v5  ;;  %4661 = vmatmul.msk.bf16.gmra.mxu2 %vm929_vm2, %v4789_v23  ;;  %4693 = vmatmul.msk.bf16.gmra.mxu3 %vm929_vm2, %v4821_v26 }
  0xcf   :  { %9370 = vst [vmem:[#allocation33_spill] sm:$0xff] %v5238_v39 }
  0xd1   :  { %v5247_v51 = vpop.f32.mrf.mxu2  ;;  %v5249_v55 = vpop.f32.mrf.mxu3 }
  0xd2   :  { %9371 = vst [vmem:[#allocation34_spill] sm:$0xff] %v5247_v51  ;;  %v1352_v56 = vpop.f32.mrf.mxu0  ;;  %v5251_v57 = vpop.f32.mrf.mxu1  ;;  %v3354_v58 = vmax.f32 %v5247_v51, %v5249_v55  ;;  %v3546_v4 = vmin.f32 %v5247_v51, %v5249_v55 }
  0xd3   :  { %9372 = vst [vmem:[#allocation35_spill] sm:$0xff] %v5249_v55  ;;  %v1990_v5 = vsel %vm1972_vm3, %v1352_v56, 0.0  ;;  %v2500_v6 = vmul.f32 %v1352_v56, %v1352_v56  ;;  %v3291_v26 = vmax.f32 %v1352_v56, %v5251_v57  ;;  %v3483_v27 = vmin.f32 %v1352_v56, %v5251_v57 }
  0xd4   :  { %v1991_v8 = vadd.f32 %v1990_v5, %v1989_v33  ;;  %v5258_v13 = vmax.f32 %v3290_v44, %v3354_v58  ;;  %v5260_v14 = vmin.f32 %v3482_v47, %v3546_v4  ;;  %v4758_v33 = vld [vmem:[%s8913_s0 + $0x168] sm:$0xff] }
  0xd5   :  { %v2764_v19 = vsel %vm1972_vm3, %v2500_v6, 0.0  ;;  %v4822_v47 = vld [vmem:[%s8913_s0 + $0x368] sm:$0xff] }
  0xd6   :  { %9373 = vst [vmem:[#allocation36_spill] sm:$0xff] %v5258_v13  ;;  %v2765_v23 = vadd.f32 %v2764_v19, %v2763_v42  ;;  %v4790_v42 = vld [vmem:[%s8913_s0 + $0x268] sm:$0xff] }
  0xd7   :  { %9374 = vst [vmem:[#allocation37_spill] sm:$0xff] %v5260_v14 }
  0xd9   :  { %v5265_v28 = vpop.f32.mrf.mxu2  ;;  %v5267_v29 = vpop.f32.mrf.mxu3 }
  0xda   :  { %9375 = vst [vmem:[#allocation38_spill] sm:$0xff] %v5265_v28  ;;  %v1355_v40 = vpop.f32.mrf.mxu0  ;;  %v5275_v44 = vpop.f32.mrf.mxu1  ;;  %v3355_v56 = vmax.f32 %v5265_v28, %v5267_v29  ;;  %v3547_v58 = vmin.f32 %v5265_v28, %v5267_v29 }
  0xdb   :  { %9376 = vst [vmem:[#allocation39_spill] sm:$0xff] %v5267_v29  ;;  %v1992_v4 = vsel %vm1972_vm3, %v1355_v40, 0.0  ;;  %v2501_v5 = vmul.f32 %v1355_v40, %v1355_v40  ;;  %v3292_v39 = vmax.f32 %v1355_v40, %v5275_v44  ;;  %v3484_v63 = vmin.f32 %v1355_v40, %v5275_v44 }
  0xdc   :  { %v1993_v6 = vadd.f32 %v1992_v4, %v1991_v8  ;;  %v5288_v19 = vmax.f32 %v3291_v26, %v3355_v56  ;;  %v5290_v13 = vmin.f32 %v3483_v27, %v3547_v58 }
  0xdd   :  { %v2766_v14 = vsel %vm1972_vm3, %v2501_v5, 0.0  ;;  %4598 = vmatmul.msk.bf16.gmra.mxu0 %vm929_vm2, %v4726_v32  ;;  %4630 = vmatmul.msk.bf16.gmra.mxu1 %vm929_vm2, %v4758_v33 }
  0xde   :  { %9377 = vst [vmem:[#allocation40_spill] sm:$0xff] %v5288_v19  ;;  %v2767_v34 = vadd.f32 %v2766_v14, %v2765_v23  ;;  %4662 = vmatmul.msk.bf16.gmra.mxu2 %vm929_vm2, %v4790_v42  ;;  %4694 = vmatmul.msk.bf16.gmra.mxu3 %vm929_vm2, %v4822_v47 }
  0xdf   :  { %9378 = vst [vmem:[#allocation41_spill] sm:$0xff] %v5290_v13 }
  0xe1   :  { %v5299_v8 = vpop.f32.mrf.mxu2  ;;  %v5301_v26 = vpop.f32.mrf.mxu3 }
  0xe2   :  { %9379 = vst [vmem:[#allocation42_spill] sm:$0xff] %v5299_v8  ;;  %v1357_v27 = vpop.f32.mrf.mxu0  ;;  %v5303_v56 = vpop.f32.mrf.mxu1  ;;  %v3356_v32 = vmax.f32 %v5299_v8, %v5301_v26  ;;  %v3548_v14 = vmin.f32 %v5299_v8, %v5301_v26 }
  0xe3   :  { %9380 = vst [vmem:[#allocation43_spill] sm:$0xff] %v5301_v26  ;;  %v1994_v23 = vsel %vm1972_vm3, %v1357_v27, 0.0  ;;  %v2502_v33 = vmul.f32 %v1357_v27, %v1357_v27  ;;  %v3293_v5 = vmax.f32 %v1357_v27, %v5303_v56  ;;  %v3485_v19 = vmin.f32 %v1357_v27, %v5303_v56  ;;  %v4823_v27 = vld [vmem:[%s8913_s0 + $0x370] sm:$0xff] }
  0xe4   :  { %v1995_v40 = vadd.f32 %v1994_v23, %v1993_v6  ;;  %v5310_v42 = vmax.f32 %v3292_v39, %v3356_v32  ;;  %v5312_v47 = vmin.f32 %v3484_v63, %v3548_v14  ;;  %v4759_v63 = vld [vmem:[%s8913_s0 + $0x170] sm:$0xff] }
  0xe5   :  { %v2768_v58 = vsel %vm1972_vm3, %v2502_v33, 0.0 }
  0xe6   :  { %9381 = vst [vmem:[#allocation44_spill] sm:$0xff] %v5310_v42  ;;  %v2769_v4 = vadd.f32 %v2768_v58, %v2767_v34  ;;  %v4791_v34 = vld [vmem:[%s8913_s0 + $0x270] sm:$0xff] }
  0xe7   :  { %9382 = vst [vmem:[#allocation45_spill] sm:$0xff] %v5312_v47 }
  0xe9   :  { %v5317_v13 = vpop.f32.mrf.mxu2  ;;  %v5319_v1 = vpop.f32.mrf.mxu3 }
  0xea   :  { %9383 = vst [vmem:[#allocation46_spill] sm:$0xff] %v5317_v13  ;;  %v1360_v39 = vpop.f32.mrf.mxu0  ;;  %v5327_v6 = vpop.f32.mrf.mxu1  ;;  %v3357_v32 = vmax.f32 %v5317_v13, %v5319_v1  ;;  %v3549_v14 = vmin.f32 %v5317_v13, %v5319_v1 }
  0xeb   :  { %9384 = vst [vmem:[#allocation47_spill] sm:$0xff] %v5319_v1  ;;  %v1996_v23 = vsel %vm1972_vm3, %v1360_v39, 0.0  ;;  %v2503_v33 = vmul.f32 %v1360_v39, %v1360_v39  ;;  %v3294_v10 = vmax.f32 %v1360_v39, %v5327_v6  ;;  %v3486_v52 = vmin.f32 %v1360_v39, %v5327_v6 }
  0xec   :  { %v1997_v58 = vadd.f32 %v1996_v23, %v1995_v40  ;;  %v5340_v42 = vmax.f32 %v3293_v5, %v3357_v32  ;;  %v5342_v47 = vmin.f32 %v3485_v19, %v3549_v14 }
  0xed   :  { %v2770_v38 = vsel %vm1972_vm3, %v2503_v33, 0.0  ;;  %4599 = vmatmul.msk.bf16.gmra.mxu0 %vm929_vm2, %v4727_v35  ;;  %4631 = vmatmul.msk.bf16.gmra.mxu1 %vm929_vm2, %v4759_v63 }
  0xee   :  { %9385 = vst [vmem:[#allocation48_spill] sm:$0xff] %v5340_v42  ;;  %v2771_v9 = vadd.f32 %v2770_v38, %v2769_v4  ;;  %4663 = vmatmul.msk.bf16.gmra.mxu2 %vm929_vm2, %v4791_v34  ;;  %4695 = vmatmul.msk.bf16.gmra.mxu3 %vm929_vm2, %v4823_v27 }
  0xef   :  { %9386 = vst [vmem:[#allocation49_spill] sm:$0xff] %v5342_v47 }
  0xf1   :  { %v5351_v40 = vpop.f32.mrf.mxu2  ;;  %v5353_v5 = vpop.f32.mrf.mxu3 }
  0xf2   :  { %9387 = vst [vmem:[#allocation50_spill] sm:$0xff] %v5351_v40  ;;  %v1362_v19 = vpop.f32.mrf.mxu0  ;;  %v5355_v32 = vpop.f32.mrf.mxu1  ;;  %v3358_v35 = vmax.f32 %v5351_v40, %v5353_v5  ;;  %v3550_v38 = vmin.f32 %v5351_v40, %v5353_v5 }
  0xf3   :  { %9388 = vst [vmem:[#allocation51_spill] sm:$0xff] %v5353_v5  ;;  %v1998_v4 = vsel %vm1972_vm3, %v1362_v19, 0.0  ;;  %v2504_v63 = vmul.f32 %v1362_v19, %v1362_v19  ;;  %v3295_v33 = vmax.f32 %v1362_v19, %v5355_v32  ;;  %v3487_v42 = vmin.f32 %v1362_v19, %v5355_v32  ;;  %v4824_v19 = vld [vmem:[%s8913_s0 + $0x378] sm:$0xff] }
  0xf4   :  { %v1999_v39 = vadd.f32 %v1998_v4, %v1997_v58  ;;  %v5362_v34 = vmax.f32 %v3294_v10, %v3358_v35  ;;  %v5364_v27 = vmin.f32 %v3486_v52, %v3550_v38  ;;  %v4760_v52 = vld [vmem:[%s8913_s0 + $0x178] sm:$0xff] }
  0xf5   :  { %v2772_v14 = vsel %vm1972_vm3, %v2504_v63, 0.0 }
  0xf6   :  { %9389 = vst [vmem:[#allocation52_spill] sm:$0xff] %v5362_v34  ;;  %v2773_v23 = vadd.f32 %v2772_v14, %v2771_v9  ;;  %v4792_v9 = vld [vmem:[%s8913_s0 + $0x278] sm:$0xff] }
  0xf7   :  { %9390 = vst [vmem:[#allocation53_spill] sm:$0xff] %v5364_v27 }
  0xf9   :  { %v5369_v47 = vpop.f32.mrf.mxu2  ;;  %v5371_v54 = vpop.f32.mrf.mxu3 }
  0xfa   :  { %9391 = vst [vmem:[#allocation54_spill] sm:$0xff] %v5369_v47  ;;  %v1365_v10 = vpop.f32.mrf.mxu0  ;;  %v5379_v58 = vpop.f32.mrf.mxu1  ;;  %v3359_v35 = vmax.f32 %v5369_v47, %v5371_v54  ;;  %v3551_v38 = vmin.f32 %v5369_v47, %v5371_v54 }
  0xfb   :  { %9392 = vst [vmem:[#allocation55_spill] sm:$0xff] %v5371_v54  ;;  %v2000_v4 = vsel %vm1972_vm3, %v1365_v10, 0.0  ;;  %v2505_v63 = vmul.f32 %v1365_v10, %v1365_v10  ;;  %v3296_v16 = vmax.f32 %v1365_v10, %v5379_v58  ;;  %v3488_v60 = vmin.f32 %v1365_v10, %v5379_v58 }
  0xfc   :  { %v2001_v14 = vadd.f32 %v2000_v4, %v1999_v39  ;;  %v5392_v34 = vmax.f32 %v3295_v33, %v3359_v35  ;;  %v5394_v27 = vmin.f32 %v3487_v42, %v3551_v38 }
  0xfd   :  { %v2774_v31 = vsel %vm1972_vm3, %v2505_v63, 0.0  ;;  %4600 = vmatmul.msk.bf16.gmra.mxu0 %vm929_vm2, %v4728_v30  ;;  %4632 = vmatmul.msk.bf16.gmra.mxu1 %vm929_vm2, %v4760_v52 }
  0xfe   :  { %9393 = vst [vmem:[#allocation56_spill] sm:$0xff] %v5392_v34  ;;  %v2775_v15 = vadd.f32 %v2774_v31, %v2773_v23  ;;  %4664 = vmatmul.msk.bf16.gmra.mxu2 %vm929_vm2, %v4792_v9  ;;  %4696 = vmatmul.msk.bf16.gmra.mxu3 %vm929_vm2, %v4824_v19 }
  0xff   :  { %9394 = vst [vmem:[#allocation57_spill] sm:$0xff] %v5394_v27 }
 0x101   :  { %v5403_v39 = vpop.f32.mrf.mxu2  ;;  %v5405_v33 = vpop.f32.mrf.mxu3 }
 0x102   :  { %9395 = vst [vmem:[#allocation58_spill] sm:$0xff] %v5403_v39  ;;  %v1367_v42 = vpop.f32.mrf.mxu0  ;;  %v5407_v35 = vpop.f32.mrf.mxu1  ;;  %v3360_v30 = vmax.f32 %v5403_v39, %v5405_v33  ;;  %v3552_v31 = vmin.f32 %v5403_v39, %v5405_v33 }
 0x103   :  { %9396 = vst [vmem:[#allocation59_spill] sm:$0xff] %v5405_v33  ;;  %v2002_v23 = vsel %vm1972_vm3, %v1367_v42, 0.0  ;;  %v2506_v52 = vmul.f32 %v1367_v42, %v1367_v42  ;;  %v3297_v63 = vmax.f32 %v1367_v42, %v5407_v35  ;;  %v3489_v34 = vmin.f32 %v1367_v42, %v5407_v35  ;;  %v4729_v33 = vld [vmem:[%s8913_s0 + $0x80] sm:$0xff] }
 0x104   :  { %v2003_v10 = vadd.f32 %v2002_v23, %v2001_v14  ;;  %v5414_v9 = vmax.f32 %v3296_v16, %v3360_v30  ;;  %v5416_v19 = vmin.f32 %v3488_v60, %v3552_v31  ;;  %v4761_v60 = vld [vmem:[%s8913_s0 + $0x180] sm:$0xff] }
 0x105   :  { %v2776_v38 = vsel %vm1972_vm3, %v2506_v52, 0.0  ;;  %v4825_v42 = vld [vmem:[%s8913_s0 + $0x380] sm:$0xff] }
 0x106   :  { %9397 = vst [vmem:[#allocation60_spill] sm:$0xff] %v5414_v9  ;;  %v2777_v4 = vadd.f32 %v2776_v38, %v2775_v15  ;;  %v4793_v15 = vld [vmem:[%s8913_s0 + $0x280] sm:$0xff] }
 0x107   :  { %9398 = vst [vmem:[#allocation61_spill] sm:$0xff] %v5416_v19 }
 0x109   :  { %v5421_v27 = vpop.f32.mrf.mxu2  ;;  %v5423_v61 = vpop.f32.mrf.mxu3 }
 0x10a   :  { %9399 = vst [vmem:[#allocation62_spill] sm:$0xff] %v5421_v27  ;;  %v1370_v16 = vpop.f32.mrf.mxu0  ;;  %v5431_v14 = vpop.f32.mrf.mxu1  ;;  %v3361_v30 = vmax.f32 %v5421_v27, %v5423_v61  ;;  %v3553_v31 = vmin.f32 %v5421_v27, %v5423_v61 }
 0x10b   :  { %9400 = vst [vmem:[#allocation63_spill] sm:$0xff] %v5423_v61  ;;  %v2004_v23 = vsel %vm1972_vm3, %v1370_v16, 0.0  ;;  %v2507_v52 = vmul.f32 %v1370_v16, %v1370_v16  ;;  %v3298_v1 = vmax.f32 %v1370_v16, %v5431_v14  ;;  %v3490_v26 = vmin.f32 %v1370_v16, %v5431_v14 }
 0x10c   :  { %v2005_v38 = vadd.f32 %v2004_v23, %v2003_v10  ;;  %v5444_v9 = vmax.f32 %v3297_v63, %v3361_v30  ;;  %v5446_v19 = vmin.f32 %v3489_v34, %v3553_v31 }
 0x10d   :  { %v2778_v54 = vsel %vm1972_vm3, %v2507_v52, 0.0  ;;  %4601 = vmatmul.msk.bf16.gmra.mxu0 %vm929_vm2, %v4729_v33  ;;  %4633 = vmatmul.msk.bf16.gmra.mxu1 %vm929_vm2, %v4761_v60 }
 0x10e   :  { %9401 = vst [vmem:[#allocation64_spill] sm:$0xff] %v5444_v9  ;;  %v2779_v5 = vadd.f32 %v2778_v54, %v2777_v4  ;;  %4665 = vmatmul.msk.bf16.gmra.mxu2 %vm929_vm2, %v4793_v15  ;;  %4697 = vmatmul.msk.bf16.gmra.mxu3 %vm929_vm2, %v4825_v42 }
 0x10f   :  { %9402 = vst [vmem:[#allocation65_spill] sm:$0xff] %v5446_v19 }
 0x111   :  { %v5455_v10 = vpop.f32.mrf.mxu2  ;;  %v5457_v63 = vpop.f32.mrf.mxu3 }
 0x112   :  { %9403 = vst [vmem:[#allocation66_spill] sm:$0xff] %v5455_v10  ;;  %v1372_v34 = vpop.f32.mrf.mxu0  ;;  %v5459_v30 = vpop.f32.mrf.mxu1  ;;  %v3362_v33 = vmax.f32 %v5455_v10, %v5457_v63  ;;  %v3554_v54 = vmin.f32 %v5455_v10, %v5457_v63 }
 0x113   :  { %9404 = vst [vmem:[#allocation67_spill] sm:$0xff] %v5457_v63  ;;  %v2006_v4 = vsel %vm1972_vm3, %v1372_v34, 0.0  ;;  %v2508_v60 = vmul.f32 %v1372_v34, %v1372_v34  ;;  %v3299_v52 = vmax.f32 %v1372_v34, %v5459_v30  ;;  %v3491_v9 = vmin.f32 %v1372_v34, %v5459_v30  ;;  %v4730_v63 = vld [vmem:[%s8913_s0 + $0x88] sm:$0xff] }
 0x114   :  { %v2007_v16 = vadd.f32 %v2006_v4, %v2005_v38  ;;  %v5466_v15 = vmax.f32 %v3298_v1, %v3362_v33  ;;  %v5468_v42 = vmin.f32 %v3490_v26, %v3554_v54  ;;  %v4762_v1 = vld [vmem:[%s8913_s0 + $0x188] sm:$0xff] }
 0x115   :  { %v2780_v31 = vsel %vm1972_vm3, %v2508_v60, 0.0  ;;  %v4826_v34 = vld [vmem:[%s8913_s0 + $0x388] sm:$0xff] }
 0x116   :  { %9405 = vst [vmem:[#allocation68_spill] sm:$0xff] %v5466_v15  ;;  %v2781_v23 = vadd.f32 %v2780_v31, %v2779_v5  ;;  %v4794_v5 = vld [vmem:[%s8913_s0 + $0x288] sm:$0xff] }
 0x117   :  { %9406 = vst [vmem:[#allocation69_spill] sm:$0xff] %v5468_v42 }
 0x119   :  { %v5473_v19 = vpop.f32.mrf.mxu2  ;;  %v5475_v61 = vpop.f32.mrf.mxu3 }
 0x11a   :  { %9407 = vst [vmem:[#allocation70_spill] sm:$0xff] %v5473_v19  ;;  %v1375_v26 = vpop.f32.mrf.mxu0  ;;  %v5483_v38 = vpop.f32.mrf.mxu1  ;;  %v3363_v33 = vmax.f32 %v5473_v19, %v5475_v61  ;;  %v3555_v54 = vmin.f32 %v5473_v19, %v5475_v61 }
 0x11b   :  { %9408 = vst [vmem:[#allocation71_spill] sm:$0xff] %v5475_v61  ;;  %v2008_v4 = vsel %vm1972_vm3, %v1375_v26, 0.0  ;;  %v2509_v60 = vmul.f32 %v1375_v26, %v1375_v26  ;;  %v3300_v12 = vmax.f32 %v1375_v26, %v5483_v38  ;;  %v3492_v46 = vmin.f32 %v1375_v26, %v5483_v38 }
 0x11c   :  { %v2009_v31 = vadd.f32 %v2008_v4, %v2007_v16  ;;  %v5496_v15 = vmax.f32 %v3299_v52, %v3363_v33  ;;  %v5498_v42 = vmin.f32 %v3491_v9, %v3555_v54 }
 0x11d   :  { %v2782_v29 = vsel %vm1972_vm3, %v2509_v60, 0.0  ;;  %4602 = vmatmul.msk.bf16.gmra.mxu0 %vm929_vm2, %v4730_v63  ;;  %4634 = vmatmul.msk.bf16.gmra.mxu1 %vm929_vm2, %v4762_v1 }
 0x11e   :  { %9409 = vst [vmem:[#allocation72_spill] sm:$0xff] %v5496_v15  ;;  %v2783_v55 = vadd.f32 %v2782_v29, %v2781_v23  ;;  %4666 = vmatmul.msk.bf16.gmra.mxu2 %vm929_vm2, %v4794_v5  ;;  %4698 = vmatmul.msk.bf16.gmra.mxu3 %vm929_vm2, %v4826_v34 }
 0x11f   :  { %9410 = vst [vmem:[#allocation73_spill] sm:$0xff] %v5498_v42 }
 0x121   :  { %v5507_v16 = vpop.f32.mrf.mxu2  ;;  %v5509_v52 = vpop.f32.mrf.mxu3 }
 0x122   :  { %9411 = vst [vmem:[#allocation74_spill] sm:$0xff] %v5507_v16  ;;  %v1377_v9 = vpop.f32.mrf.mxu0  ;;  %v5511_v33 = vpop.f32.mrf.mxu1  ;;  %v3364_v63 = vmax.f32 %v5507_v16, %v5509_v52  ;;  %v3556_v29 = vmin.f32 %v5507_v16, %v5509_v52 }
 0x123   :  { %9412 = vst [vmem:[#allocation75_spill] sm:$0xff] %v5509_v52  ;;  %v2010_v23 = vsel %vm1972_vm3, %v1377_v9, 0.0  ;;  %v2510_v1 = vmul.f32 %v1377_v9, %v1377_v9  ;;  %v3301_v60 = vmax.f32 %v1377_v9, %v5511_v33  ;;  %v3493_v15 = vmin.f32 %v1377_v9, %v5511_v33  ;;  %v4731_v52 = vld [vmem:[%s8913_s0 + $0x90] sm:$0xff] }
 0x124   :  { %v2011_v26 = vadd.f32 %v2010_v23, %v2009_v31  ;;  %v5518_v5 = vmax.f32 %v3300_v12, %v3364_v63  ;;  %v5520_v34 = vmin.f32 %v3492_v46, %v3556_v29  ;;  %v4763_v46 = vld [vmem:[%s8913_s0 + $0x190] sm:$0xff] }
 0x125   :  { %v2784_v54 = vsel %vm1972_vm3, %v2510_v1, 0.0  ;;  %v4827_v9 = vld [vmem:[%s8913_s0 + $0x390] sm:$0xff] }
 0x126   :  { %9413 = vst [vmem:[#allocation76_spill] sm:$0xff] %v5518_v5  ;;  %v2785_v4 = vadd.f32 %v2784_v54, %v2783_v55  ;;  %v4795_v55 = vld [vmem:[%s8913_s0 + $0x290] sm:$0xff] }
 0x127   :  { %9414 = vst [vmem:[#allocation77_spill] sm:$0xff] %v5520_v34 }
 0x129   :  { %v5525_v42 = vpop.f32.mrf.mxu2  ;;  %v5527_v61 = vpop.f32.mrf.mxu3 }
 0x12a   :  { %9415 = vst [vmem:[#allocation78_spill] sm:$0xff] %v5525_v42  ;;  %v1380_v12 = vpop.f32.mrf.mxu0  ;;  %v5535_v31 = vpop.f32.mrf.mxu1  ;;  %v3365_v63 = vmax.f32 %v5525_v42, %v5527_v61  ;;  %v3557_v29 = vmin.f32 %v5525_v42, %v5527_v61 }
 0x12b   :  { %9416 = vst [vmem:[#allocation79_spill] sm:$0xff] %v5527_v61  ;;  %v2012_v23 = vsel %vm1972_vm3, %v1380_v12, 0.0  ;;  %v2511_v1 = vmul.f32 %v1380_v12, %v1380_v12  ;;  %v3302_v37 = vmax.f32 %v1380_v12, %v5535_v31  ;;  %v3494_v22 = vmin.f32 %v1380_v12, %v5535_v31 }
 0x12c   :  { %v2013_v54 = vadd.f32 %v2012_v23, %v2011_v26  ;;  %v5548_v5 = vmax.f32 %v3301_v60, %v3365_v63  ;;  %v5550_v34 = vmin.f32 %v3493_v15, %v3557_v29 }
 0x12d   :  { %v2786_v18 = vsel %vm1972_vm3, %v2511_v1, 0.0  ;;  %4603 = vmatmul.msk.bf16.gmra.mxu0 %vm929_vm2, %v4731_v52  ;;  %4635 = vmatmul.msk.bf16.gmra.mxu1 %vm929_vm2, %v4763_v46 }
 0x12e   :  { %9417 = vst [vmem:[#allocation80_spill] sm:$0xff] %v5548_v5  ;;  %v2787_v62 = vadd.f32 %v2786_v18, %v2785_v4  ;;  %4667 = vmatmul.msk.bf16.gmra.mxu2 %vm929_vm2, %v4795_v55  ;;  %4699 = vmatmul.msk.bf16.gmra.mxu3 %vm929_vm2, %v4827_v9 }
 0x12f   :  { %9418 = vst [vmem:[#allocation81_spill] sm:$0xff] %v5550_v34 }
 0x131   :  { %v5559_v26 = vpop.f32.mrf.mxu2  ;;  %v5561_v60 = vpop.f32.mrf.mxu3 }
 0x132   :  { %9419 = vst [vmem:[#allocation82_spill] sm:$0xff] %v5559_v26  ;;  %v1382_v15 = vpop.f32.mrf.mxu0  ;;  %v5563_v63 = vpop.f32.mrf.mxu1  ;;  %v3366_v52 = vmax.f32 %v5559_v26, %v5561_v60  ;;  %v3558_v18 = vmin.f32 %v5559_v26, %v5561_v60 }
 0x133   :  { %9420 = vst [vmem:[#allocation83_spill] sm:$0xff] %v5561_v60  ;;  %v2014_v4 = vsel %vm1972_vm3, %v1382_v15, 0.0  ;;  %v2512_v46 = vmul.f32 %v1382_v15, %v1382_v15  ;;  %v3303_v1 = vmax.f32 %v1382_v15, %v5563_v63  ;;  %v3495_v5 = vmin.f32 %v1382_v15, %v5563_v63  ;;  %v4732_v60 = vld [vmem:[%s8913_s0 + $0x98] sm:$0xff] }
 0x134   :  { %v2015_v12 = vadd.f32 %v2014_v4, %v2013_v54  ;;  %v5570_v55 = vmax.f32 %v3302_v37, %v3366_v52  ;;  %v5572_v9 = vmin.f32 %v3494_v22, %v3558_v18  ;;  %v4764_v22 = vld [vmem:[%s8913_s0 + $0x198] sm:$0xff] }
 0x135   :  { %v2788_v29 = vsel %vm1972_vm3, %v2512_v46, 0.0  ;;  %v4828_v15 = vld [vmem:[%s8913_s0 + $0x398] sm:$0xff] }
 0x136   :  { %9421 = vst [vmem:[#allocation84_spill] sm:$0xff] %v5570_v55  ;;  %v2789_v23 = vadd.f32 %v2788_v29, %v2787_v62  ;;  %v4796_v62 = vld [vmem:[%s8913_s0 + $0x298] sm:$0xff] }
 0x137   :  { %9422 = vst [vmem:[#allocation85_spill] sm:$0xff] %v5572_v9 }
 0x139   :  { %v5577_v34 = vpop.f32.mrf.mxu2  ;;  %v5579_v61 = vpop.f32.mrf.mxu3 }
 0x13a   :  { %9423 = vst [vmem:[#allocation86_spill] sm:$0xff] %v5577_v34  ;;  %v1385_v37 = vpop.f32.mrf.mxu0  ;;  %v5587_v54 = vpop.f32.mrf.mxu1  ;;  %v3367_v52 = vmax.f32 %v5577_v34, %v5579_v61  ;;  %v3559_v18 = vmin.f32 %v5577_v34, %v5579_v61 }
 0x13b   :  { %9424 = vst [vmem:[#allocation87_spill] sm:$0xff] %v5579_v61  ;;  %v2016_v4 = vsel %vm1972_vm3, %v1385_v37, 0.0  ;;  %v2513_v46 = vmul.f32 %v1385_v37, %v1385_v37  ;;  %v3304_v26 = vmax.f32 %v1385_v37, %v5587_v54  ;;  %v3496_v42 = vmin.f32 %v1385_v37, %v5587_v54 }
 0x13c   :  { %v2017_v29 = vadd.f32 %v2016_v4, %v2015_v12  ;;  %v5600_v55 = vmax.f32 %v3303_v1, %v3367_v52  ;;  %v5602_v9 = vmin.f32 %v3495_v5, %v3559_v18 }
 0x13d   :  { %v2790_v3 = vsel %vm1972_vm3, %v2513_v46, 0.0  ;;  %4604 = vmatmul.msk.bf16.gmra.mxu0 %vm929_vm2, %v4732_v60  ;;  %4636 = vmatmul.msk.bf16.gmra.mxu1 %vm929_vm2, %v4764_v22 }
 0x13e   :  { %9425 = vst [vmem:[#allocation88_spill] sm:$0xff] %v5600_v55  ;;  %v2791_v50 = vadd.f32 %v2790_v3, %v2789_v23  ;;  %4668 = vmatmul.msk.bf16.gmra.mxu2 %vm929_vm2, %v4796_v62  ;;  %4700 = vmatmul.msk.bf16.gmra.mxu3 %vm929_vm2, %v4828_v15 }
 0x13f   :  { %9426 = vst [vmem:[#allocation89_spill] sm:$0xff] %v5602_v9 }
 0x141   :  { %v5611_v12 = vpop.f32.mrf.mxu2  ;;  %v5613_v1 = vpop.f32.mrf.mxu3 }
 0x142   :  { %9427 = vst [vmem:[#allocation90_spill] sm:$0xff] %v5611_v12  ;;  %v1387_v5 = vpop.f32.mrf.mxu0  ;;  %v5615_v52 = vpop.f32.mrf.mxu1  ;;  %v3368_v60 = vmax.f32 %v5611_v12, %v5613_v1  ;;  %v3560_v3 = vmin.f32 %v5611_v12, %v5613_v1 }
 0x143   :  { %9428 = vst [vmem:[#allocation91_spill] sm:$0xff] %v5613_v1  ;;  %v2018_v23 = vsel %vm1972_vm3, %v1387_v5, 0.0  ;;  %v2514_v22 = vmul.f32 %v1387_v5, %v1387_v5  ;;  %v3305_v46 = vmax.f32 %v1387_v5, %v5615_v52  ;;  %v3497_v55 = vmin.f32 %v1387_v5, %v5615_v52  ;;  %v4733_v1 = vld [vmem:[%s8913_s0 + $0xa0] sm:$0xff] }
 0x144   :  { %v2019_v37 = vadd.f32 %v2018_v23, %v2017_v29  ;;  %v5622_v62 = vmax.f32 %v3304_v26, %v3368_v60  ;;  %v5624_v15 = vmin.f32 %v3496_v42, %v3560_v3  ;;  %v4765_v42 = vld [vmem:[%s8913_s0 + $0x1a0] sm:$0xff] }
 0x145   :  { %v2792_v18 = vsel %vm1972_vm3, %v2514_v22, 0.0  ;;  %v4829_v5 = vld [vmem:[%s8913_s0 + $0x3a0] sm:$0xff] }
 0x146   :  { %9429 = vst [vmem:[#allocation92_spill] sm:$0xff] %v5622_v62  ;;  %v2793_v4 = vadd.f32 %v2792_v18, %v2791_v50  ;;  %v4797_v50 = vld [vmem:[%s8913_s0 + $0x2a0] sm:$0xff] }
 0x147   :  { %9430 = vst [vmem:[#allocation93_spill] sm:$0xff] %v5624_v15 }
 0x149   :  { %v5629_v9 = vpop.f32.mrf.mxu2  ;;  %v5631_v61 = vpop.f32.mrf.mxu3 }
 0x14a   :  { %9431 = vst [vmem:[#allocation94_spill] sm:$0xff] %v5629_v9  ;;  %v1390_v26 = vpop.f32.mrf.mxu0  ;;  %v5639_v29 = vpop.f32.mrf.mxu1  ;;  %v3369_v60 = vmax.f32 %v5629_v9, %v5631_v61  ;;  %v3561_v3 = vmin.f32 %v5629_v9, %v5631_v61 }
 0x14b   :  { %9432 = vst [vmem:[#allocation95_spill] sm:$0xff] %v5631_v61  ;;  %v2020_v23 = vsel %vm1972_vm3, %v1390_v26, 0.0  ;;  %v2515_v22 = vmul.f32 %v1390_v26, %v1390_v26  ;;  %v3306_v16 = vmax.f32 %v1390_v26, %v5639_v29  ;;  %v3498_v19 = vmin.f32 %v1390_v26, %v5639_v29 }
 0x14c   :  { %v2021_v18 = vadd.f32 %v2020_v23, %v2019_v37  ;;  %v5652_v62 = vmax.f32 %v3305_v46, %v3369_v60  ;;  %v5654_v15 = vmin.f32 %v3497_v55, %v3561_v3 }
 0x14d   :  { %v2794_v12 = vsel %vm1972_vm3, %v2515_v22, 0.0  ;;  %4605 = vmatmul.msk.bf16.gmra.mxu0 %vm929_vm2, %v4733_v1  ;;  %4637 = vmatmul.msk.bf16.gmra.mxu1 %vm929_vm2, %v4765_v42 }
 0x14e   :  { %9433 = vst [vmem:[#allocation96_spill] sm:$0xff] %v5652_v62  ;;  %v2795_v34 = vadd.f32 %v2794_v12, %v2793_v4  ;;  %4669 = vmatmul.msk.bf16.gmra.mxu2 %vm929_vm2, %v4797_v50  ;;  %4701 = vmatmul.msk.bf16.gmra.mxu3 %vm929_vm2, %v4829_v5 }
 0x14f   :  { %9434 = vst [vmem:[#allocation97_spill] sm:$0xff] %v5654_v15 }
 0x151   :  { %v5663_v37 = vpop.f32.mrf.mxu2  ;;  %v5665_v46 = vpop.f32.mrf.mxu3 }
 0x152   :  { %9435 = vst [vmem:[#allocation98_spill] sm:$0xff] %v5663_v37  ;;  %v1392_v55 = vpop.f32.mrf.mxu0  ;;  %v5667_v60 = vpop.f32.mrf.mxu1  ;;  %v3370_v1 = vmax.f32 %v5663_v37, %v5665_v46  ;;  %v3562_v12 = vmin.f32 %v5663_v37, %v5665_v46 }
 0x153   :  { %9436 = vst [vmem:[#allocation99_spill] sm:$0xff] %v5665_v46  ;;  %v2022_v4 = vsel %vm1972_vm3, %v1392_v55, 0.0  ;;  %v2516_v42 = vmul.f32 %v1392_v55, %v1392_v55  ;;  %v3307_v22 = vmax.f32 %v1392_v55, %v5667_v60  ;;  %v3499_v62 = vmin.f32 %v1392_v55, %v5667_v60  ;;  %v4734_v46 = vld [vmem:[%s8913_s0 + $0xa8] sm:$0xff] }
 0x154   :  { %v2023_v26 = vadd.f32 %v2022_v4, %v2021_v18  ;;  %v5674_v50 = vmax.f32 %v3306_v16, %v3370_v1  ;;  %v5676_v5 = vmin.f32 %v3498_v19, %v3562_v12  ;;  %v4766_v19 = vld [vmem:[%s8913_s0 + $0x1a8] sm:$0xff] }
 0x155   :  { %v2796_v3 = vsel %vm1972_vm3, %v2516_v42, 0.0  ;;  %v4830_v55 = vld [vmem:[%s8913_s0 + $0x3a8] sm:$0xff] }
 0x156   :  { %9437 = vst [vmem:[#allocation100_spill] sm:$0xff] %v5674_v50  ;;  %v2797_v23 = vadd.f32 %v2796_v3, %v2795_v34  ;;  %v4798_v34 = vld [vmem:[%s8913_s0 + $0x2a8] sm:$0xff] }
 0x157   :  { %9438 = vst [vmem:[#allocation101_spill] sm:$0xff] %v5676_v5 }
 0x159   :  { %v5681_v15 = vpop.f32.mrf.mxu2  ;;  %v5683_v61 = vpop.f32.mrf.mxu3 }
 0x15a   :  { %9439 = vst [vmem:[#allocation102_spill] sm:$0xff] %v5681_v15  ;;  %v1395_v16 = vpop.f32.mrf.mxu0  ;;  %v5691_v18 = vpop.f32.mrf.mxu1  ;;  %v3371_v1 = vmax.f32 %v5681_v15, %v5683_v61  ;;  %v3563_v12 = vmin.f32 %v5681_v15, %v5683_v61 }
 0x15b   :  { %9440 = vst [vmem:[#allocation103_spill] sm:$0xff] %v5683_v61  ;;  %v2024_v4 = vsel %vm1972_vm3, %v1395_v16, 0.0  ;;  %v2517_v42 = vmul.f32 %v1395_v16, %v1395_v16  ;;  %v3308_v10 = vmax.f32 %v1395_v16, %v5691_v18  ;;  %v3500_v27 = vmin.f32 %v1395_v16, %v5691_v18 }
 0x15c   :  { %v2025_v3 = vadd.f32 %v2024_v4, %v2023_v26  ;;  %v5704_v50 = vmax.f32 %v3307_v22, %v3371_v1  ;;  %v5706_v5 = vmin.f32 %v3499_v62, %v3563_v12 }
 0x15d   :  { %v2798_v37 = vsel %vm1972_vm3, %v2517_v42, 0.0  ;;  %4606 = vmatmul.msk.bf16.gmra.mxu0 %vm929_vm2, %v4734_v46  ;;  %4638 = vmatmul.msk.bf16.gmra.mxu1 %vm929_vm2, %v4766_v19 }
 0x15e   :  { %9441 = vst [vmem:[#allocation104_spill] sm:$0xff] %v5704_v50  ;;  %v2799_v9 = vadd.f32 %v2798_v37, %v2797_v23  ;;  %4670 = vmatmul.msk.bf16.gmra.mxu2 %vm929_vm2, %v4798_v34  ;;  %4702 = vmatmul.msk.bf16.gmra.mxu3 %vm929_vm2, %v4830_v55 }
 0x15f   :  { %9442 = vst [vmem:[#allocation105_spill] sm:$0xff] %v5706_v5 }
 0x161   :  { %v5715_v26 = vpop.f32.mrf.mxu2  ;;  %v5717_v22 = vpop.f32.mrf.mxu3 }
 0x162   :  { %9443 = vst [vmem:[#allocation106_spill] sm:$0xff] %v5715_v26  ;;  %v1397_v62 = vpop.f32.mrf.mxu0  ;;  %v5719_v1 = vpop.f32.mrf.mxu1  ;;  %v3372_v46 = vmax.f32 %v5715_v26, %v5717_v22  ;;  %v3564_v37 = vmin.f32 %v5715_v26, %v5717_v22 }
 0x163   :  { %9444 = vst [vmem:[#allocation107_spill] sm:$0xff] %v5717_v22  ;;  %v2026_v23 = vsel %vm1972_vm3, %v1397_v62, 0.0  ;;  %v2518_v19 = vmul.f32 %v1397_v62, %v1397_v62  ;;  %v3309_v42 = vmax.f32 %v1397_v62, %v5719_v1  ;;  %v3501_v50 = vmin.f32 %v1397_v62, %v5719_v1  ;;  %v4735_v22 = vld [vmem:[%s8913_s0 + $0xb0] sm:$0xff] }
 0x164   :  { %v2027_v16 = vadd.f32 %v2026_v23, %v2025_v3  ;;  %v5726_v34 = vmax.f32 %v3308_v10, %v3372_v46  ;;  %v5728_v55 = vmin.f32 %v3500_v27, %v3564_v37  ;;  %v4767_v27 = vld [vmem:[%s8913_s0 + $0x1b0] sm:$0xff] }
 0x165   :  { %v2800_v12 = vsel %vm1972_vm3, %v2518_v19, 0.0  ;;  %v4831_v62 = vld [vmem:[%s8913_s0 + $0x3b0] sm:$0xff] }
 0x166   :  { %9445 = vst [vmem:[#allocation108_spill] sm:$0xff] %v5726_v34  ;;  %v2801_v4 = vadd.f32 %v2800_v12, %v2799_v9  ;;  %v4799_v9 = vld [vmem:[%s8913_s0 + $0x2b0] sm:$0xff] }
 0x167   :  { %9446 = vst [vmem:[#allocation109_spill] sm:$0xff] %v5728_v55 }
 0x169   :  { %v5733_v5 = vpop.f32.mrf.mxu2  ;;  %v5735_v61 = vpop.f32.mrf.mxu3 }
 0x16a   :  { %9447 = vst [vmem:[#allocation110_spill] sm:$0xff] %v5733_v5  ;;  %v1400_v10 = vpop.f32.mrf.mxu0  ;;  %v5743_v3 = vpop.f32.mrf.mxu1  ;;  %v3373_v46 = vmax.f32 %v5733_v5, %v5735_v61  ;;  %v3565_v37 = vmin.f32 %v5733_v5, %v5735_v61 }
 0x16b   :  { %9448 = vst [vmem:[#allocation111_spill] sm:$0xff] %v5735_v61  ;;  %v2028_v23 = vsel %vm1972_vm3, %v1400_v10, 0.0  ;;  %v2519_v19 = vmul.f32 %v1400_v10, %v1400_v10  ;;  %v3310_v39 = vmax.f32 %v1400_v10, %v5743_v3  ;;  %v3502_v47 = vmin.f32 %v1400_v10, %v5743_v3 }
 0x16c   :  { %v2029_v12 = vadd.f32 %v2028_v23, %v2027_v16  ;;  %v5756_v34 = vmax.f32 %v3309_v42, %v3373_v46  ;;  %v5758_v55 = vmin.f32 %v3501_v50, %v3565_v37 }
 0x16d   :  { %v2802_v26 = vsel %vm1972_vm3, %v2519_v19, 0.0  ;;  %4607 = vmatmul.msk.bf16.gmra.mxu0 %vm929_vm2, %v4735_v22  ;;  %4639 = vmatmul.msk.bf16.gmra.mxu1 %vm929_vm2, %v4767_v27 }
 0x16e   :  { %9449 = vst [vmem:[#allocation112_spill] sm:$0xff] %v5756_v34  ;;  %v2803_v15 = vadd.f32 %v2802_v26, %v2801_v4  ;;  %4671 = vmatmul.msk.bf16.gmra.mxu2 %vm929_vm2, %v4799_v9  ;;  %4703 = vmatmul.msk.bf16.gmra.mxu3 %vm929_vm2, %v4831_v62 }
 0x16f   :  { %9450 = vst [vmem:[#allocation113_spill] sm:$0xff] %v5758_v55 }
 0x171   :  { %v5767_v16 = vpop.f32.mrf.mxu2  ;;  %v5769_v42 = vpop.f32.mrf.mxu3 }
 0x172   :  { %9451 = vst [vmem:[#allocation114_spill] sm:$0xff] %v5767_v16  ;;  %v1402_v50 = vpop.f32.mrf.mxu0  ;;  %v5771_v46 = vpop.f32.mrf.mxu1  ;;  %v3374_v22 = vmax.f32 %v5767_v16, %v5769_v42  ;;  %v3566_v26 = vmin.f32 %v5767_v16, %v5769_v42 }
 0x173   :  { %9452 = vst [vmem:[#allocation115_spill] sm:$0xff] %v5769_v42  ;;  %v2030_v4 = vsel %vm1972_vm3, %v1402_v50, 0.0  ;;  %v2520_v27 = vmul.f32 %v1402_v50, %v1402_v50  ;;  %v3311_v19 = vmax.f32 %v1402_v50, %v5771_v46  ;;  %v3503_v34 = vmin.f32 %v1402_v50, %v5771_v46  ;;  %v4736_v42 = vld [vmem:[%s8913_s0 + $0xb8] sm:$0xff] }
 0x174   :  { %v2031_v10 = vadd.f32 %v2030_v4, %v2029_v12  ;;  %v5778_v9 = vmax.f32 %v3310_v39, %v3374_v22  ;;  %v5780_v62 = vmin.f32 %v3502_v47, %v3566_v26  ;;  %v4768_v47 = vld [vmem:[%s8913_s0 + $0x1b8] sm:$0xff] }
 0x175   :  { %v2804_v37 = vsel %vm1972_vm3, %v2520_v27, 0.0  ;;  %v4832_v50 = vld [vmem:[%s8913_s0 + $0x3b8] sm:$0xff] }
 0x176   :  { %9453 = vst [vmem:[#allocation116_spill] sm:$0xff] %v5778_v9  ;;  %v2805_v23 = vadd.f32 %v2804_v37, %v2803_v15  ;;  %v4800_v15 = vld [vmem:[%s8913_s0 + $0x2b8] sm:$0xff] }
 0x177   :  { %9454 = vst [vmem:[#allocation117_spill] sm:$0xff] %v5780_v62 }
 0x179   :  { %v5785_v55 = vpop.f32.mrf.mxu2  ;;  %v5787_v61 = vpop.f32.mrf.mxu3 }
 0x17a   :  { %9455 = vst [vmem:[#allocation118_spill] sm:$0xff] %v5785_v55  ;;  %v1405_v39 = vpop.f32.mrf.mxu0  ;;  %v5795_v12 = vpop.f32.mrf.mxu1  ;;  %v3375_v22 = vmax.f32 %v5785_v55, %v5787_v61  ;;  %v3567_v26 = vmin.f32 %v5785_v55, %v5787_v61 }
 0x17b   :  { %9456 = vst [vmem:[#allocation119_spill] sm:$0xff] %v5787_v61  ;;  %v2032_v4 = vsel %vm1972_vm3, %v1405_v39, 0.0  ;;  %v2521_v27 = vmul.f32 %v1405_v39, %v1405_v39  ;;  %v3312_v40 = vmax.f32 %v1405_v39, %v5795_v12  ;;  %v3504_v13 = vmin.f32 %v1405_v39, %v5795_v12 }
 0x17c   :  { %v2033_v37 = vadd.f32 %v2032_v4, %v2031_v10  ;;  %v5808_v9 = vmax.f32 %v3311_v19, %v3375_v22  ;;  %v5810_v62 = vmin.f32 %v3503_v34, %v3567_v26 }
 0x17d   :  { %v2806_v16 = vsel %vm1972_vm3, %v2521_v27, 0.0  ;;  %4608 = vmatmul.msk.bf16.gmra.mxu0 %vm929_vm2, %v4736_v42  ;;  %4640 = vmatmul.msk.bf16.gmra.mxu1 %vm929_vm2, %v4768_v47 }
 0x17e   :  { %9457 = vst [vmem:[#allocation120_spill] sm:$0xff] %v5808_v9  ;;  %v2807_v5 = vadd.f32 %v2806_v16, %v2805_v23  ;;  %4672 = vmatmul.msk.bf16.gmra.mxu2 %vm929_vm2, %v4800_v15  ;;  %4704 = vmatmul.msk.bf16.gmra.mxu3 %vm929_vm2, %v4832_v50 }
 0x17f   :  { %9458 = vst [vmem:[#allocation121_spill] sm:$0xff] %v5810_v62 }
 0x181   :  { %v5819_v10 = vpop.f32.mrf.mxu2  ;;  %v5821_v19 = vpop.f32.mrf.mxu3 }
 0x182   :  { %9459 = vst [vmem:[#allocation122_spill] sm:$0xff] %v5819_v10  ;;  %v1407_v34 = vpop.f32.mrf.mxu0  ;;  %v5823_v22 = vpop.f32.mrf.mxu1  ;;  %v3376_v42 = vmax.f32 %v5819_v10, %v5821_v19  ;;  %v3568_v16 = vmin.f32 %v5819_v10, %v5821_v19 }
 0x183   :  { %9460 = vst [vmem:[#allocation123_spill] sm:$0xff] %v5821_v19  ;;  %v2034_v23 = vsel %vm1972_vm3, %v1407_v34, 0.0  ;;  %v2522_v47 = vmul.f32 %v1407_v34, %v1407_v34  ;;  %v3313_v26 = vmax.f32 %v1407_v34, %v5823_v22  ;;  %v3505_v4 = vmin.f32 %v1407_v34, %v5823_v22  ;;  %v4737_v19 = vld [vmem:[%s8913_s0 + $0xc0] sm:$0xff] }
 0x184   :  { %v5830_v39 = vmax.f32 %v3312_v40, %v3376_v42  ;;  %v5832_v15 = vmin.f32 %v3504_v13, %v3568_v16  ;;  %v2035_v27 = vadd.f32 %v2034_v23, %v2033_v37  ;;  %v4769_v13 = vld [vmem:[%s8913_s0 + $0x1c0] sm:$0xff] }
 0x185   :  { %v2808_v50 = vsel %vm1972_vm3, %v2522_v47, 0.0  ;;  %v4801_v37 = vld [vmem:[%s8913_s0 + $0x2c0] sm:$0xff] }
 0x186   :  { %9461 = vst [vmem:[#allocation124_spill] sm:$0xff] %v5830_v39  ;;  %v2809_v9 = vadd.f32 %v2808_v50, %v2807_v5  ;;  %v4833_v5 = vld [vmem:[%s8913_s0 + $0x3c0] sm:$0xff] }
 0x187   :  { %9462 = vst [vmem:[#allocation125_spill] sm:$0xff] %v5832_v15 }
 0x189   :  { %v5837_v62 = vpop.f32.mrf.mxu2  ;;  %v5839_v61 = vpop.f32.mrf.mxu3 }
 0x18a   :  { %9463 = vst [vmem:[#allocation126_spill] sm:$0xff] %v5837_v62  ;;  %v1410_v40 = vpop.f32.mrf.mxu0  ;;  %v5847_v42 = vpop.f32.mrf.mxu1  ;;  %v3377_v34 = vmax.f32 %v5837_v62, %v5839_v61  ;;  %v3569_v16 = vmin.f32 %v5837_v62, %v5839_v61 }
 0x18b   :  { %9464 = vst [vmem:[#allocation127_spill] sm:$0xff] %v5839_v61  ;;  %v2036_v23 = vsel %vm1972_vm3, %v1410_v40, 0.0  ;;  %v2523_v47 = vmul.f32 %v1410_v40, %v1410_v40  ;;  %v3314_v8 = vmax.f32 %v1410_v40, %v5847_v42  ;;  %v3506_v28 = vmin.f32 %v1410_v40, %v5847_v42 }
 0x18c   :  { %v2037_v50 = vadd.f32 %v2036_v23, %v2035_v27  ;;  %v5860_v39 = vmax.f32 %v3313_v26, %v3377_v34  ;;  %v5862_v15 = vmin.f32 %v3505_v4, %v3569_v16 }
 0x18d   :  { %v2810_v10 = vsel %vm1972_vm3, %v2523_v47, 0.0  ;;  %4609 = vmatmul.msk.bf16.gmra.mxu0 %vm929_vm2, %v4737_v19  ;;  %4641 = vmatmul.msk.bf16.gmra.mxu1 %vm929_vm2, %v4769_v13 }
 0x18e   :  { %9465 = vst [vmem:[#allocation128_spill] sm:$0xff] %v5860_v39  ;;  %v2811_v55 = vadd.f32 %v2810_v10, %v2809_v9  ;;  %4673 = vmatmul.msk.bf16.gmra.mxu2 %vm929_vm2, %v4801_v37  ;;  %4705 = vmatmul.msk.bf16.gmra.mxu3 %vm929_vm2, %v4833_v5 }
 0x18f   :  { %9466 = vst [vmem:[#allocation129_spill] sm:$0xff] %v5862_v15 }
 0x191   :  { %v5871_v27 = vpop.f32.mrf.mxu2  ;;  %v5873_v26 = vpop.f32.mrf.mxu3 }
 0x192   :  { %9467 = vst [vmem:[#allocation130_spill] sm:$0xff] %v5871_v27  ;;  %v1412_v4 = vpop.f32.mrf.mxu0  ;;  %v5875_v34 = vpop.f32.mrf.mxu1  ;;  %v3378_v19 = vmax.f32 %v5871_v27, %v5873_v26  ;;  %v3570_v9 = vmin.f32 %v5871_v27, %v5873_v26 }
 0x193   :  { %9468 = vst [vmem:[#allocation131_spill] sm:$0xff] %v5873_v26  ;;  %v2038_v10 = vsel %vm1972_vm3, %v1412_v4, 0.0  ;;  %v2524_v13 = vmul.f32 %v1412_v4, %v1412_v4  ;;  %v3315_v16 = vmax.f32 %v1412_v4, %v5875_v34  ;;  %v3507_v23 = vmin.f32 %v1412_v4, %v5875_v34  ;;  %v4738_v26 = vld [vmem:[%s8913_s0 + $0xc8] sm:$0xff] }
 0x194   :  { %v5882_v40 = vmax.f32 %v3314_v8, %v3378_v19  ;;  %v5884_v37 = vmin.f32 %v3506_v28, %v3570_v9  ;;  %v2039_v47 = vadd.f32 %v2038_v10, %v2037_v50  ;;  %v4770_v28 = vld [vmem:[%s8913_s0 + $0x1c8] sm:$0xff] }
 0x195   :  { %v2812_v5 = vsel %vm1972_vm3, %v2524_v13, 0.0  ;;  %v4802_v50 = vld [vmem:[%s8913_s0 + $0x2c8] sm:$0xff] }
 0x196   :  { %9469 = vst [vmem:[#allocation132_spill] sm:$0xff] %v5882_v40  ;;  %v2813_v39 = vadd.f32 %v2812_v5, %v2811_v55  ;;  %v4834_v55 = vld [vmem:[%s8913_s0 + $0x3c8] sm:$0xff] }
 0x197   :  { %9470 = vst [vmem:[#allocation133_spill] sm:$0xff] %v5884_v37 }
 0x199   :  { %v5889_v15 = vpop.f32.mrf.mxu2  ;;  %v5891_v61 = vpop.f32.mrf.mxu3 }
 0x19a   :  { %9471 = vst [vmem:[#allocation134_spill] sm:$0xff] %v5889_v15  ;;  %v1415_v8 = vpop.f32.mrf.mxu0  ;;  %v5899_v19 = vpop.f32.mrf.mxu1  ;;  %v3379_v4 = vmax.f32 %v5889_v15, %v5891_v61  ;;  %v3571_v9 = vmin.f32 %v5889_v15, %v5891_v61 }
 0x19b   :  { %9472 = vst [vmem:[#allocation135_spill] sm:$0xff] %v5891_v61  ;;  %v2040_v10 = vsel %vm1972_vm3, %v1415_v8, 0.0  ;;  %v2525_v13 = vmul.f32 %v1415_v8, %v1415_v8  ;;  %v3316_v51 = vmax.f32 %v1415_v8, %v5899_v19  ;;  %v3508_v11 = vmin.f32 %v1415_v8, %v5899_v19 }
 0x19c   :  { %9473 = vst [vmem:[#allocation136_spill] sm:$0xff] %v5899_v19  ;;  %v2041_v5 = vadd.f32 %v2040_v10, %v2039_v47  ;;  %v5912_v40 = vmax.f32 %v3315_v16, %v3379_v4  ;;  %v5914_v37 = vmin.f32 %v3507_v23, %v3571_v9 }
 0x19d   :  { %v2814_v27 = vsel %vm1972_vm3, %v2525_v13, 0.0  ;;  %4610 = vmatmul.msk.bf16.gmra.mxu0 %vm929_vm2, %v4738_v26  ;;  %4642 = vmatmul.msk.bf16.gmra.mxu1 %vm929_vm2, %v4770_v28 }
 0x19e   :  { %9474 = vst [vmem:[#allocation137_spill] sm:$0xff] %v5912_v40  ;;  %v2815_v62 = vadd.f32 %v2814_v27, %v2813_v39  ;;  %4674 = vmatmul.msk.bf16.gmra.mxu2 %vm929_vm2, %v4802_v50  ;;  %4706 = vmatmul.msk.bf16.gmra.mxu3 %vm929_vm2, %v4834_v55 }
 0x19f   :  { %9475 = vst [vmem:[#allocation138_spill] sm:$0xff] %v5914_v37 }
 0x1a1   :  { %v5923_v47 = vpop.f32.mrf.mxu2  ;;  %v5925_v16 = vpop.f32.mrf.mxu3 }
 0x1a2   :  { %9476 = vst [vmem:[#allocation139_spill] sm:$0xff] %v5923_v47  ;;  %v1417_v23 = vpop.f32.mrf.mxu0  ;;  %v5927_v4 = vpop.f32.mrf.mxu1  ;;  %v3380_v26 = vmax.f32 %v5923_v47, %v5925_v16  ;;  %v3572_v39 = vmin.f32 %v5923_v47, %v5925_v16 }
 0x1a3   :  { %9477 = vst [vmem:[#allocation140_spill] sm:$0xff] %v5925_v16  ;;  %v2042_v27 = vsel %vm1972_vm3, %v1417_v23, 0.0  ;;  %v2526_v28 = vmul.f32 %v1417_v23, %v1417_v23  ;;  %v3317_v9 = vmax.f32 %v1417_v23, %v5927_v4  ;;  %v3509_v10 = vmin.f32 %v1417_v23, %v5927_v4  ;;  %v4739_v16 = vld [vmem:[%s8913_s0 + $0xd0] sm:$0xff] }
 0x1a4   :  { %9478 = vst [vmem:[#allocation141_spill] sm:$0xff] %v5927_v4  ;;  %v5934_v8 = vmax.f32 %v3316_v51, %v3380_v26  ;;  %v5936_v50 = vmin.f32 %v3508_v11, %v3572_v39  ;;  %v2043_v13 = vadd.f32 %v2042_v27, %v2041_v5  ;;  %v4771_v11 = vld [vmem:[%s8913_s0 + $0x1d0] sm:$0xff] }
 0x1a5   :  { %v2816_v55 = vsel %vm1972_vm3, %v2526_v28, 0.0  ;;  %v4803_v5 = vld [vmem:[%s8913_s0 + $0x2d0] sm:$0xff] }
 0x1a6   :  { %9479 = vst [vmem:[#allocation142_spill] sm:$0xff] %v5934_v8  ;;  %v2817_v40 = vadd.f32 %v2816_v55, %v2815_v62  ;;  %v4835_v62 = vld [vmem:[%s8913_s0 + $0x3d0] sm:$0xff] }
 0x1a7   :  { %9480 = vst [vmem:[#allocation143_spill] sm:$0xff] %v5936_v50 }
 0x1a9   :  { %v5941_v37 = vpop.f32.mrf.mxu2  ;;  %v5943_v61 = vpop.f32.mrf.mxu3 }
 0x1aa   :  { %9481 = vst [vmem:[#allocation144_spill] sm:$0xff] %v5941_v37  ;;  %v1420_v51 = vpop.f32.mrf.mxu0  ;;  %v5951_v26 = vpop.f32.mrf.mxu1  ;;  %v3381_v23 = vmax.f32 %v5941_v37, %v5943_v61  ;;  %v3573_v39 = vmin.f32 %v5941_v37, %v5943_v61 }
 0x1ab   :  { %9482 = vst [vmem:[#allocation145_spill] sm:$0xff] %v5943_v61  ;;  %v2044_v27 = vsel %vm1972_vm3, %v1420_v51, 0.0  ;;  %v2527_v28 = vmul.f32 %v1420_v51, %v1420_v51  ;;  %v3318_v45 = vmax.f32 %v1420_v51, %v5951_v26  ;;  %v3510_v17 = vmin.f32 %v1420_v51, %v5951_v26 }
 0x1ac   :  { %9483 = vst [vmem:[#allocation146_spill] sm:$0xff] %v5951_v26  ;;  %v2045_v55 = vadd.f32 %v2044_v27, %v2043_v13  ;;  %v5964_v8 = vmax.f32 %v3317_v9, %v3381_v23  ;;  %v5966_v50 = vmin.f32 %v3509_v10, %v3573_v39 }
 0x1ad   :  { %v2818_v47 = vsel %vm1972_vm3, %v2527_v28, 0.0  ;;  %4611 = vmatmul.msk.bf16.gmra.mxu0 %vm929_vm2, %v4739_v16  ;;  %4643 = vmatmul.msk.bf16.gmra.mxu1 %vm929_vm2, %v4771_v11 }
 0x1ae   :  { %9484 = vst [vmem:[#allocation147_spill] sm:$0xff] %v5964_v8  ;;  %v2819_v15 = vadd.f32 %v2818_v47, %v2817_v40  ;;  %4675 = vmatmul.msk.bf16.gmra.mxu2 %vm929_vm2, %v4803_v5  ;;  %4707 = vmatmul.msk.bf16.gmra.mxu3 %vm929_vm2, %v4835_v62 }
 0x1af   :  { %9485 = vst [vmem:[#allocation148_spill] sm:$0xff] %v5966_v50 }
 0x1b1   :  { %v5975_v13 = vpop.f32.mrf.mxu2  ;;  %v5977_v9 = vpop.f32.mrf.mxu3 }
 0x1b2   :  { %9486 = vst [vmem:[#allocation149_spill] sm:$0xff] %v5975_v13  ;;  %v1422_v10 = vpop.f32.mrf.mxu0  ;;  %v5979_v23 = vpop.f32.mrf.mxu1  ;;  %v3382_v16 = vmax.f32 %v5975_v13, %v5977_v9  ;;  %v3574_v40 = vmin.f32 %v5975_v13, %v5977_v9 }
 0x1b3   :  { %9487 = vst [vmem:[#allocation150_spill] sm:$0xff] %v5977_v9  ;;  %v2046_v47 = vsel %vm1972_vm3, %v1422_v10, 0.0  ;;  %v2528_v11 = vmul.f32 %v1422_v10, %v1422_v10  ;;  %v3319_v39 = vmax.f32 %v1422_v10, %v5979_v23  ;;  %v3511_v27 = vmin.f32 %v1422_v10, %v5979_v23  ;;  %v4740_v9 = vld [vmem:[%s8913_s0 + $0xd8] sm:$0xff] }
 0x1b4   :  { %9488 = vst [vmem:[#allocation151_spill] sm:$0xff] %v5979_v23  ;;  %v5986_v51 = vmax.f32 %v3318_v45, %v3382_v16  ;;  %v5988_v5 = vmin.f32 %v3510_v17, %v3574_v40  ;;  %v2047_v28 = vadd.f32 %v2046_v47, %v2045_v55  ;;  %v4772_v17 = vld [vmem:[%s8913_s0 + $0x1d8] sm:$0xff] }
 0x1b5   :  { %v2820_v62 = vsel %vm1972_vm3, %v2528_v11, 0.0  ;;  %v4804_v55 = vld [vmem:[%s8913_s0 + $0x2d8] sm:$0xff] }
 0x1b6   :  { %9489 = vst [vmem:[#allocation152_spill] sm:$0xff] %v5986_v51  ;;  %v2821_v8 = vadd.f32 %v2820_v62, %v2819_v15  ;;  %v4836_v15 = vld [vmem:[%s8913_s0 + $0x3d8] sm:$0xff] }
 0x1b7   :  { %9490 = vst [vmem:[#allocation153_spill] sm:$0xff] %v5988_v5 }
 0x1b9   :  { %v5993_v50 = vpop.f32.mrf.mxu2  ;;  %v5995_v61 = vpop.f32.mrf.mxu3 }
 0x1ba   :  { %9491 = vst [vmem:[#allocation154_spill] sm:$0xff] %v5993_v50  ;;  %v1425_v45 = vpop.f32.mrf.mxu0  ;;  %v6003_v16 = vpop.f32.mrf.mxu1  ;;  %v3383_v10 = vmax.f32 %v5993_v50, %v5995_v61  ;;  %v3575_v40 = vmin.f32 %v5993_v50, %v5995_v61 }
 0x1bb   :  { %9492 = vst [vmem:[#allocation155_spill] sm:$0xff] %v5995_v61  ;;  %v2048_v47 = vsel %vm1972_vm3, %v1425_v45, 0.0  ;;  %v2529_v11 = vmul.f32 %v1425_v45, %v1425_v45  ;;  %v3320_v59 = vmax.f32 %v1425_v45, %v6003_v16  ;;  %v3512_v36 = vmin.f32 %v1425_v45, %v6003_v16 }
 0x1bc   :  { %9493 = vst [vmem:[#allocation156_spill] sm:$0xff] %v6003_v16  ;;  %v2049_v62 = vadd.f32 %v2048_v47, %v2047_v28  ;;  %v6016_v51 = vmax.f32 %v3319_v39, %v3383_v10  ;;  %v6018_v5 = vmin.f32 %v3511_v27, %v3575_v40 }
 0x1bd   :  { %v2822_v13 = vsel %vm1972_vm3, %v2529_v11, 0.0  ;;  %4612 = vmatmul.msk.bf16.gmra.mxu0 %vm929_vm2, %v4740_v9  ;;  %4644 = vmatmul.msk.bf16.gmra.mxu1 %vm929_vm2, %v4772_v17 }
 0x1be   :  { %9494 = vst [vmem:[#allocation157_spill] sm:$0xff] %v6016_v51  ;;  %v2823_v37 = vadd.f32 %v2822_v13, %v2821_v8  ;;  %4676 = vmatmul.msk.bf16.gmra.mxu2 %vm929_vm2, %v4804_v55  ;;  %4708 = vmatmul.msk.bf16.gmra.mxu3 %vm929_vm2, %v4836_v15 }
 0x1bf   :  { %9495 = vst [vmem:[#allocation158_spill] sm:$0xff] %v6018_v5 }
 0x1c1   :  { %v6027_v28 = vpop.f32.mrf.mxu2  ;;  %v6029_v39 = vpop.f32.mrf.mxu3 }
 0x1c2   :  { %9496 = vst [vmem:[#allocation159_spill] sm:$0xff] %v6027_v28  ;;  %v1427_v27 = vpop.f32.mrf.mxu0  ;;  %v6031_v10 = vpop.f32.mrf.mxu1  ;;  %v3384_v9 = vmax.f32 %v6027_v28, %v6029_v39  ;;  %v3576_v8 = vmin.f32 %v6027_v28, %v6029_v39 }
 0x1c3   :  { %9497 = vst [vmem:[#allocation160_spill] sm:$0xff] %v6029_v39  ;;  %v2050_v13 = vsel %vm1972_vm3, %v1427_v27, 0.0  ;;  %v2530_v17 = vmul.f32 %v1427_v27, %v1427_v27  ;;  %v3321_v40 = vmax.f32 %v1427_v27, %v6031_v10  ;;  %v3513_v47 = vmin.f32 %v1427_v27, %v6031_v10  ;;  %v4741_v39 = vld [vmem:[%s8913_s0 + $0xe0] sm:$0xff] }
 0x1c4   :  { %9498 = vst [vmem:[#allocation161_spill] sm:$0xff] %v6031_v10  ;;  %v6038_v45 = vmax.f32 %v3320_v59, %v3384_v9  ;;  %v6040_v55 = vmin.f32 %v3512_v36, %v3576_v8  ;;  %v2051_v11 = vadd.f32 %v2050_v13, %v2049_v62  ;;  %v4773_v36 = vld [vmem:[%s8913_s0 + $0x1e0] sm:$0xff] }
 0x1c5   :  { %v2824_v15 = vsel %vm1972_vm3, %v2530_v17, 0.0  ;;  %v4805_v62 = vld [vmem:[%s8913_s0 + $0x2e0] sm:$0xff] }
 0x1c6   :  { %9499 = vst [vmem:[#allocation162_spill] sm:$0xff] %v6038_v45  ;;  %v2825_v51 = vadd.f32 %v2824_v15, %v2823_v37  ;;  %v4837_v37 = vld [vmem:[%s8913_s0 + $0x3e0] sm:$0xff] }
 0x1c7   :  { %9500 = vst [vmem:[#allocation163_spill] sm:$0xff] %v6040_v55 }
 0x1c9   :  { %v6045_v5 = vpop.f32.mrf.mxu2  ;;  %v6047_v61 = vpop.f32.mrf.mxu3 }
 0x1ca   :  { %9501 = vst [vmem:[#allocation164_spill] sm:$0xff] %v6045_v5  ;;  %v1430_v59 = vpop.f32.mrf.mxu0  ;;  %v6055_v9 = vpop.f32.mrf.mxu1  ;;  %v3385_v27 = vmax.f32 %v6045_v5, %v6047_v61  ;;  %v3577_v8 = vmin.f32 %v6045_v5, %v6047_v61 }
 0x1cb   :  { %9502 = vst [vmem:[#allocation165_spill] sm:$0xff] %v6047_v61  ;;  %v2052_v13 = vsel %vm1972_vm3, %v1430_v59, 0.0  ;;  %v2531_v17 = vmul.f32 %v1430_v59, %v1430_v59  ;;  %v3322_v21 = vmax.f32 %v1430_v59, %v6055_v9  ;;  %v3514_v2 = vmin.f32 %v1430_v59, %v6055_v9 }
 0x1cc   :  { %9503 = vst [vmem:[#allocation166_spill] sm:$0xff] %v6055_v9  ;;  %v2053_v15 = vadd.f32 %v2052_v13, %v2051_v11  ;;  %v6068_v45 = vmax.f32 %v3321_v40, %v3385_v27  ;;  %v6070_v55 = vmin.f32 %v3513_v47, %v3577_v8 }
 0x1cd   :  { %v2826_v28 = vsel %vm1972_vm3, %v2531_v17, 0.0  ;;  %4613 = vmatmul.msk.bf16.gmra.mxu0 %vm929_vm2, %v4741_v39  ;;  %4645 = vmatmul.msk.bf16.gmra.mxu1 %vm929_vm2, %v4773_v36 }
 0x1ce   :  { %9504 = vst [vmem:[#allocation167_spill] sm:$0xff] %v6068_v45  ;;  %v2827_v50 = vadd.f32 %v2826_v28, %v2825_v51  ;;  %4677 = vmatmul.msk.bf16.gmra.mxu2 %vm929_vm2, %v4805_v62  ;;  %4709 = vmatmul.msk.bf16.gmra.mxu3 %vm929_vm2, %v4837_v37 }
 0x1cf   :  { %9505 = vst [vmem:[#allocation168_spill] sm:$0xff] %v6070_v55 }
 0x1d1   :  { %v6079_v11 = vpop.f32.mrf.mxu2  ;;  %v6081_v40 = vpop.f32.mrf.mxu3 }
 0x1d2   :  { %9506 = vst [vmem:[#allocation169_spill] sm:$0xff] %v6079_v11  ;;  %v1432_v47 = vpop.f32.mrf.mxu0  ;;  %v6083_v27 = vpop.f32.mrf.mxu1  ;;  %v3386_v39 = vmax.f32 %v6079_v11, %v6081_v40  ;;  %v3578_v51 = vmin.f32 %v6079_v11, %v6081_v40 }
 0x1d3   :  { %9507 = vst [vmem:[#allocation170_spill] sm:$0xff] %v6081_v40  ;;  %v2054_v28 = vsel %vm1972_vm3, %v1432_v47, 0.0  ;;  %v2532_v36 = vmul.f32 %v1432_v47, %v1432_v47  ;;  %v3323_v17 = vmax.f32 %v1432_v47, %v6083_v27  ;;  %v3515_v45 = vmin.f32 %v1432_v47, %v6083_v27  ;;  %v4742_v40 = vld [vmem:[%s8913_s0 + $0xe8] sm:$0xff] }
 0x1d4   :  { %9508 = vst [vmem:[#allocation171_spill] sm:$0xff] %v6083_v27  ;;  %v2055_v59 = vadd.f32 %v2054_v28, %v2053_v15  ;;  %v6090_v62 = vmax.f32 %v3322_v21, %v3386_v39  ;;  %v6092_v37 = vmin.f32 %v3514_v2, %v3578_v51  ;;  %v4774_v2 = vld [vmem:[%s8913_s0 + $0x1e8] sm:$0xff] }
 0x1d5   :  { %v2828_v8 = vsel %vm1972_vm3, %v2532_v36, 0.0  ;;  %v4838_v47 = vld [vmem:[%s8913_s0 + $0x3e8] sm:$0xff] }
 0x1d6   :  { %9509 = vst [vmem:[#allocation172_spill] sm:$0xff] %v6090_v62  ;;  %v2829_v13 = vadd.f32 %v2828_v8, %v2827_v50  ;;  %v4806_v50 = vld [vmem:[%s8913_s0 + $0x2e8] sm:$0xff] }
 0x1d7   :  { %9510 = vst [vmem:[#allocation173_spill] sm:$0xff] %v6092_v37 }
 0x1d9   :  { %v6097_v55 = vpop.f32.mrf.mxu2  ;;  %v6099_v61 = vpop.f32.mrf.mxu3 }
 0x1da   :  { %9511 = vst [vmem:[#allocation174_spill] sm:$0xff] %v6097_v55  ;;  %v1435_v21 = vpop.f32.mrf.mxu0  ;;  %v6107_v15 = vpop.f32.mrf.mxu1  ;;  %v3387_v39 = vmax.f32 %v6097_v55, %v6099_v61  ;;  %v3579_v51 = vmin.f32 %v6097_v55, %v6099_v61 }
 0x1db   :  { %9512 = vst [vmem:[#allocation175_spill] sm:$0xff] %v6099_v61  ;;  %v2056_v28 = vsel %vm1972_vm3, %v1435_v21, 0.0  ;;  %v2533_v36 = vmul.f32 %v1435_v21, %v1435_v21  ;;  %v3324_v49 = vmax.f32 %v1435_v21, %v6107_v15  ;;  %v3516_v27 = vmin.f32 %v1435_v21, %v6107_v15 }
 0x1dc   :  { %9513 = vst [vmem:[#allocation176_spill] sm:$0xff] %v6107_v15  ;;  %v2057_v8 = vadd.f32 %v2056_v28, %v2055_v59  ;;  %v6120_v62 = vmax.f32 %v3323_v17, %v3387_v39  ;;  %v6122_v37 = vmin.f32 %v3515_v45, %v3579_v51 }
 0x1dd   :  { %v2830_v11 = vsel %vm1972_vm3, %v2533_v36, 0.0  ;;  %4614 = vmatmul.msk.bf16.gmra.mxu0 %vm929_vm2, %v4742_v40  ;;  %4646 = vmatmul.msk.bf16.gmra.mxu1 %vm929_vm2, %v4774_v2 }
 0x1de   :  { %9514 = vst [vmem:[#allocation177_spill] sm:$0xff] %v6120_v62  ;;  %v2831_v5 = vadd.f32 %v2830_v11, %v2829_v13  ;;  %4678 = vmatmul.msk.bf16.gmra.mxu2 %vm929_vm2, %v4806_v50  ;;  %4710 = vmatmul.msk.bf16.gmra.mxu3 %vm929_vm2, %v4838_v47 }
 0x1df   :  { %9515 = vst [vmem:[#allocation178_spill] sm:$0xff] %v6122_v37 }
 0x1e1   :  { %v6131_v59 = vpop.f32.mrf.mxu2  ;;  %v6133_v17 = vpop.f32.mrf.mxu3 }
 0x1e2   :  { %9516 = vst [vmem:[#allocation179_spill] sm:$0xff] %v6131_v59  ;;  %v1437_v45 = vpop.f32.mrf.mxu0  ;;  %v6135_v39 = vpop.f32.mrf.mxu1  ;;  %v3388_v40 = vmax.f32 %v6131_v59, %v6133_v17  ;;  %v3580_v11 = vmin.f32 %v6131_v59, %v6133_v17 }
 0x1e3   :  { %9517 = vst [vmem:[#allocation180_spill] sm:$0xff] %v6133_v17  ;;  %v2058_v13 = vsel %vm1972_vm3, %v1437_v45, 0.0  ;;  %v2534_v2 = vmul.f32 %v1437_v45, %v1437_v45  ;;  %v3325_v36 = vmax.f32 %v1437_v45, %v6135_v39  ;;  %v3517_v62 = vmin.f32 %v1437_v45, %v6135_v39  ;;  %v4743_v17 = vld [vmem:[%s8913_s0 + $0xf0] sm:$0xff] }
 0x1e4   :  { %9518 = vst [vmem:[#allocation181_spill] sm:$0xff] %v6135_v39  ;;  %v2059_v21 = vadd.f32 %v2058_v13, %v2057_v8  ;;  %v6142_v50 = vmax.f32 %v3324_v49, %v3388_v40  ;;  %v6144_v47 = vmin.f32 %v3516_v27, %v3580_v11  ;;  %v4775_v49 = vld [vmem:[%s8913_s0 + $0x1f0] sm:$0xff] }
 0x1e5   :  { %v2832_v51 = vsel %vm1972_vm3, %v2534_v2, 0.0  ;;  %v4839_v45 = vld [vmem:[%s8913_s0 + $0x3f0] sm:$0xff] }
 0x1e6   :  { %9519 = vst [vmem:[#allocation182_spill] sm:$0xff] %v6142_v50  ;;  %v2833_v28 = vadd.f32 %v2832_v51, %v2831_v5  ;;  %v4807_v5 = vld [vmem:[%s8913_s0 + $0x2f0] sm:$0xff] }
 0x1e7   :  { %9520 = vst [vmem:[#allocation183_spill] sm:$0xff] %v6144_v47 }
 0x1e9   :  { %v6149_v37 = vpop.f32.mrf.mxu2  ;;  %v6151_v61 = vpop.f32.mrf.mxu3 }
 0x1ea   :  { %9521 = vst [vmem:[#allocation184_spill] sm:$0xff] %v6149_v37  ;;  %v1440_v27 = vpop.f32.mrf.mxu0  ;;  %v6159_v8 = vpop.f32.mrf.mxu1  ;;  %v3389_v40 = vmax.f32 %v6149_v37, %v6151_v61  ;;  %v3581_v11 = vmin.f32 %v6149_v37, %v6151_v61 }
 0x1eb   :  { %9522 = vst [vmem:[#allocation185_spill] sm:$0xff] %v6151_v61  ;;  %v2060_v13 = vsel %vm1972_vm3, %v1440_v27, 0.0  ;;  %v2535_v2 = vmul.f32 %v1440_v27, %v1440_v27  ;;  %v3326_v39 = vmax.f32 %v1440_v27, %v6159_v8  ;;  %v3518_v15 = vmin.f32 %v1440_v27, %v6159_v8 }
 0x1ec   :  { %9523 = vst [vmem:[#allocation186_spill] sm:$0xff] %v6159_v8  ;;  %v2061_v51 = vadd.f32 %v2060_v13, %v2059_v21  ;;  %v6172_v50 = vmax.f32 %v3325_v36, %v3389_v40  ;;  %v6174_v47 = vmin.f32 %v3517_v62, %v3581_v11 }
 0x1ed   :  { %v2834_v59 = vsel %vm1972_vm3, %v2535_v2, 0.0  ;;  %4615 = vmatmul.msk.bf16.gmra.mxu0 %vm929_vm2, %v4743_v17  ;;  %4647 = vmatmul.msk.bf16.gmra.mxu1 %vm929_vm2, %v4775_v49 }
 0x1ee   :  { %9524 = vst [vmem:[#allocation187_spill] sm:$0xff] %v6172_v50  ;;  %v2835_v55 = vadd.f32 %v2834_v59, %v2833_v28  ;;  %4679 = vmatmul.msk.bf16.gmra.mxu2 %vm929_vm2, %v4807_v5  ;;  %4711 = vmatmul.msk.bf16.gmra.mxu3 %vm929_vm2, %v4839_v45 }
 0x1ef   :  { %9525 = vst [vmem:[#allocation188_spill] sm:$0xff] %v6174_v47 }
 0x1f1   :  { %v6183_v21 = vpop.f32.mrf.mxu2  ;;  %v6185_v36 = vpop.f32.mrf.mxu3 }
 0x1f2   :  { %9526 = vst [vmem:[#allocation189_spill] sm:$0xff] %v6183_v21  ;;  %v1442_v62 = vpop.f32.mrf.mxu0  ;;  %v6187_v40 = vpop.f32.mrf.mxu1  ;;  %v3390_v17 = vmax.f32 %v6183_v21, %v6185_v36  ;;  %v3582_v59 = vmin.f32 %v6183_v21, %v6185_v36 }
 0x1f3   :  { %9527 = vst [vmem:[#allocation190_spill] sm:$0xff] %v6185_v36  ;;  %v2062_v28 = vsel %vm1972_vm3, %v1442_v62, 0.0  ;;  %v2536_v49 = vmul.f32 %v1442_v62, %v1442_v62  ;;  %v3327_v2 = vmax.f32 %v1442_v62, %v6187_v40  ;;  %v3519_v50 = vmin.f32 %v1442_v62, %v6187_v40  ;;  %v4744_v36 = vld [vmem:[%s8913_s0 + $0xf8] sm:$0xff] }
 0x1f4   :  { %9528 = vst [vmem:[#allocation191_spill] sm:$0xff] %v6187_v40  ;;  %v2063_v27 = vadd.f32 %v2062_v28, %v2061_v51  ;;  %v6194_v5 = vmax.f32 %v3326_v39, %v3390_v17  ;;  %v6196_v45 = vmin.f32 %v3518_v15, %v3582_v59  ;;  %v4776_v15 = vld [vmem:[%s8913_s0 + $0x1f8] sm:$0xff] }
 0x1f5   :  { %v2836_v11 = vsel %vm1972_vm3, %v2536_v49, 0.0  ;;  %v4840_v62 = vld [vmem:[%s8913_s0 + $0x3f8] sm:$0xff] }
 0x1f6   :  { %9529 = vst [vmem:[#allocation192_spill] sm:$0xff] %v6194_v5  ;;  %v2837_v13 = vadd.f32 %v2836_v11, %v2835_v55  ;;  %v4808_v55 = vld [vmem:[%s8913_s0 + $0x2f8] sm:$0xff] }
 0x1f7   :  { %9530 = vst [vmem:[#allocation193_spill] sm:$0xff] %v6196_v45 }
 0x1f9   :  { %v6201_v47 = vpop.f32.mrf.mxu2  ;;  %v6203_v61 = vpop.f32.mrf.mxu3 }
 0x1fa   :  { %9531 = vst [vmem:[#allocation194_spill] sm:$0xff] %v6201_v47  ;;  %v1445_v39 = vpop.f32.mrf.mxu0  ;;  %v6211_v51 = vpop.f32.mrf.mxu1  ;;  %v3391_v17 = vmax.f32 %v6201_v47, %v6203_v61  ;;  %v3583_v59 = vmin.f32 %v6201_v47, %v6203_v61 }
 0x1fb   :  { %9532 = vst [vmem:[#allocation195_spill] sm:$0xff] %v6203_v61  ;;  %v2064_v28 = vsel %vm1972_vm3, %v1445_v39, 0.0  ;;  %v2537_v49 = vmul.f32 %v1445_v39, %v1445_v39  ;;  %v3328_v40 = vmax.f32 %v1445_v39, %v6211_v51  ;;  %v3520_v8 = vmin.f32 %v1445_v39, %v6211_v51 }
 0x1fc   :  { %9533 = vst [vmem:[#allocation196_spill] sm:$0xff] %v6211_v51  ;;  %v2065_v11 = vadd.f32 %v2064_v28, %v2063_v27  ;;  %v6224_v5 = vmax.f32 %v3327_v2, %v3391_v17  ;;  %v6226_v45 = vmin.f32 %v3519_v50, %v3583_v59 }
 0x1fd   :  { %v2838_v21 = vsel %vm1972_vm3, %v2537_v49, 0.0  ;;  %4616 = vmatmul.msk.bf16.gmra.mxu0 %vm929_vm2, %v4744_v36  ;;  %4648 = vmatmul.msk.bf16.gmra.mxu1 %vm929_vm2, %v4776_v15 }
 0x1fe   :  { %9534 = vst [vmem:[#allocation197_spill] sm:$0xff] %v6224_v5  ;;  %v2839_v37 = vadd.f32 %v2838_v21, %v2837_v13  ;;  %4680 = vmatmul.msk.bf16.gmra.mxu2 %vm929_vm2, %v4808_v55  ;;  %4712 = vmatmul.msk.bf16.gmra.mxu3 %vm929_vm2, %v4840_v62 }
 0x1ff   :  { %9535 = vst [vmem:[#allocation198_spill] sm:$0xff] %v6226_v45 }
 0x201   :  { %v6235_v27 = vpop.f32.mrf.mxu2  ;;  %v6237_v2 = vpop.f32.mrf.mxu3 }
 0x202   :  { %9536 = vst [vmem:[#allocation199_spill] sm:$0xff] %v6235_v27  ;;  %v1447_v50 = vpop.f32.mrf.mxu0  ;;  %v6239_v17 = vpop.f32.mrf.mxu1  ;;  %v3392_v36 = vmax.f32 %v6235_v27, %v6237_v2  ;;  %v3584_v21 = vmin.f32 %v6235_v27, %v6237_v2 }
 0x203   :  { %9537 = vst [vmem:[#allocation200_spill] sm:$0xff] %v6237_v2  ;;  %v2066_v13 = vsel %vm1972_vm3, %v1447_v50, 0.0  ;;  %v2538_v15 = vmul.f32 %v1447_v50, %v1447_v50  ;;  %v3329_v49 = vmax.f32 %v1447_v50, %v6239_v17  ;;  %v3521_v5 = vmin.f32 %v1447_v50, %v6239_v17 }
 0x204   :  { %9538 = vst [vmem:[#allocation201_spill] sm:$0xff] %v6239_v17  ;;  %v2067_v39 = vadd.f32 %v2066_v13, %v2065_v11  ;;  %v6246_v55 = vmax.f32 %v3328_v40, %v3392_v36  ;;  %v6248_v62 = vmin.f32 %v3520_v8, %v3584_v21 }
 0x205   :  { %v2840_v59 = vsel %vm1972_vm3, %v2538_v15, 0.0 }
 0x206   :  { %9539 = vst [vmem:[#allocation202_spill] sm:$0xff] %v6246_v55  ;;  %v2841_v28 = vadd.f32 %v2840_v59, %v2839_v37 }
 0x207   :  { %9540 = vst [vmem:[#allocation203_spill] sm:$0xff] %v6248_v62 }
 0x209   :  { %v6253_v45 = vpop.f32.mrf.mxu2  ;;  %v6255_v61 = vpop.f32.mrf.mxu3 }
 0x20a   :  { %9541 = vst [vmem:[#allocation204_spill] sm:$0xff] %v6253_v45  ;;  %v1450_v2 = vpop.f32.mrf.mxu0  ;;  %v6257_v27 = vpop.f32.mrf.mxu1  ;;  %v3393_v40 = vmax.f32 %v6253_v45, %v6255_v61  ;;  %v3585_v8 = vmin.f32 %v6253_v45, %v6255_v61 }
 0x20b   :  { %9542 = vst [vmem:[#allocation205_spill] sm:$0xff] %v6255_v61  ;;  %v2068_v11 = vsel %vm1972_vm3, %v1450_v2, 0.0  ;;  %v2539_v37 = vmul.f32 %v1450_v2, %v1450_v2  ;;  %v3330_v59 = vmax.f32 %v1450_v2, %v6257_v27  ;;  %v3522_v55 = vmin.f32 %v1450_v2, %v6257_v27 }
 0x20c   :  { %9543 = vst [vmem:[#allocation206_spill] sm:$0xff] %v6257_v27  ;;  %v2069_v36 = vadd.f32 %v2068_v11, %v2067_v39  ;;  %v6264_v21 = vmax.f32 %v3329_v49, %v3393_v40  ;;  %v6266_v50 = vmin.f32 %v3521_v5, %v3585_v8 }
 0x20d   :  { %v2842_v13 = vsel %vm1972_vm3, %v2539_v37, 0.0 }
 0x20e   :  { %9544 = vst [vmem:[#allocation207_spill] sm:$0xff] %v6264_v21  ;;  %v2843_v15 = vadd.f32 %v2842_v13, %v2841_v28 }
 0x20f   :  { %9545 = vst [vmem:[#allocation208_spill] sm:$0xff] %v6266_v50 }
 0x211   :  { %v6271_v62 = vpop.f32.mrf.mxu2  ;;  %v6273_v47 = vpop.f32.mrf.mxu3 }
 0x212   :  { %9546 = vst [vmem:[#allocation209_spill] sm:$0xff] %v6271_v62  ;;  %v1452_v61 = vpop.f32.mrf.mxu0  ;;  %v6275_v45 = vpop.f32.mrf.mxu1  ;;  %v3394_v39 = vmax.f32 %v6271_v62, %v6273_v47  ;;  %v3586_v5 = vmin.f32 %v6271_v62, %v6273_v47 }
 0x213   :  { %9547 = vst [vmem:[#allocation210_spill] sm:$0xff] %v6273_v47  ;;  %v2070_v49 = vsel %vm1972_vm3, %v1452_v61, 0.0  ;;  %v2540_v28 = vmul.f32 %v1452_v61, %v1452_v61  ;;  %v3331_v13 = vmax.f32 %v1452_v61, %v6275_v45  ;;  %v3523_v21 = vmin.f32 %v1452_v61, %v6275_v45 }
 0x214   :  { %9548 = vst [vmem:[#allocation211_spill] sm:$0xff] %v6275_v45  ;;  %v2071_v40 = vadd.f32 %v2070_v49, %v2069_v36  ;;  %v6282_v8 = vmax.f32 %v3330_v59, %v3394_v39  ;;  %v6284_v2 = vmin.f32 %v3522_v55, %v3586_v5 }
 0x215   :  { %v2844_v11 = vsel %vm1972_vm3, %v2540_v28, 0.0 }
 0x216   :  { %9549 = vst [vmem:[#allocation212_spill] sm:$0xff] %v6282_v8  ;;  %v2845_v37 = vadd.f32 %v2844_v11, %v2843_v15 }
 0x217   :  { %9550 = vst [vmem:[#allocation213_spill] sm:$0xff] %v6284_v2 }
 0x219   :  { %v6289_v50 = vpop.f32.mrf.mxu2  ;;  %v6291_v27 = vpop.f32.mrf.mxu3 }
 0x21a   :  { %9551 = vst [vmem:[#allocation214_spill] sm:$0xff] %v6289_v50  ;;  %v1455_v47 = vpop.f32.mrf.mxu0  ;;  %v6293_v62 = vpop.f32.mrf.mxu1  ;;  %v3395_v36 = vmax.f32 %v6289_v50, %v6291_v27  ;;  %v3587_v55 = vmin.f32 %v6289_v50, %v6291_v27 }
 0x21b   :  { %9552 = vst [vmem:[#allocation215_spill] sm:$0xff] %v6291_v27  ;;  %v2072_v59 = vsel %vm1972_vm3, %v1455_v47, 0.0  ;;  %v2541_v15 = vmul.f32 %v1455_v47, %v1455_v47  ;;  %v3332_v11 = vmax.f32 %v1455_v47, %v6293_v62  ;;  %v3524_v8 = vmin.f32 %v1455_v47, %v6293_v62 }
 0x21c   :  { %9553 = vst [vmem:[#allocation216_spill] sm:$0xff] %v6293_v62  ;;  %v2073_v39 = vadd.f32 %v2072_v59, %v2071_v40  ;;  %v6300_v5 = vmax.f32 %v3331_v13, %v3395_v36  ;;  %v6302_v61 = vmin.f32 %v3523_v21, %v3587_v55 }
 0x21d   :  { %v2846_v49 = vsel %vm1972_vm3, %v2541_v15, 0.0 }
 0x21e   :  { %9554 = vst [vmem:[#allocation217_spill] sm:$0xff] %v6300_v5  ;;  %v2847_v28 = vadd.f32 %v2846_v49, %v2845_v37 }
 0x21f   :  { %9555 = vst [vmem:[#allocation218_spill] sm:$0xff] %v6302_v61 }
 0x221   :  { %v6307_v2 = vpop.f32.mrf.mxu2  ;;  %v6309_v45 = vpop.f32.mrf.mxu3 }
 0x222   :  { %9556 = vst [vmem:[#allocation219_spill] sm:$0xff] %v6307_v2  ;;  %v1457_v27 = vpop.f32.mrf.mxu0  ;;  %v6311_v50 = vpop.f32.mrf.mxu1  ;;  %v3396_v40 = vmax.f32 %v6307_v2, %v6309_v45  ;;  %v3588_v21 = vmin.f32 %v6307_v2, %v6309_v45 }
 0x223   :  { %9557 = vst [vmem:[#allocation220_spill] sm:$0xff] %v6309_v45  ;;  %v2074_v13 = vsel %vm1972_vm3, %v1457_v27, 0.0  ;;  %v2542_v37 = vmul.f32 %v1457_v27, %v1457_v27  ;;  %v3333_v49 = vmax.f32 %v1457_v27, %v6311_v50  ;;  %v3525_v5 = vmin.f32 %v1457_v27, %v6311_v50 }
 0x224   :  { %9558 = vst [vmem:[#allocation221_spill] sm:$0xff] %v6311_v50  ;;  %v2075_v36 = vadd.f32 %v2074_v13, %v2073_v39  ;;  %v6318_v55 = vmax.f32 %v3332_v11, %v3396_v40  ;;  %v6320_v47 = vmin.f32 %v3524_v8, %v3588_v21 }
 0x225   :  { %v2848_v59 = vsel %vm1972_vm3, %v2542_v37, 0.0 }
 0x226   :  { %9559 = vst [vmem:[#allocation222_spill] sm:$0xff] %v6318_v55  ;;  %v2849_v15 = vadd.f32 %v2848_v59, %v2847_v28 }
 0x227   :  { %9560 = vst [vmem:[#allocation223_spill] sm:$0xff] %v6320_v47 }
 0x229   :  { %v6325_v61 = vpop.f32.mrf.mxu2  ;;  %v6327_v62 = vpop.f32.mrf.mxu3 }
 0x22a   :  { %9561 = vst [vmem:[#allocation224_spill] sm:$0xff] %v6325_v61  ;;  %v1460_v45 = vpop.f32.mrf.mxu0  ;;  %v6329_v2 = vpop.f32.mrf.mxu1  ;;  %v3397_v39 = vmax.f32 %v6325_v61, %v6327_v62  ;;  %v3589_v8 = vmin.f32 %v6325_v61, %v6327_v62 }
 0x22b   :  { %9562 = vst [vmem:[#allocation225_spill] sm:$0xff] %v6327_v62  ;;  %v2076_v11 = vsel %vm1972_vm3, %v1460_v45, 0.0  ;;  %v2543_v28 = vmul.f32 %v1460_v45, %v1460_v45  ;;  %v3334_v59 = vmax.f32 %v1460_v45, %v6329_v2  ;;  %v3526_v55 = vmin.f32 %v1460_v45, %v6329_v2 }
 0x22c   :  { %9563 = vst [vmem:[#allocation226_spill] sm:$0xff] %v6329_v2  ;;  %v6336_v40 = vadd.f32 %v2076_v11, %v2075_v36  ;;  %v6338_v21 = vmax.f32 %v3333_v49, %v3397_v39  ;;  %v6340_v27 = vmin.f32 %v3525_v5, %v3589_v8 }
 0x22d   :  { %v2850_v13 = vsel %vm1972_vm3, %v2543_v28, 0.0 }
 0x22e   :  { %9564 = vst [vmem:[#allocation227_spill] sm:$0xff] %v6338_v21  ;;  %v6343_v37 = vadd.f32 %v2850_v13, %v2849_v15 }
 0x22f   :  { %9565 = vst [vmem:[#allocation228_spill] sm:$0xff] %v6340_v27 }
 0x231   :  { %v6347_v47 = vpop.f32.mrf.mxu2  ;;  %v6349_v62 = vpop.f32.mrf.mxu3 }
 0x232   :  { %9566 = vst [vmem:[#allocation229_spill] sm:$0xff] %v6347_v47  ;;  %v6351_v61 = vpop.f32.mrf.mxu0  ;;  %v6353_v36 = vpop.f32.mrf.mxu1  ;;  %v3398_v5 = vmax.f32 %v6347_v47, %v6349_v62  ;;  %v3590_v49 = vmin.f32 %v6347_v47, %v6349_v62 }
 0x233   :  { %9567 = vst [vmem:[#allocation230_spill] sm:$0xff] %v6349_v62  ;;  %v3335_v45 = vmax.f32 %v6351_v61, %v6353_v36  ;;  %v3527_v8 = vmin.f32 %v6351_v61, %v6353_v36 }
 0x234   :  { %9568 = vst [vmem:[#allocation231_spill] sm:$0xff] %v6353_v36  ;;  %v6359_v15 = vmax.f32 %v3334_v59, %v3398_v5  ;;  %v6361_v39 = vmin.f32 %v3526_v55, %v3590_v49 }
 0x236   :  { %9569 = vst [vmem:[#allocation232_spill] sm:$0xff] %v6359_v15 }
 0x237   :  { %9570 = vst [vmem:[#allocation233_spill] sm:$0xff] %v6361_v39 }
 0x239   :  { %v6367_v11 = vpop.f32.mrf.mxu2  ;;  %v6369_v28 = vpop.f32.mrf.mxu3 }
 0x23a   :  { %9571 = vst [vmem:[#allocation234_spill] sm:$0xff] %v6367_v11  ;;  %v6371_v13 = vpop.f32.mrf.mxu0  ;;  %v6373_v21 = vpop.f32.mrf.mxu1  ;;  %v3399_v59 = vmax.f32 %v6367_v11, %v6369_v28  ;;  %v3591_v55 = vmin.f32 %v6367_v11, %v6369_v28 }
 0x23b   :  { %9572 = vst [vmem:[#allocation235_spill] sm:$0xff] %v6369_v28  ;;  %v3336_v15 = vmax.f32 %v6371_v13, %v6373_v21  ;;  %v3528_v39 = vmin.f32 %v6371_v13, %v6373_v21  ;;  %v2080_v23 = vsel %vm1972_vm3, %v6371_v13, 0.0 }
 0x23c   :  { %9573 = vst [vmem:[#allocation236_spill] sm:$0xff] %v6373_v21  ;;  %v6379_v5 = vmax.f32 %v3335_v45, %v3399_v59  ;;  %v6381_v49 = vmin.f32 %v3527_v8, %v3591_v55 }
 0x23e   :  { %9574 = vst [vmem:[#allocation237_spill] sm:$0xff] %v6379_v5 }
 0x23f   :  { %9575 = vst [vmem:[#allocation238_spill] sm:$0xff] %v6381_v49 }
 0x241   :  { %v6387_v27 = vpop.f32.mrf.mxu2  ;;  %v6389_v62 = vpop.f32.mrf.mxu3 }
 0x242   :  { %9576 = vst [vmem:[#allocation239_spill] sm:$0xff] %v6387_v27  ;;  %v6391_v47 = vpop.f32.mrf.mxu0  ;;  %v6393_v36 = vpop.f32.mrf.mxu1  ;;  %v3400_v45 = vmax.f32 %v6387_v27, %v6389_v62  ;;  %v3592_v8 = vmin.f32 %v6387_v27, %v6389_v62 }
 0x243   :  { %9577 = vst [vmem:[#allocation240_spill] sm:$0xff] %v6389_v62  ;;  %v3337_v5 = vmax.f32 %v6391_v47, %v6393_v36  ;;  %v3529_v49 = vmin.f32 %v6391_v47, %v6393_v36 }
 0x244   :  { %9578 = vst [vmem:[#allocation241_spill] sm:$0xff] %v6393_v36  ;;  %v6399_v59 = vmax.f32 %v3336_v15, %v3400_v45  ;;  %v6401_v55 = vmin.f32 %v3528_v39, %v3592_v8 }
 0x246   :  { %9579 = vst [vmem:[#allocation242_spill] sm:$0xff] %v6399_v59 }
 0x247   :  { %9580 = vst [vmem:[#allocation243_spill] sm:$0xff] %v6401_v55 }
 0x249   :  { %v6407_v28 = vpop.f32.mrf.mxu2  ;;  %v6409_v11 = vpop.f32.mrf.mxu3 }
 0x24a   :  { %9581 = vst [vmem:[#allocation244_spill] sm:$0xff] %v6407_v28  ;;  %v6411_v21 = vpop.f32.mrf.mxu0  ;;  %v6413_v2 = vpop.f32.mrf.mxu1  ;;  %v3401_v15 = vmax.f32 %v6407_v28, %v6409_v11  ;;  %v3593_v39 = vmin.f32 %v6407_v28, %v6409_v11 }
 0x24b   :  { %9582 = vst [vmem:[#allocation245_spill] sm:$0xff] %v6409_v11  ;;  %v3338_v59 = vmax.f32 %v6411_v21, %v6413_v2  ;;  %v3530_v55 = vmin.f32 %v6411_v21, %v6413_v2 }
 0x24c   :  { %9583 = vst [vmem:[#allocation246_spill] sm:$0xff] %v6413_v2  ;;  %v6419_v45 = vmax.f32 %v3337_v5, %v3401_v15  ;;  %v6421_v8 = vmin.f32 %v3529_v49, %v3593_v39 }
 0x24e   :  { %9584 = vst [vmem:[#allocation247_spill] sm:$0xff] %v6419_v45 }
 0x24f   :  { %9585 = vst [vmem:[#allocation248_spill] sm:$0xff] %v6421_v8 }
 0x251   :  { %v6427_v62 = vpop.f32.mrf.mxu2  ;;  %v6429_v27 = vpop.f32.mrf.mxu3 }
 0x252   :  { %9586 = vst [vmem:[#allocation249_spill] sm:$0xff] %v6427_v62  ;;  %v6431_v36 = vpop.f32.mrf.mxu0  ;;  %v6433_v50 = vpop.f32.mrf.mxu1  ;;  %v3402_v5 = vmax.f32 %v6427_v62, %v6429_v27  ;;  %v3594_v49 = vmin.f32 %v6427_v62, %v6429_v27 }
 0x253   :  { %9587 = vst [vmem:[#allocation250_spill] sm:$0xff] %v6429_v27  ;;  %v3339_v45 = vmax.f32 %v6431_v36, %v6433_v50  ;;  %v3531_v8 = vmin.f32 %v6431_v36, %v6433_v50 }
 0x254   :  { %9588 = vst [vmem:[#allocation251_spill] sm:$0xff] %v6433_v50  ;;  %v6439_v15 = vmax.f32 %v3338_v59, %v3402_v5  ;;  %v6441_v39 = vmin.f32 %v3530_v55, %v3594_v49 }
 0x256   :  { %9589 = vst [vmem:[#allocation252_spill] sm:$0xff] %v6439_v15 }
 0x257   :  { %9590 = vst [vmem:[#allocation253_spill] sm:$0xff] %v6441_v39 }
 0x259   :  { %v6447_v11 = vpop.f32.mrf.mxu2  ;;  %v6449_v28 = vpop.f32.mrf.mxu3 }
 0x25a   :  { %9591 = vst [vmem:[#allocation254_spill] sm:$0xff] %v6447_v11  ;;  %v1475_v2 = vpop.f32.mrf.mxu0  ;;  %v6451_v17 = vpop.f32.mrf.mxu1  ;;  %v3403_v27 = vmax.f32 %v6447_v11, %v6449_v28  ;;  %v3595_v59 = vmin.f32 %v6447_v11, %v6449_v28 }
 0x25b   :  { %9592 = vst [vmem:[#allocation255_spill] sm:$0xff] %v6449_v28  ;;  %v3340_v49 = vmax.f32 %v1475_v2, %v6451_v17  ;;  %v3532_v15 = vmin.f32 %v1475_v2, %v6451_v17 }
 0x25c   :  { %9593 = vst [vmem:[#allocation256_spill] sm:$0xff] %v6451_v17  ;;  %v6457_v55 = vmax.f32 %v3339_v45, %v3403_v27  ;;  %v6459_v5 = vmin.f32 %v3531_v8, %v3595_v59 }
 0x25e   :  { %9594 = vst [vmem:[#allocation257_spill] sm:$0xff] %v6457_v55 }
 0x25f   :  { %9595 = vst [vmem:[#allocation258_spill] sm:$0xff] %v6459_v5  ;;  %v2544_v5 = vmul.f32 %v6351_v61, %v6351_v61 }
 0x261   :  { %v6463_v39 = vpop.f32.mrf.mxu2  ;;  %v6465_v62 = vpop.f32.mrf.mxu3 }
 0x262   :  { %9596 = vst [vmem:[#allocation259_spill] sm:$0xff] %v6463_v39  ;;  %v1477_v50 = vpop.f32.mrf.mxu0  ;;  %v6467_v51 = vpop.f32.mrf.mxu1  ;;  %v3404_v9 = vmax.f32 %v6463_v39, %v6465_v62  ;;  %v3596_v27 = vmin.f32 %v6463_v39, %v6465_v62 }
 0x263   :  { %9597 = vst [vmem:[#allocation260_spill] sm:$0xff] %v6465_v62  ;;  %v3341_v59 = vmax.f32 %v1477_v50, %v6467_v51  ;;  %v3533_v55 = vmin.f32 %v1477_v50, %v6467_v51  ;;  %v2550_v26 = vmul.f32 %v1477_v50, %v1477_v50 }
 0x264   :  { %9598 = vst [vmem:[#allocation261_spill] sm:$0xff] %v6467_v51  ;;  %v6473_v45 = vmax.f32 %v3340_v49, %v3404_v9  ;;  %v6475_v8 = vmin.f32 %v3532_v15, %v3596_v27  ;;  %v2545_v9 = vmul.f32 %v6371_v13, %v6371_v13  ;;  %v2078_v27 = vsel %vm1972_vm3, %v6351_v61, 0.0 }
 0x265   :  { %v2079_v61 = vadd.f32 %v2078_v27, %v6336_v40  ;;  %v2084_v40 = vsel %vm1972_vm3, %v6411_v21, 0.0 }
 0x266   :  { %9599 = vst [vmem:[#allocation262_spill] sm:$0xff] %v6473_v45  ;;  %v2852_v45 = vsel %vm1972_vm3, %v2544_v5, 0.0 }
 0x267   :  { %9600 = vst [vmem:[#allocation263_spill] sm:$0xff] %v6475_v8  ;;  %v2546_v8 = vmul.f32 %v6391_v47, %v6391_v47  ;;  %v2853_v5 = vadd.f32 %v2852_v45, %v6343_v37  ;;  %v2548_v37 = vmul.f32 %v6431_v36, %v6431_v36 }
 0x269   :  { %v6481_v28 = vpop.f32.mrf.mxu2  ;;  %v6483_v11 = vpop.f32.mrf.mxu3 }
 0x26a   :  { %9601 = vst [vmem:[#allocation264_spill] sm:$0xff] %v6481_v28  ;;  %v1480_v17 = vpop.f32.mrf.mxu0  ;;  %v6485_v10 = vpop.f32.mrf.mxu1  ;;  %v3405_v15 = vmax.f32 %v6481_v28, %v6483_v11  ;;  %v3597_v49 = vmin.f32 %v6481_v28, %v6483_v11  ;;  %v2547_v28 = vmul.f32 %v6411_v21, %v6411_v21 }
 0x26b   :  { %9602 = vst [vmem:[#allocation265_spill] sm:$0xff] %v6483_v11  ;;  %v3342_v51 = vmax.f32 %v1480_v17, %v6485_v10  ;;  %v3534_v16 = vmin.f32 %v1480_v17, %v6485_v10  ;;  %v2854_v11 = vsel %vm1972_vm3, %v2545_v9, 0.0 }
 0x26c   :  { %9603 = vst [vmem:[#allocation266_spill] sm:$0xff] %v6485_v10  ;;  %v6498_v62 = vmax.f32 %v3341_v59, %v3405_v15  ;;  %v6500_v39 = vmin.f32 %v3533_v55, %v3597_v49  ;;  %v2082_v55 = vsel %vm1972_vm3, %v6391_v47, 0.0  ;;  %v2856_v59 = vsel %vm1972_vm3, %v2546_v8, 0.0 }
 0x26d   :  { %v2855_v13 = vadd.f32 %v2854_v11, %v2853_v5  ;;  %v2086_v11 = vsel %vm1972_vm3, %v6431_v36, 0.0 }
 0x26e   :  { %9604 = vst [vmem:[#allocation267_spill] sm:$0xff] %v6498_v62  ;;  %v2081_v62 = vadd.f32 %v2080_v23, %v2079_v61  ;;  %v2858_v23 = vsel %vm1972_vm3, %v2547_v28, 0.0  ;;  %v2549_v61 = vmul.f32 %v1475_v2, %v1475_v2 }
 0x26f   :  { %9605 = vst [vmem:[#allocation268_spill] sm:$0xff] %v6500_v39  ;;  %v2857_v27 = vadd.f32 %v2856_v59, %v2855_v13  ;;  %v2551_v59 = vmul.f32 %v1480_v17, %v1480_v17 }
 0x270   :  { %v2083_v8 = vadd.f32 %v2082_v55, %v2081_v62  ;;  %v2088_v62 = vsel %vm1972_vm3, %v1475_v2, 0.0  ;;  %v2862_v36 = vsel %vm1972_vm3, %v2549_v61, 0.0  ;;  %v2092_v2 = vsel %vm1972_vm3, %v1480_v17, 0.0 }
 0x271   :  { %v6514_v15 = vpop.f32.mrf.mxu2  ;;  %v6516_v49 = vpop.f32.mrf.mxu3  ;;  %v2859_v55 = vadd.f32 %v2858_v23, %v2857_v27 }
 0x272   :  { %9606 = vst [vmem:[#allocation269_spill] sm:$0xff] %v6514_v15  ;;  %v1482_v39 = vpop.f32.mrf.mxu0  ;;  %v6518_v9 = vpop.f32.mrf.mxu1  ;;  %v3406_v47 = vmax.f32 %v6514_v15, %v6516_v49  ;;  %v3598_v45 = vmin.f32 %v6514_v15, %v6516_v49  ;;  %v2085_v10 = vadd.f32 %v2084_v40, %v2083_v8 }
 0x273   :  { %9607 = vst [vmem:[#allocation270_spill] sm:$0xff] %v6516_v49  ;;  %v3343_v4 = vmax.f32 %v1482_v39, %v6518_v9  ;;  %v3535_v19 = vmin.f32 %v1482_v39, %v6518_v9  ;;  %v2860_v49 = vsel %vm1972_vm3, %v2548_v37, 0.0  ;;  %v2552_v37 = vmul.f32 %v1482_v39, %v1482_v39 }
 0x274   :  { %v6531_v5 = vmax.f32 %v3342_v51, %v3406_v47  ;;  %v6533_v21 = vmin.f32 %v3534_v16, %v3598_v45  ;;  %v2087_v28 = vadd.f32 %v2086_v11, %v2085_v10  ;;  %v2090_v51 = vsel %vm1972_vm3, %v1477_v50, 0.0 }
 0x275   :  { %v2861_v40 = vadd.f32 %v2860_v49, %v2859_v55  ;;  %v2864_v45 = vsel %vm1972_vm3, %v2550_v26, 0.0  ;;  %v2866_v11 = vsel %vm1972_vm3, %v2551_v59, 0.0  ;;  %v2094_v49 = vsel %vm1972_vm3, %v1482_v39, 0.0 }
 0x276   :  { %9608 = vst [vmem:[#allocation271_spill] sm:$0xff] %v6531_v5  ;;  %v2089_v47 = vadd.f32 %v2088_v62, %v2087_v28  ;;  %v2868_v15 = vsel %vm1972_vm3, %v2552_v37, 0.0 }
 0x277   :  { %9609 = vst [vmem:[#allocation272_spill] sm:$0xff] %v6533_v21  ;;  %v2863_v27 = vadd.f32 %v2862_v36, %v2861_v40 }
 0x278   :  { %v2091_v23 = vadd.f32 %v2090_v51, %v2089_v47 }
 0x279   :  { %v6541_v13 = vpop.f32.mrf.mxu2  ;;  %v6543_v16 = vpop.f32.mrf.mxu3  ;;  %v2865_v55 = vadd.f32 %v2864_v45, %v2863_v27  ;;  %v2100_v27 = vsel %vm1972_vm3, %v5023_v43, 0.0 }
 0x27a   :  { %v1485_v8 = vpop.f32.mrf.mxu0  ;;  %v6546_v5 = vpop.f32.mrf.mxu1  ;;  %v3407_v10 = vmax.f32 %v6541_v13, %v6543_v16  ;;  %v3599_v50 = vmin.f32 %v6541_v13, %v6543_v16  ;;  %v2093_v28 = vadd.f32 %v2092_v2, %v2091_v23 }
 0x27b   :  { %v2553_v62 = vmul.f32 %v1485_v8, %v1485_v8  ;;  %v3344_v17 = vmax.f32 %v1485_v8, %v6546_v5  ;;  %v3536_v21 = vmin.f32 %v1485_v8, %v6546_v5  ;;  %v2096_v36 = vsel %vm1972_vm3, %v1485_v8, 0.0 }
 0x27c   :  { %v6555_v61 = vmax.f32 %v3343_v4, %v3407_v10  ;;  %v6557_v26 = vmin.f32 %v3535_v19, %v3599_v50  ;;  %v2867_v51 = vadd.f32 %v2866_v11, %v2865_v55  ;;  %v2095_v40 = vadd.f32 %v2094_v49, %v2093_v28 }
 0x27d   :  { %v2870_v59 = vsel %vm1972_vm3, %v2553_v62, 0.0  ;;  %v2555_v19 = vmul.f32 %v5023_v43, %v5023_v43  ;;  %v2556_v11 = vmul.f32 %v5042_v53, %v5042_v53  ;;  %v2557_v43 = vmul.f32 %v5067_v7, %v5067_v7 }
 0x27e   :  { %v2869_v47 = vadd.f32 %v2868_v15, %v2867_v51  ;;  %v2097_v2 = vadd.f32 %v2096_v36, %v2095_v40  ;;  %v2102_v40 = vsel %vm1972_vm3, %v5042_v53, 0.0  ;;  %v2106_v53 = vsel %vm1972_vm3, %v5095_v24, 0.0 }
 0x27f   :  { %v2874_v51 = vsel %vm1972_vm3, %v2555_v19, 0.0  ;;  %v2878_v19 = vsel %vm1972_vm3, %v2557_v43, 0.0 }
 0x280   :  { %v2871_v15 = vadd.f32 %v2870_v59, %v2869_v47 }
 0x281   :  { %v6564_v39 = vpop.f32.mrf.mxu2  ;;  %v6566_v4 = vpop.f32.mrf.mxu3 }
 0x282   :  { %v6570_v45 = vpop.f32.mrf.mxu0  ;;  %v3408_v37 = vmax.f32 %v6564_v39, %v6566_v4  ;;  %v3600_v8 = vmin.f32 %v6564_v39, %v6566_v4 }
 0x283   :  { %v2098_v10 = vsel %vm1972_vm3, %v6570_v45, 0.0  ;;  %v2554_v50 = vmul.f32 %v6570_v45, %v6570_v45 }
 0x284   :  { %v2099_v23 = vadd.f32 %v2098_v10, %v2097_v2  ;;  %v6584_v49 = vmax.f32 %v3344_v17, %v3408_v37  ;;  %v6586_v62 = vmin.f32 %v3536_v21, %v3600_v8  ;;  %v2876_v2 = vsel %vm1972_vm3, %v2556_v11, 0.0 }
 0x285   :  { %v2872_v55 = vsel %vm1972_vm3, %v2554_v50, 0.0  ;;  %v2104_v21 = vsel %vm1972_vm3, %v5067_v7, 0.0  ;;  %v2558_v17 = vmul.f32 %v5095_v24, %v5095_v24  ;;  %v2559_v10 = vmul.f32 %v5119_v41, %v5119_v41 }
 0x286   :  { %v2101_v28 = vadd.f32 %v2100_v27, %v2099_v23  ;;  %v2873_v36 = vadd.f32 %v2872_v55, %v2871_v15  ;;  %v2108_v7 = vsel %vm1972_vm3, %v5119_v41, 0.0  ;;  %v2560_v15 = vmul.f32 %v5147_v0, %v5147_v0 }
 0x287   :  { %v2880_v23 = vsel %vm1972_vm3, %v2558_v17, 0.0  ;;  %v2110_v24 = vsel %vm1972_vm3, %v5147_v0, 0.0  ;;  %v2112_v41 = vsel %vm1972_vm3, %v5171_v25, 0.0  ;;  %v2114_v0 = vsel %vm1972_vm3, %v5199_v48, 0.0 }
 0x288   :  { %v2103_v59 = vadd.f32 %v2102_v40, %v2101_v28  ;;  %v2875_v47 = vadd.f32 %v2874_v51, %v2873_v36  ;;  %v2882_v28 = vsel %vm1972_vm3, %v2559_v10, 0.0  ;;  %v2561_v36 = vmul.f32 %v5171_v25, %v5171_v25 }
 0x289   :  { %v2884_v43 = vsel %vm1972_vm3, %v2560_v15, 0.0  ;;  %v2563_v17 = vmul.f32 %v5223_v20, %v5223_v20  ;;  %v2116_v25 = vsel %vm1972_vm3, %v5223_v20, 0.0  ;;  %v2120_v20 = vsel %vm1972_vm3, %v5275_v44, 0.0 }
 0x28a   :  { %v2105_v37 = vadd.f32 %v2104_v21, %v2103_v59  ;;  %v2877_v8 = vadd.f32 %v2876_v2, %v2875_v47  ;;  %v2562_v59 = vmul.f32 %v5199_v48, %v5199_v48  ;;  %v2886_v21 = vsel %vm1972_vm3, %v2561_v36, 0.0 }
 0x28b   :  { %v2118_v48 = vsel %vm1972_vm3, %v5251_v57, 0.0 }
 0x28c   :  { %v2107_v50 = vadd.f32 %v2106_v53, %v2105_v37  ;;  %v2879_v27 = vadd.f32 %v2878_v19, %v2877_v8  ;;  %v2888_v19 = vsel %vm1972_vm3, %v2562_v59, 0.0  ;;  %v2564_v53 = vmul.f32 %v5251_v57, %v5251_v57 }
 0x28d   :  { %v2122_v57 = vsel %vm1972_vm3, %v5303_v56, 0.0  ;;  %v2568_v59 = vmul.f32 %v5355_v32, %v5355_v32 }
 0x28e   :  { %v2109_v11 = vadd.f32 %v2108_v7, %v2107_v50  ;;  %v2881_v55 = vadd.f32 %v2880_v23, %v2879_v27  ;;  %v2890_v27 = vsel %vm1972_vm3, %v2563_v17, 0.0  ;;  %v2565_v23 = vmul.f32 %v5275_v44, %v5275_v44 }
 0x28f   :  { %v2124_v44 = vsel %vm1972_vm3, %v5327_v6, 0.0 }
 0x290   :  { %v2111_v51 = vadd.f32 %v2110_v24, %v2109_v11  ;;  %v2883_v40 = vadd.f32 %v2882_v28, %v2881_v55  ;;  %v2892_v11 = vsel %vm1972_vm3, %v2564_v53, 0.0  ;;  %v2566_v55 = vmul.f32 %v5303_v56, %v5303_v56 }
 0x291   :  { %v2894_v36 = vsel %vm1972_vm3, %v2565_v23, 0.0  ;;  %v2126_v56 = vsel %vm1972_vm3, %v5355_v32, 0.0  ;;  %v2130_v32 = vsel %vm1972_vm3, %v5407_v35, 0.0 }
 0x292   :  { %v2113_v47 = vadd.f32 %v2112_v41, %v2111_v51  ;;  %v2885_v2 = vadd.f32 %v2884_v43, %v2883_v40  ;;  %v2567_v51 = vmul.f32 %v5327_v6, %v5327_v6  ;;  %v2896_v41 = vsel %vm1972_vm3, %v2566_v55, 0.0 }
 0x293   :  { %v2128_v6 = vsel %vm1972_vm3, %v5379_v58, 0.0  ;;  %v2573_v55 = vmul.f32 %v5483_v38, %v5483_v38 }
 0x294   :  { %v2115_v37 = vadd.f32 %v2114_v0, %v2113_v47  ;;  %v2887_v8 = vadd.f32 %v2886_v21, %v2885_v2  ;;  %v2898_v21 = vsel %vm1972_vm3, %v2567_v51, 0.0  ;;  %v2569_v0 = vmul.f32 %v5379_v58, %v5379_v58 }
 0x295   :  { %v2132_v58 = vsel %vm1972_vm3, %v5431_v14, 0.0 }
 0x296   :  { %v2117_v10 = vadd.f32 %v2116_v25, %v2115_v37  ;;  %v2889_v50 = vadd.f32 %v2888_v19, %v2887_v8  ;;  %v2900_v8 = vsel %vm1972_vm3, %v2568_v59, 0.0  ;;  %v2570_v19 = vmul.f32 %v5407_v35, %v5407_v35 }
 0x297   :  { %v2134_v35 = vsel %vm1972_vm3, %v5459_v30, 0.0 }
 0x298   :  { %v2119_v7 = vadd.f32 %v2118_v48, %v2117_v10  ;;  %v2891_v15 = vadd.f32 %v2890_v27, %v2889_v50  ;;  %v2902_v10 = vsel %vm1972_vm3, %v2569_v0, 0.0  ;;  %v2571_v50 = vmul.f32 %v5431_v14, %v5431_v14 }
 0x299   :  { %v2904_v23 = vsel %vm1972_vm3, %v2570_v19, 0.0  ;;  %v2136_v14 = vsel %vm1972_vm3, %v5483_v38, 0.0  ;;  %v2140_v38 = vsel %vm1972_vm3, %v5535_v31, 0.0  ;;  %v2578_v19 = vmul.f32 %v5615_v52, %v5615_v52 }
 0x29a   :  { %v2121_v28 = vadd.f32 %v2120_v20, %v2119_v7  ;;  %v2893_v24 = vadd.f32 %v2892_v11, %v2891_v15  ;;  %v2572_v7 = vmul.f32 %v5459_v30, %v5459_v30  ;;  %v2906_v20 = vsel %vm1972_vm3, %v2571_v50, 0.0 }
 0x29b   :  { %v2138_v30 = vsel %vm1972_vm3, %v5511_v33, 0.0 }
 0x29c   :  { %v2123_v40 = vadd.f32 %v2122_v57, %v2121_v28  ;;  %v2895_v43 = vadd.f32 %v2894_v36, %v2893_v24  ;;  %v2908_v36 = vsel %vm1972_vm3, %v2572_v7, 0.0  ;;  %v2574_v57 = vmul.f32 %v5511_v33, %v5511_v33 }
 0x29d   :  { %v2142_v33 = vsel %vm1972_vm3, %v5563_v63, 0.0 }
 0x29e   :  { %v2125_v47 = vadd.f32 %v2124_v44, %v2123_v40  ;;  %v2897_v2 = vadd.f32 %v2896_v41, %v2895_v43  ;;  %v2910_v43 = vsel %vm1972_vm3, %v2573_v55, 0.0  ;;  %v2575_v41 = vmul.f32 %v5535_v31, %v5535_v31 }
 0x29f   :  { %v2144_v31 = vsel %vm1972_vm3, %v5587_v54, 0.0 }
 0x2a0   :  { %v2127_v17 = vadd.f32 %v2126_v56, %v2125_v47  ;;  %v2899_v37 = vadd.f32 %v2898_v21, %v2897_v2  ;;  %v2912_v47 = vsel %vm1972_vm3, %v2574_v57, 0.0  ;;  %v2576_v2 = vmul.f32 %v5563_v63, %v5563_v63 }
 0x2a1   :  { %v2914_v0 = vsel %vm1972_vm3, %v2575_v41, 0.0  ;;  %v2146_v63 = vsel %vm1972_vm3, %v5615_v52, 0.0  ;;  %v2150_v52 = vsel %vm1972_vm3, %v5667_v60, 0.0  ;;  %v2583_v57 = vmul.f32 %v5743_v3, %v5743_v3 }
 0x2a2   :  { %v2129_v25 = vadd.f32 %v2128_v6, %v2127_v17  ;;  %v2901_v53 = vadd.f32 %v2900_v8, %v2899_v37  ;;  %v2577_v17 = vmul.f32 %v5587_v54, %v5587_v54  ;;  %v2916_v6 = vsel %vm1972_vm3, %v2576_v2, 0.0 }
 0x2a3   :  { %v2148_v54 = vsel %vm1972_vm3, %v5639_v29, 0.0 }
 0x2a4   :  { %v2131_v27 = vadd.f32 %v2130_v32, %v2129_v25  ;;  %v2903_v48 = vadd.f32 %v2902_v10, %v2901_v53  ;;  %v2918_v10 = vsel %vm1972_vm3, %v2577_v17, 0.0  ;;  %v2579_v32 = vmul.f32 %v5639_v29, %v5639_v29 }
 0x2a5   :  { %v2152_v29 = vsel %vm1972_vm3, %v5691_v18, 0.0 }
 0x2a6   :  { %v2133_v15 = vadd.f32 %v2132_v58, %v2131_v27  ;;  %v2905_v11 = vadd.f32 %v2904_v23, %v2903_v48  ;;  %v2920_v48 = vsel %vm1972_vm3, %v2578_v19, 0.0  ;;  %v2580_v23 = vmul.f32 %v5667_v60, %v5667_v60 }
 0x2a7   :  { %v2154_v60 = vsel %vm1972_vm3, %v5719_v1, 0.0  ;;  %v2588_v19 = vmul.f32 %v5875_v34, %v5875_v34 }
 0x2a8   :  { %v2135_v28 = vadd.f32 %v2134_v35, %v2133_v15  ;;  %v2907_v24 = vadd.f32 %v2906_v20, %v2905_v11  ;;  %v2922_v15 = vsel %vm1972_vm3, %v2579_v32, 0.0  ;;  %v2581_v11 = vmul.f32 %v5691_v18, %v5691_v18 }
 0x2a9   :  { %v2924_v55 = vsel %vm1972_vm3, %v2580_v23, 0.0  ;;  %v2156_v18 = vsel %vm1972_vm3, %v5743_v3, 0.0  ;;  %v2160_v3 = vsel %vm1972_vm3, %v5795_v12, 0.0 }
 0x2aa   :  { %v2137_v51 = vadd.f32 %v2136_v14, %v2135_v28  ;;  %v2909_v40 = vadd.f32 %v2908_v36, %v2907_v24  ;;  %v2582_v28 = vmul.f32 %v5719_v1, %v5719_v1  ;;  %v2926_v14 = vsel %vm1972_vm3, %v2581_v11, 0.0 }
 0x2ab   :  { %v2158_v1 = vsel %vm1972_vm3, %v5771_v46, 0.0 }
 0x2ac   :  { %v2139_v44 = vadd.f32 %v2138_v30, %v2137_v51  ;;  %v2911_v59 = vadd.f32 %v2910_v43, %v2909_v40  ;;  %v2928_v43 = vsel %vm1972_vm3, %v2582_v28, 0.0  ;;  %v2584_v30 = vmul.f32 %v5771_v46, %v5771_v46  ;;  %v9613_v28 = vld [vmem:[#allocation151_spill] sm:$0xff] }
 0x2ad   :  { %v2162_v46 = vsel %vm1972_vm3, %v5823_v22, 0.0 }
 0x2ae   :  { %v2141_v21 = vadd.f32 %v2140_v38, %v2139_v44  ;;  %v2913_v56 = vadd.f32 %v2912_v47, %v2911_v59  ;;  %v2930_v59 = vsel %vm1972_vm3, %v2583_v57, 0.0  ;;  %v2585_v47 = vmul.f32 %v5795_v12, %v5795_v12 }
 0x2af   :  { %v2164_v12 = vsel %vm1972_vm3, %v5847_v42, 0.0  ;;  %v2174_v57 = vsel %vm1972_vm3, %v9613_v28, 0.0 }
 0x2b0   :  { %v2143_v37 = vadd.f32 %v2142_v33, %v2141_v21  ;;  %v2915_v8 = vadd.f32 %v2914_v0, %v2913_v56  ;;  %v2932_v21 = vsel %vm1972_vm3, %v2584_v30, 0.0  ;;  %v2586_v56 = vmul.f32 %v5823_v22, %v5823_v22 }
 0x2b1   :  { %v2934_v17 = vsel %vm1972_vm3, %v2585_v47, 0.0  ;;  %v2166_v22 = vsel %vm1972_vm3, %v5875_v34, 0.0 }
 0x2b2   :  { %v2145_v25 = vadd.f32 %v2144_v31, %v2143_v37  ;;  %v2917_v53 = vadd.f32 %v2916_v6, %v2915_v8  ;;  %v2587_v37 = vmul.f32 %v5847_v42, %v5847_v42  ;;  %v2936_v31 = vsel %vm1972_vm3, %v2586_v56, 0.0 }
 0x2b4   :  { %v2147_v50 = vadd.f32 %v2146_v63, %v2145_v25  ;;  %v2919_v27 = vadd.f32 %v2918_v10, %v2917_v53  ;;  %v2938_v10 = vsel %vm1972_vm3, %v2587_v37, 0.0  ;;  %v9610_v63 = vld [vmem:[#allocation136_spill] sm:$0xff] }
 0x2b5   :  { %v2589_v32 = vmul.f32 %v9610_v63, %v9610_v63  ;;  %v2168_v42 = vsel %vm1972_vm3, %v9610_v63, 0.0 }
 0x2b6   :  { %v2149_v58 = vadd.f32 %v2148_v54, %v2147_v50  ;;  %v2921_v7 = vadd.f32 %v2920_v48, %v2919_v27  ;;  %v2940_v48 = vsel %vm1972_vm3, %v2588_v19, 0.0  ;;  %v9611_v54 = vld [vmem:[#allocation141_spill] sm:$0xff]  ;;  %v9618_v19 = vld [vmem:[#allocation176_spill] sm:$0xff] }
 0x2b7   :  { %v2590_v23 = vmul.f32 %v9611_v54, %v9611_v54  ;;  %v2170_v34 = vsel %vm1972_vm3, %v9611_v54, 0.0  ;;  %v2184_v63 = vsel %vm1972_vm3, %v9618_v19, 0.0 }
 0x2b8   :  { %v2151_v20 = vadd.f32 %v2150_v52, %v2149_v58  ;;  %v2923_v35 = vadd.f32 %v2922_v15, %v2921_v7  ;;  %v2942_v15 = vsel %vm1972_vm3, %v2589_v32, 0.0  ;;  %v9612_v52 = vld [vmem:[#allocation146_spill] sm:$0xff]  ;;  %v9619_v32 = vld [vmem:[#allocation181_spill] sm:$0xff] }
 0x2b9   :  { %v2591_v11 = vmul.f32 %v9612_v52, %v9612_v52  ;;  %v2186_v54 = vsel %vm1972_vm3, %v9619_v32, 0.0 }
 0x2ba   :  { %v2153_v24 = vadd.f32 %v2152_v29, %v2151_v20  ;;  %v2925_v36 = vadd.f32 %v2924_v55, %v2923_v35  ;;  %v2944_v55 = vsel %vm1972_vm3, %v2590_v23, 0.0  ;;  %v2172_v29 = vsel %vm1972_vm3, %v9612_v52, 0.0  ;;  %v9620_v23 = vld [vmem:[#allocation186_spill] sm:$0xff] }
 0x2bb   :  { %v2188_v52 = vsel %vm1972_vm3, %v9620_v23, 0.0 }
 0x2bc   :  { %v2155_v51 = vadd.f32 %v2154_v60, %v2153_v24  ;;  %v2927_v40 = vadd.f32 %v2926_v14, %v2925_v36  ;;  %v2592_v24 = vmul.f32 %v9613_v28, %v9613_v28  ;;  %v2946_v60 = vsel %vm1972_vm3, %v2591_v11, 0.0  ;;  %v9621_v11 = vld [vmem:[#allocation191_spill] sm:$0xff] }
 0x2bd   :  { %v2190_v28 = vsel %vm1972_vm3, %v9621_v11, 0.0 }
 0x2be   :  { %v2157_v41 = vadd.f32 %v2156_v18, %v2155_v51  ;;  %v2929_v44 = vadd.f32 %v2928_v43, %v2927_v40  ;;  %v9614_v51 = vld [vmem:[#allocation156_spill] sm:$0xff]  ;;  %v2948_v30 = vsel %vm1972_vm3, %v2592_v24, 0.0 }
 0x2bf   :  { %v2593_v40 = vmul.f32 %v9614_v51, %v9614_v51  ;;  %v9622_v24 = vld [vmem:[#allocation196_spill] sm:$0xff] }
 0x2c0   :  { %v2159_v38 = vadd.f32 %v2158_v1, %v2157_v41  ;;  %v2931_v2 = vadd.f32 %v2930_v59, %v2929_v44  ;;  %v2176_v41 = vsel %vm1972_vm3, %v9614_v51, 0.0  ;;  %v9615_v44 = vld [vmem:[#allocation161_spill] sm:$0xff]  ;;  %v2192_v51 = vsel %vm1972_vm3, %v9622_v24, 0.0 }
 0x2c1   :  { %v2594_v59 = vmul.f32 %v9615_v44, %v9615_v44 }
 0x2c2   :  { %v2161_v0 = vadd.f32 %v2160_v3, %v2159_v38  ;;  %v2933_v33 = vadd.f32 %v2932_v21, %v2931_v2  ;;  %v2950_v38 = vsel %vm1972_vm3, %v2593_v40, 0.0  ;;  %v2178_v2 = vsel %vm1972_vm3, %v9615_v44, 0.0  ;;  %v9616_v21 = vld [vmem:[#allocation166_spill] sm:$0xff]  ;;  %v9623_v40 = vld [vmem:[#allocation201_spill] sm:$0xff] }
 0x2c3   :  { %v2595_v3 = vmul.f32 %v9616_v21, %v9616_v21  ;;  %v2194_v44 = vsel %vm1972_vm3, %v9623_v40, 0.0 }
 0x2c4   :  { %v2935_v8 = vadd.f32 %v2934_v17, %v2933_v33  ;;  %v2163_v6 = vadd.f32 %v2162_v46, %v2161_v0  ;;  %v2952_v33 = vsel %vm1972_vm3, %v2594_v59, 0.0  ;;  %v2180_v17 = vsel %vm1972_vm3, %v9616_v21, 0.0  ;;  %v9617_v46 = vld [vmem:[#allocation171_spill] sm:$0xff]  ;;  %v9624_v59 = vld [vmem:[#allocation206_spill] sm:$0xff] }
 0x2c5   :  { %v2596_v37 = vmul.f32 %v9617_v46, %v9617_v46  ;;  %v2196_v21 = vsel %vm1972_vm3, %v9624_v59, 0.0 }
 0x2c6   :  { %v2165_v25 = vadd.f32 %v2164_v12, %v2163_v6  ;;  %v2937_v53 = vadd.f32 %v2936_v31, %v2935_v8  ;;  %v2954_v31 = vsel %vm1972_vm3, %v2595_v3, 0.0  ;;  %v2182_v12 = vsel %vm1972_vm3, %v9617_v46, 0.0  ;;  %v9625_v3 = vld [vmem:[#allocation211_spill] sm:$0xff] }
 0x2c7   :  { %v2198_v46 = vsel %vm1972_vm3, %v9625_v3, 0.0 }
 0x2c8   :  { %v2167_v50 = vadd.f32 %v2166_v22, %v2165_v25  ;;  %v2939_v27 = vadd.f32 %v2938_v10, %v2937_v53  ;;  %v2597_v25 = vmul.f32 %v9618_v19, %v9618_v19  ;;  %v2956_v22 = vsel %vm1972_vm3, %v2596_v37, 0.0  ;;  %v9626_v37 = vld [vmem:[#allocation216_spill] sm:$0xff] }
 0x2c9   :  { %v2200_v19 = vsel %vm1972_vm3, %v9626_v37, 0.0 }
 0x2ca   :  { %v2169_v58 = vadd.f32 %v2168_v42, %v2167_v50  ;;  %v2941_v7 = vadd.f32 %v2940_v48, %v2939_v27  ;;  %v2598_v50 = vmul.f32 %v9619_v32, %v9619_v32  ;;  %v2958_v42 = vsel %vm1972_vm3, %v2597_v25, 0.0  ;;  %v9627_v25 = vld [vmem:[#allocation221_spill] sm:$0xff] }
 0x2cb   :  { %v2202_v32 = vsel %vm1972_vm3, %v9627_v25, 0.0 }
 0x2cc   :  { %v2171_v20 = vadd.f32 %v2170_v34, %v2169_v58  ;;  %v2943_v35 = vadd.f32 %v2942_v15, %v2941_v7  ;;  %v2599_v58 = vmul.f32 %v9620_v23, %v9620_v23  ;;  %v2960_v34 = vsel %vm1972_vm3, %v2598_v50, 0.0  ;;  %v9628_v50 = vld [vmem:[#allocation226_spill] sm:$0xff] }
 0x2cd   :  { %v2204_v23 = vsel %vm1972_vm3, %v9628_v50, 0.0 }
 0x2ce   :  { %v2173_v36 = vadd.f32 %v2172_v29, %v2171_v20  ;;  %v2945_v14 = vadd.f32 %v2944_v55, %v2943_v35  ;;  %v2600_v20 = vmul.f32 %v9621_v11, %v9621_v11  ;;  %v2962_v29 = vsel %vm1972_vm3, %v2599_v58, 0.0  ;;  %v9629_v58 = vld [vmem:[#allocation231_spill] sm:$0xff] }
 0x2cf   :  { %v2206_v11 = vsel %vm1972_vm3, %v9629_v58, 0.0 }
 0x2d0   :  { %v2175_v43 = vadd.f32 %v2174_v57, %v2173_v36  ;;  %v2947_v18 = vadd.f32 %v2946_v60, %v2945_v14  ;;  %v2601_v36 = vmul.f32 %v9622_v24, %v9622_v24  ;;  %v2964_v57 = vsel %vm1972_vm3, %v2600_v20, 0.0  ;;  %v9630_v20 = vld [vmem:[#allocation236_spill] sm:$0xff] }
 0x2d1   :  { %v2208_v24 = vsel %vm1972_vm3, %v9630_v20, 0.0 }
 0x2d2   :  { %v2177_v1 = vadd.f32 %v2176_v41, %v2175_v43  ;;  %v2949_v47 = vadd.f32 %v2948_v30, %v2947_v18  ;;  %v2602_v43 = vmul.f32 %v9623_v40, %v9623_v40  ;;  %v2966_v41 = vsel %vm1972_vm3, %v2601_v36, 0.0  ;;  %v9631_v36 = vld [vmem:[#allocation241_spill] sm:$0xff] }
 0x2d3   :  { %v2210_v40 = vsel %vm1972_vm3, %v9631_v36, 0.0 }
 0x2d4   :  { %v2179_v56 = vadd.f32 %v2178_v2, %v2177_v1  ;;  %v2951_v0 = vadd.f32 %v2950_v38, %v2949_v47  ;;  %v2603_v1 = vmul.f32 %v9624_v59, %v9624_v59  ;;  %v2968_v2 = vsel %vm1972_vm3, %v2602_v43, 0.0  ;;  %v9632_v43 = vld [vmem:[#allocation246_spill] sm:$0xff] }
 0x2d5   :  { %v2212_v59 = vsel %vm1972_vm3, %v9632_v43, 0.0 }
 0x2d6   :  { %v2181_v8 = vadd.f32 %v2180_v17, %v2179_v56  ;;  %v2953_v6 = vadd.f32 %v2952_v33, %v2951_v0  ;;  %v2604_v56 = vmul.f32 %v9625_v3, %v9625_v3  ;;  %v2970_v17 = vsel %vm1972_vm3, %v2603_v1, 0.0  ;;  %v9633_v1 = vld [vmem:[#allocation251_spill] sm:$0xff] }
 0x2d7   :  { %v2214_v3 = vsel %vm1972_vm3, %v9633_v1, 0.0 }
 0x2d8   :  { %v2183_v53 = vadd.f32 %v2182_v12, %v2181_v8  ;;  %v2955_v10 = vadd.f32 %v2954_v31, %v2953_v6  ;;  %v2605_v8 = vmul.f32 %v9626_v37, %v9626_v37  ;;  %v2972_v12 = vsel %vm1972_vm3, %v2604_v56, 0.0  ;;  %v9634_v56 = vld [vmem:[#allocation256_spill] sm:$0xff] }
 0x2d9   :  { %v2216_v37 = vsel %vm1972_vm3, %v9634_v56, 0.0 }
 0x2da   :  { %v2185_v27 = vadd.f32 %v2184_v63, %v2183_v53  ;;  %v2957_v48 = vadd.f32 %v2956_v22, %v2955_v10  ;;  %v2606_v53 = vmul.f32 %v9627_v25, %v9627_v25  ;;  %v2974_v63 = vsel %vm1972_vm3, %v2605_v8, 0.0  ;;  %v9635_v8 = vld [vmem:[#allocation261_spill] sm:$0xff] }
 0x2db   :  { %v2218_v25 = vsel %vm1972_vm3, %v9635_v8, 0.0 }
 0x2dc   :  { %v2187_v7 = vadd.f32 %v2186_v54, %v2185_v27  ;;  %v2959_v15 = vadd.f32 %v2958_v42, %v2957_v48  ;;  %v2607_v27 = vmul.f32 %v9628_v50, %v9628_v50  ;;  %v2976_v54 = vsel %vm1972_vm3, %v2606_v53, 0.0  ;;  %v9636_v53 = vld [vmem:[#allocation266_spill] sm:$0xff] }
 0x2dd   :  { %v2220_v50 = vsel %vm1972_vm3, %v9636_v53, 0.0 }
 0x2de   :  { %v2189_v35 = vadd.f32 %v2188_v52, %v2187_v7  ;;  %v2961_v55 = vadd.f32 %v2960_v34, %v2959_v15  ;;  %v2608_v7 = vmul.f32 %v9629_v58, %v9629_v58  ;;  %v2978_v52 = vsel %vm1972_vm3, %v2607_v27, 0.0 }
 0x2df   :  { %v2616_v27 = vmul.f32 %v6518_v9, %v6518_v9  ;;  %v2617_v58 = vmul.f32 %v6546_v5, %v6546_v5 }
 0x2e0   :  { %v2191_v14 = vadd.f32 %v2190_v28, %v2189_v35  ;;  %v2963_v60 = vadd.f32 %v2962_v29, %v2961_v55  ;;  %v2609_v35 = vmul.f32 %v9630_v20, %v9630_v20  ;;  %v2980_v28 = vsel %vm1972_vm3, %v2608_v7, 0.0  ;;  %v6894_v7 = vpop.f32.mrf.mxu1 }
 0x2e1   :  { %v2618_v20 = vmul.f32 %v6894_v7, %v6894_v7 }
 0x2e2   :  { %v2193_v18 = vadd.f32 %v2192_v51, %v2191_v14  ;;  %v2965_v30 = vadd.f32 %v2964_v57, %v2963_v60  ;;  %v2610_v14 = vmul.f32 %v9631_v36, %v9631_v36  ;;  %v2982_v51 = vsel %vm1972_vm3, %v2609_v35, 0.0 }
 0x2e4   :  { %v2195_v47 = vadd.f32 %v2194_v44, %v2193_v18  ;;  %v2967_v38 = vadd.f32 %v2966_v41, %v2965_v30  ;;  %v2611_v18 = vmul.f32 %v9632_v43, %v9632_v43  ;;  %v2984_v44 = vsel %vm1972_vm3, %v2610_v14, 0.0 }
 0x2e6   :  { %v2197_v0 = vadd.f32 %v2196_v21, %v2195_v47  ;;  %v2969_v33 = vadd.f32 %v2968_v2, %v2967_v38  ;;  %v2612_v47 = vmul.f32 %v9633_v1, %v9633_v1  ;;  %v2986_v21 = vsel %vm1972_vm3, %v2611_v18, 0.0 }
 0x2e8   :  { %v2199_v6 = vadd.f32 %v2198_v46, %v2197_v0  ;;  %v2971_v31 = vadd.f32 %v2970_v17, %v2969_v33  ;;  %v2613_v0 = vmul.f32 %v9634_v56, %v9634_v56  ;;  %v2988_v46 = vsel %vm1972_vm3, %v2612_v47, 0.0 }
 0x2ea   :  { %v2201_v10 = vadd.f32 %v2200_v19, %v2199_v6  ;;  %v2973_v22 = vadd.f32 %v2972_v12, %v2971_v31  ;;  %v2614_v6 = vmul.f32 %v9635_v8, %v9635_v8  ;;  %v2990_v19 = vsel %vm1972_vm3, %v2613_v0, 0.0 }
 0x2ec   :  { %v2203_v48 = vadd.f32 %v2202_v32, %v2201_v10  ;;  %v2975_v42 = vadd.f32 %v2974_v63, %v2973_v22  ;;  %v2615_v10 = vmul.f32 %v9636_v53, %v9636_v53  ;;  %v2992_v32 = vsel %vm1972_vm3, %v2614_v6, 0.0 }
 0x2ee   :  { %v2205_v15 = vadd.f32 %v2204_v23, %v2203_v48  ;;  %v2977_v34 = vadd.f32 %v2976_v54, %v2975_v42  ;;  %v2994_v54 = vsel %vm1972_vm3, %v2615_v10, 0.0  ;;  %v2222_v23 = vsel %vm1972_vm3, %v6518_v9, 0.0 }
 0x2f0   :  { %v2207_v55 = vadd.f32 %v2206_v11, %v2205_v15  ;;  %v2979_v29 = vadd.f32 %v2978_v52, %v2977_v34  ;;  %v2996_v52 = vsel %vm1972_vm3, %v2616_v27, 0.0  ;;  %v2224_v11 = vsel %vm1972_vm3, %v6546_v5, 0.0 }
 0x2f2   :  { %v2209_v60 = vadd.f32 %v2208_v24, %v2207_v55  ;;  %v2981_v57 = vadd.f32 %v2980_v28, %v2979_v29  ;;  %v9637_v29 = vld [vmem:[#allocation2_spill] sm:$0xff]  ;;  %v2998_v28 = vsel %vm1972_vm3, %v2617_v58, 0.0  ;;  %v2226_v24 = vsel %vm1972_vm3, %v6894_v7, 0.0 }
 0x2f3   :  { %v2619_v9 = vmul.f32 %v9637_v29, %v9637_v29 }
 0x2f4   :  { %v2211_v30 = vadd.f32 %v2210_v40, %v2209_v60  ;;  %v2983_v41 = vadd.f32 %v2982_v51, %v2981_v57  ;;  %v2228_v60 = vsel %vm1972_vm3, %v9637_v29, 0.0  ;;  %v9638_v57 = vld [vmem:[#allocation6_spill] sm:$0xff]  ;;  %v3000_v51 = vsel %vm1972_vm3, %v2618_v20, 0.0 }
 0x2f5   :  { %v2620_v5 = vmul.f32 %v9638_v57, %v9638_v57  ;;  %v3002_v18 = vsel %vm1972_vm3, %v2619_v9, 0.0 }
 0x2f6   :  { %v2213_v38 = vadd.f32 %v2212_v59, %v2211_v30  ;;  %v2985_v2 = vadd.f32 %v2984_v44, %v2983_v41  ;;  %v2230_v30 = vsel %vm1972_vm3, %v9638_v57, 0.0  ;;  %v9639_v41 = vld [vmem:[#allocation10_spill] sm:$0xff] }
 0x2f7   :  { %v2621_v44 = vmul.f32 %v9639_v41, %v9639_v41  ;;  %v3004_v47 = vsel %vm1972_vm3, %v2620_v5, 0.0  ;;  %v9647_v5 = vld [vmem:[#allocation42_spill] sm:$0xff] }
 0x2f8   :  { %v2215_v33 = vadd.f32 %v2214_v3, %v2213_v38  ;;  %v2987_v17 = vadd.f32 %v2986_v21, %v2985_v2  ;;  %v2232_v38 = vsel %vm1972_vm3, %v9639_v41, 0.0  ;;  %v9640_v2 = vld [vmem:[#allocation14_spill] sm:$0xff] }
 0x2f9   :  { %v2622_v21 = vmul.f32 %v9640_v2, %v9640_v2  ;;  %v3006_v0 = vsel %vm1972_vm3, %v2621_v44, 0.0  ;;  %v9648_v41 = vld [vmem:[#allocation46_spill] sm:$0xff] }
 0x2fa   :  { %v2217_v31 = vadd.f32 %v2216_v37, %v2215_v33  ;;  %v2989_v12 = vadd.f32 %v2988_v46, %v2987_v17  ;;  %v2234_v33 = vsel %vm1972_vm3, %v9640_v2, 0.0  ;;  %v9641_v17 = vld [vmem:[#allocation18_spill] sm:$0xff]  ;;  %v2630_v44 = vmul.f32 %v9648_v41, %v9648_v41 }
 0x2fb   :  { %v2623_v46 = vmul.f32 %v9641_v17, %v9641_v17  ;;  %v3008_v6 = vsel %vm1972_vm3, %v2622_v21, 0.0  ;;  %v9649_v2 = vld [vmem:[#allocation50_spill] sm:$0xff] }
 0x2fc   :  { %v2219_v22 = vadd.f32 %v2218_v25, %v2217_v31  ;;  %v2991_v63 = vadd.f32 %v2990_v19, %v2989_v12  ;;  %v2236_v31 = vsel %vm1972_vm3, %v9641_v17, 0.0  ;;  %v9642_v12 = vld [vmem:[#allocation22_spill] sm:$0xff]  ;;  %v2631_v21 = vmul.f32 %v9649_v2, %v9649_v2 }
 0x2fd   :  { %v2624_v19 = vmul.f32 %v9642_v12, %v9642_v12  ;;  %v3010_v10 = vsel %vm1972_vm3, %v2623_v46, 0.0  ;;  %v9650_v17 = vld [vmem:[#allocation54_spill] sm:$0xff] }
 0x2fe   :  { %v2221_v48 = vadd.f32 %v2220_v50, %v2219_v22  ;;  %v2993_v42 = vadd.f32 %v2992_v32, %v2991_v63  ;;  %v2238_v22 = vsel %vm1972_vm3, %v9642_v12, 0.0  ;;  %v9643_v63 = vld [vmem:[#allocation26_spill] sm:$0xff]  ;;  %v2632_v46 = vmul.f32 %v9650_v17, %v9650_v17 }
 0x2ff   :  { %v2625_v32 = vmul.f32 %v9643_v63, %v9643_v63  ;;  %v9651_v12 = vld [vmem:[#allocation58_spill] sm:$0xff] }
 0x300   :  { %v2223_v15 = vadd.f32 %v2222_v23, %v2221_v48  ;;  %v2995_v34 = vadd.f32 %v2994_v54, %v2993_v42  ;;  %v3012_v48 = vsel %vm1972_vm3, %v2624_v19, 0.0  ;;  %v2240_v42 = vsel %vm1972_vm3, %v9643_v63, 0.0  ;;  %v9644_v54 = vld [vmem:[#allocation30_spill] sm:$0xff] }
 0x301   :  { %v2626_v23 = vmul.f32 %v9644_v54, %v9644_v54  ;;  %v2633_v19 = vmul.f32 %v9651_v12, %v9651_v12  ;;  %v9652_v63 = vld [vmem:[#allocation62_spill] sm:$0xff] }
 0x302   :  { %v2225_v35 = vadd.f32 %v2224_v11, %v2223_v15  ;;  %v2997_v55 = vadd.f32 %v2996_v52, %v2995_v34  ;;  %v3014_v34 = vsel %vm1972_vm3, %v2625_v32, 0.0  ;;  %v2242_v52 = vsel %vm1972_vm3, %v9644_v54, 0.0  ;;  %v9645_v11 = vld [vmem:[#allocation34_spill] sm:$0xff] }
 0x303   :  { %v2627_v20 = vmul.f32 %v9645_v11, %v9645_v11  ;;  %v3016_v29 = vsel %vm1972_vm3, %v2626_v23, 0.0  ;;  %v2244_v9 = vsel %vm1972_vm3, %v9645_v11, 0.0  ;;  %v2634_v32 = vmul.f32 %v9652_v63, %v9652_v63  ;;  %v9653_v54 = vld [vmem:[#allocation66_spill] sm:$0xff] }
 0x304   :  { %v2227_v36 = vadd.f32 %v2226_v24, %v2225_v35  ;;  %v2999_v14 = vadd.f32 %v2998_v28, %v2997_v55  ;;  %v9646_v28 = vld [vmem:[#allocation38_spill] sm:$0xff]  ;;  %v2635_v23 = vmul.f32 %v9653_v54, %v9653_v54 }
 0x305   :  { %v2628_v24 = vmul.f32 %v9646_v28, %v9646_v28  ;;  %v2246_v57 = vsel %vm1972_vm3, %v9646_v28, 0.0  ;;  %v9654_v11 = vld [vmem:[#allocation70_spill] sm:$0xff] }
 0x306   :  { %v2229_v40 = vadd.f32 %v2228_v60, %v2227_v36  ;;  %v3001_v43 = vadd.f32 %v3000_v51, %v2999_v14  ;;  %v3018_v60 = vsel %vm1972_vm3, %v2627_v20, 0.0  ;;  %v2629_v51 = vmul.f32 %v9647_v5, %v9647_v5  ;;  %v9655_v28 = vld [vmem:[#allocation74_spill] sm:$0xff] }
 0x307   :  { %v2636_v20 = vmul.f32 %v9654_v11, %v9654_v11 }
 0x308   :  { %v2231_v59 = vadd.f32 %v2230_v30, %v2229_v40  ;;  %v3003_v1 = vadd.f32 %v3002_v18, %v3001_v43  ;;  %v3020_v18 = vsel %vm1972_vm3, %v2628_v24, 0.0  ;;  %v2248_v30 = vsel %vm1972_vm3, %v9647_v5, 0.0  ;;  %v9656_v5 = vld [vmem:[#allocation78_spill] sm:$0xff] }
 0x309   :  { %v2637_v24 = vmul.f32 %v9655_v28, %v9655_v28 }
 0x30a   :  { %v2233_v3 = vadd.f32 %v2232_v38, %v2231_v59  ;;  %v3005_v56 = vadd.f32 %v3004_v47, %v3003_v1  ;;  %v3022_v47 = vsel %vm1972_vm3, %v2629_v51, 0.0  ;;  %v2250_v38 = vsel %vm1972_vm3, %v9648_v41, 0.0  ;;  %v9657_v41 = vld [vmem:[#allocation82_spill] sm:$0xff] }
 0x30b   :  { %v2638_v51 = vmul.f32 %v9656_v5, %v9656_v5 }
 0x30c   :  { %v2235_v37 = vadd.f32 %v2234_v33, %v2233_v3  ;;  %v3007_v8 = vadd.f32 %v3006_v0, %v3005_v56  ;;  %v3024_v0 = vsel %vm1972_vm3, %v2630_v44, 0.0  ;;  %v2252_v33 = vsel %vm1972_vm3, %v9649_v2, 0.0  ;;  %v9658_v2 = vld [vmem:[#allocation86_spill] sm:$0xff] }
 0x30d   :  { %v2639_v44 = vmul.f32 %v9657_v41, %v9657_v41 }
 0x30e   :  { %v2237_v25 = vadd.f32 %v2236_v31, %v2235_v37  ;;  %v3009_v53 = vadd.f32 %v3008_v6, %v3007_v8  ;;  %v3026_v6 = vsel %vm1972_vm3, %v2631_v21, 0.0  ;;  %v2254_v31 = vsel %vm1972_vm3, %v9650_v17, 0.0  ;;  %v9659_v17 = vld [vmem:[#allocation90_spill] sm:$0xff] }
 0x30f   :  { %v2640_v21 = vmul.f32 %v9658_v2, %v9658_v2 }
 0x310   :  { %v2239_v50 = vadd.f32 %v2238_v22, %v2237_v25  ;;  %v3011_v27 = vadd.f32 %v3010_v10, %v3009_v53  ;;  %v3028_v10 = vsel %vm1972_vm3, %v2632_v46, 0.0  ;;  %v2256_v22 = vsel %vm1972_vm3, %v9651_v12, 0.0  ;;  %v9660_v12 = vld [vmem:[#allocation94_spill] sm:$0xff] }
 0x311   :  { %v2641_v46 = vmul.f32 %v9659_v17, %v9659_v17 }
 0x312   :  { %v2241_v58 = vadd.f32 %v2240_v42, %v2239_v50  ;;  %v3013_v15 = vadd.f32 %v3012_v48, %v3011_v27  ;;  %v3030_v48 = vsel %vm1972_vm3, %v2633_v19, 0.0  ;;  %v2258_v42 = vsel %vm1972_vm3, %v9652_v63, 0.0  ;;  %v9661_v63 = vld [vmem:[#allocation98_spill] sm:$0xff] }
 0x313   :  { %v2642_v19 = vmul.f32 %v9660_v12, %v9660_v12 }
 0x314   :  { %v2243_v35 = vadd.f32 %v2242_v52, %v2241_v58  ;;  %v3015_v55 = vadd.f32 %v3014_v34, %v3013_v15  ;;  %v3032_v34 = vsel %vm1972_vm3, %v2634_v32, 0.0  ;;  %v2260_v52 = vsel %vm1972_vm3, %v9653_v54, 0.0  ;;  %v9662_v54 = vld [vmem:[#allocation102_spill] sm:$0xff] }
 0x315   :  { %v2643_v32 = vmul.f32 %v9661_v63, %v9661_v63 }
 0x316   :  { %v2245_v36 = vadd.f32 %v2244_v9, %v2243_v35  ;;  %v3017_v14 = vadd.f32 %v3016_v29, %v3015_v55  ;;  %v3034_v29 = vsel %vm1972_vm3, %v2635_v23, 0.0  ;;  %v2262_v9 = vsel %vm1972_vm3, %v9654_v11, 0.0  ;;  %v9663_v11 = vld [vmem:[#allocation106_spill] sm:$0xff] }
 0x317   :  { %v2644_v23 = vmul.f32 %v9662_v54, %v9662_v54 }
 0x318   :  { %v2247_v40 = vadd.f32 %v2246_v57, %v2245_v36  ;;  %v3019_v43 = vadd.f32 %v3018_v60, %v3017_v14  ;;  %v3036_v60 = vsel %vm1972_vm3, %v2636_v20, 0.0  ;;  %v2264_v57 = vsel %vm1972_vm3, %v9655_v28, 0.0  ;;  %v9664_v28 = vld [vmem:[#allocation110_spill] sm:$0xff] }
 0x319   :  { %v2645_v20 = vmul.f32 %v9663_v11, %v9663_v11 }
 0x31a   :  { %v2249_v59 = vadd.f32 %v2248_v30, %v2247_v40  ;;  %v3021_v1 = vadd.f32 %v3020_v18, %v3019_v43  ;;  %v3038_v18 = vsel %vm1972_vm3, %v2637_v24, 0.0  ;;  %v2266_v30 = vsel %vm1972_vm3, %v9656_v5, 0.0  ;;  %v9665_v5 = vld [vmem:[#allocation114_spill] sm:$0xff] }
 0x31b   :  { %v2646_v24 = vmul.f32 %v9664_v28, %v9664_v28 }
 0x31c   :  { %v2251_v3 = vadd.f32 %v2250_v38, %v2249_v59  ;;  %v3023_v56 = vadd.f32 %v3022_v47, %v3021_v1  ;;  %v3040_v47 = vsel %vm1972_vm3, %v2638_v51, 0.0  ;;  %v2268_v38 = vsel %vm1972_vm3, %v9657_v41, 0.0  ;;  %v9666_v41 = vld [vmem:[#allocation118_spill] sm:$0xff] }
 0x31d   :  { %v2647_v51 = vmul.f32 %v9665_v5, %v9665_v5 }
 0x31e   :  { %v2253_v37 = vadd.f32 %v2252_v33, %v2251_v3  ;;  %v3025_v8 = vadd.f32 %v3024_v0, %v3023_v56  ;;  %v3042_v0 = vsel %vm1972_vm3, %v2639_v44, 0.0  ;;  %v2270_v33 = vsel %vm1972_vm3, %v9658_v2, 0.0  ;;  %v9667_v2 = vld [vmem:[#allocation122_spill] sm:$0xff] }
 0x31f   :  { %v2648_v44 = vmul.f32 %v9666_v41, %v9666_v41 }
 0x320   :  { %v2255_v25 = vadd.f32 %v2254_v31, %v2253_v37  ;;  %v3027_v53 = vadd.f32 %v3026_v6, %v3025_v8  ;;  %v3044_v6 = vsel %vm1972_vm3, %v2640_v21, 0.0  ;;  %v2272_v31 = vsel %vm1972_vm3, %v9659_v17, 0.0  ;;  %v9668_v17 = vld [vmem:[#allocation126_spill] sm:$0xff] }
 0x321   :  { %v2649_v21 = vmul.f32 %v9667_v2, %v9667_v2 }
 0x322   :  { %v2257_v50 = vadd.f32 %v2256_v22, %v2255_v25  ;;  %v3029_v27 = vadd.f32 %v3028_v10, %v3027_v53  ;;  %v3046_v10 = vsel %vm1972_vm3, %v2641_v46, 0.0  ;;  %v2274_v22 = vsel %vm1972_vm3, %v9660_v12, 0.0  ;;  %v9669_v12 = vld [vmem:[#allocation130_spill] sm:$0xff] }
 0x323   :  { %v2650_v46 = vmul.f32 %v9668_v17, %v9668_v17 }
 0x324   :  { %v2259_v58 = vadd.f32 %v2258_v42, %v2257_v50  ;;  %v3031_v15 = vadd.f32 %v3030_v48, %v3029_v27  ;;  %v3048_v48 = vsel %vm1972_vm3, %v2642_v19, 0.0  ;;  %v2276_v42 = vsel %vm1972_vm3, %v9661_v63, 0.0  ;;  %v9670_v63 = vld [vmem:[#allocation134_spill] sm:$0xff] }
 0x325   :  { %v2651_v19 = vmul.f32 %v9669_v12, %v9669_v12 }
 0x326   :  { %v2261_v35 = vadd.f32 %v2260_v52, %v2259_v58  ;;  %v3033_v55 = vadd.f32 %v3032_v34, %v3031_v15  ;;  %v3050_v34 = vsel %vm1972_vm3, %v2643_v32, 0.0  ;;  %v2278_v52 = vsel %vm1972_vm3, %v9662_v54, 0.0  ;;  %v9671_v54 = vld [vmem:[#allocation139_spill] sm:$0xff] }
 0x327   :  { %v2652_v32 = vmul.f32 %v9670_v63, %v9670_v63 }
 0x328   :  { %v2263_v36 = vadd.f32 %v2262_v9, %v2261_v35  ;;  %v3035_v14 = vadd.f32 %v3034_v29, %v3033_v55  ;;  %v3052_v29 = vsel %vm1972_vm3, %v2644_v23, 0.0  ;;  %v2280_v9 = vsel %vm1972_vm3, %v9663_v11, 0.0  ;;  %v9672_v11 = vld [vmem:[#allocation144_spill] sm:$0xff] }
 0x329   :  { %v2653_v23 = vmul.f32 %v9671_v54, %v9671_v54 }
 0x32a   :  { %v2265_v40 = vadd.f32 %v2264_v57, %v2263_v36  ;;  %v3037_v43 = vadd.f32 %v3036_v60, %v3035_v14  ;;  %v3054_v60 = vsel %vm1972_vm3, %v2645_v20, 0.0  ;;  %v2282_v57 = vsel %vm1972_vm3, %v9664_v28, 0.0  ;;  %v9673_v28 = vld [vmem:[#allocation149_spill] sm:$0xff] }
 0x32b   :  { %v2654_v20 = vmul.f32 %v9672_v11, %v9672_v11 }
 0x32c   :  { %v2267_v59 = vadd.f32 %v2266_v30, %v2265_v40  ;;  %v3039_v1 = vadd.f32 %v3038_v18, %v3037_v43  ;;  %v3056_v18 = vsel %vm1972_vm3, %v2646_v24, 0.0  ;;  %v2284_v30 = vsel %vm1972_vm3, %v9665_v5, 0.0  ;;  %v9674_v5 = vld [vmem:[#allocation154_spill] sm:$0xff] }
 0x32d   :  { %v2655_v24 = vmul.f32 %v9673_v28, %v9673_v28 }
 0x32e   :  { %v2269_v3 = vadd.f32 %v2268_v38, %v2267_v59  ;;  %v3041_v56 = vadd.f32 %v3040_v47, %v3039_v1  ;;  %v3058_v47 = vsel %vm1972_vm3, %v2647_v51, 0.0  ;;  %v2286_v38 = vsel %vm1972_vm3, %v9666_v41, 0.0  ;;  %v9675_v41 = vld [vmem:[#allocation159_spill] sm:$0xff] }
 0x32f   :  { %v2656_v51 = vmul.f32 %v9674_v5, %v9674_v5 }
 0x330   :  { %v2271_v37 = vadd.f32 %v2270_v33, %v2269_v3  ;;  %v3043_v8 = vadd.f32 %v3042_v0, %v3041_v56  ;;  %v3060_v0 = vsel %vm1972_vm3, %v2648_v44, 0.0  ;;  %v2288_v33 = vsel %vm1972_vm3, %v9667_v2, 0.0  ;;  %v9676_v2 = vld [vmem:[#allocation164_spill] sm:$0xff] }
 0x331   :  { %v2657_v44 = vmul.f32 %v9675_v41, %v9675_v41 }
 0x332   :  { %v2273_v25 = vadd.f32 %v2272_v31, %v2271_v37  ;;  %v3045_v53 = vadd.f32 %v3044_v6, %v3043_v8  ;;  %v3062_v6 = vsel %vm1972_vm3, %v2649_v21, 0.0  ;;  %v2290_v31 = vsel %vm1972_vm3, %v9668_v17, 0.0  ;;  %v9677_v17 = vld [vmem:[#allocation169_spill] sm:$0xff] }
 0x333   :  { %v2658_v21 = vmul.f32 %v9676_v2, %v9676_v2 }
 0x334   :  { %v2275_v50 = vadd.f32 %v2274_v22, %v2273_v25  ;;  %v3047_v27 = vadd.f32 %v3046_v10, %v3045_v53  ;;  %v3064_v10 = vsel %vm1972_vm3, %v2650_v46, 0.0  ;;  %v2292_v22 = vsel %vm1972_vm3, %v9669_v12, 0.0  ;;  %v9678_v12 = vld [vmem:[#allocation174_spill] sm:$0xff] }
 0x335   :  { %v2659_v46 = vmul.f32 %v9677_v17, %v9677_v17 }
 0x336   :  { %v2277_v58 = vadd.f32 %v2276_v42, %v2275_v50  ;;  %v3049_v15 = vadd.f32 %v3048_v48, %v3047_v27  ;;  %v3066_v48 = vsel %vm1972_vm3, %v2651_v19, 0.0  ;;  %v2294_v42 = vsel %vm1972_vm3, %v9670_v63, 0.0  ;;  %v9679_v63 = vld [vmem:[#allocation179_spill] sm:$0xff] }
 0x337   :  { %v2660_v19 = vmul.f32 %v9678_v12, %v9678_v12 }
 0x338   :  { %v2279_v35 = vadd.f32 %v2278_v52, %v2277_v58  ;;  %v3051_v55 = vadd.f32 %v3050_v34, %v3049_v15  ;;  %v3068_v34 = vsel %vm1972_vm3, %v2652_v32, 0.0  ;;  %v2296_v52 = vsel %vm1972_vm3, %v9671_v54, 0.0  ;;  %v9680_v54 = vld [vmem:[#allocation184_spill] sm:$0xff] }
 0x339   :  { %v2661_v32 = vmul.f32 %v9679_v63, %v9679_v63 }
 0x33a   :  { %v2281_v36 = vadd.f32 %v2280_v9, %v2279_v35  ;;  %v3053_v14 = vadd.f32 %v3052_v29, %v3051_v55  ;;  %v3070_v29 = vsel %vm1972_vm3, %v2653_v23, 0.0  ;;  %v2298_v9 = vsel %vm1972_vm3, %v9672_v11, 0.0  ;;  %v9681_v11 = vld [vmem:[#allocation189_spill] sm:$0xff] }
 0x33b   :  { %v2662_v23 = vmul.f32 %v9680_v54, %v9680_v54 }
 0x33c   :  { %v2283_v40 = vadd.f32 %v2282_v57, %v2281_v36  ;;  %v3055_v43 = vadd.f32 %v3054_v60, %v3053_v14  ;;  %v3072_v60 = vsel %vm1972_vm3, %v2654_v20, 0.0  ;;  %v2300_v57 = vsel %vm1972_vm3, %v9673_v28, 0.0  ;;  %v9682_v28 = vld [vmem:[#allocation194_spill] sm:$0xff] }
 0x33d   :  { %v2663_v20 = vmul.f32 %v9681_v11, %v9681_v11 }
 0x33e   :  { %v2285_v59 = vadd.f32 %v2284_v30, %v2283_v40  ;;  %v3057_v1 = vadd.f32 %v3056_v18, %v3055_v43  ;;  %v3074_v18 = vsel %vm1972_vm3, %v2655_v24, 0.0  ;;  %v2302_v30 = vsel %vm1972_vm3, %v9674_v5, 0.0  ;;  %v9683_v5 = vld [vmem:[#allocation199_spill] sm:$0xff] }
 0x33f   :  { %v2664_v24 = vmul.f32 %v9682_v28, %v9682_v28 }
 0x340   :  { %v2287_v3 = vadd.f32 %v2286_v38, %v2285_v59  ;;  %v3059_v56 = vadd.f32 %v3058_v47, %v3057_v1  ;;  %v3076_v47 = vsel %vm1972_vm3, %v2656_v51, 0.0  ;;  %v2304_v38 = vsel %vm1972_vm3, %v9675_v41, 0.0  ;;  %v9684_v41 = vld [vmem:[#allocation204_spill] sm:$0xff] }
 0x341   :  { %v2665_v51 = vmul.f32 %v9683_v5, %v9683_v5 }
 0x342   :  { %v2289_v37 = vadd.f32 %v2288_v33, %v2287_v3  ;;  %v3061_v8 = vadd.f32 %v3060_v0, %v3059_v56  ;;  %v3078_v0 = vsel %vm1972_vm3, %v2657_v44, 0.0  ;;  %v2306_v33 = vsel %vm1972_vm3, %v9676_v2, 0.0  ;;  %v9685_v2 = vld [vmem:[#allocation209_spill] sm:$0xff] }
 0x343   :  { %v2666_v44 = vmul.f32 %v9684_v41, %v9684_v41 }
 0x344   :  { %v3063_v25 = vadd.f32 %v3062_v6, %v3061_v8  ;;  %v2291_v53 = vadd.f32 %v2290_v31, %v2289_v37  ;;  %v3080_v6 = vsel %vm1972_vm3, %v2658_v21, 0.0  ;;  %v2308_v31 = vsel %vm1972_vm3, %v9677_v17, 0.0  ;;  %v9686_v17 = vld [vmem:[#allocation214_spill] sm:$0xff] }
 0x345   :  { %v2667_v21 = vmul.f32 %v9685_v2, %v9685_v2 }
 0x346   :  { %v2293_v50 = vadd.f32 %v2292_v22, %v2291_v53  ;;  %v3065_v27 = vadd.f32 %v3064_v10, %v3063_v25  ;;  %v3082_v10 = vsel %vm1972_vm3, %v2659_v46, 0.0  ;;  %v2310_v22 = vsel %vm1972_vm3, %v9678_v12, 0.0  ;;  %v9687_v12 = vld [vmem:[#allocation219_spill] sm:$0xff] }
 0x347   :  { %v2668_v46 = vmul.f32 %v9686_v17, %v9686_v17 }
 0x348   :  { %v2295_v58 = vadd.f32 %v2294_v42, %v2293_v50  ;;  %v3067_v15 = vadd.f32 %v3066_v48, %v3065_v27  ;;  %v3084_v48 = vsel %vm1972_vm3, %v2660_v19, 0.0  ;;  %v2312_v42 = vsel %vm1972_vm3, %v9679_v63, 0.0  ;;  %v9688_v63 = vld [vmem:[#allocation224_spill] sm:$0xff] }
 0x349   :  { %v2669_v19 = vmul.f32 %v9687_v12, %v9687_v12 }
 0x34a   :  { %v2297_v35 = vadd.f32 %v2296_v52, %v2295_v58  ;;  %v3069_v55 = vadd.f32 %v3068_v34, %v3067_v15  ;;  %v3086_v34 = vsel %vm1972_vm3, %v2661_v32, 0.0  ;;  %v2314_v52 = vsel %vm1972_vm3, %v9680_v54, 0.0  ;;  %v9689_v54 = vld [vmem:[#allocation229_spill] sm:$0xff] }
 0x34b   :  { %v2670_v32 = vmul.f32 %v9688_v63, %v9688_v63 }
 0x34c   :  { %v2299_v36 = vadd.f32 %v2298_v9, %v2297_v35  ;;  %v3071_v14 = vadd.f32 %v3070_v29, %v3069_v55  ;;  %v3088_v29 = vsel %vm1972_vm3, %v2662_v23, 0.0  ;;  %v2316_v9 = vsel %vm1972_vm3, %v9681_v11, 0.0  ;;  %v9690_v11 = vld [vmem:[#allocation234_spill] sm:$0xff] }
 0x34d   :  { %v2671_v23 = vmul.f32 %v9689_v54, %v9689_v54 }
 0x34e   :  { %v2301_v40 = vadd.f32 %v2300_v57, %v2299_v36  ;;  %v3073_v43 = vadd.f32 %v3072_v60, %v3071_v14  ;;  %v3090_v60 = vsel %vm1972_vm3, %v2663_v20, 0.0  ;;  %v2318_v57 = vsel %vm1972_vm3, %v9682_v28, 0.0  ;;  %v9691_v28 = vld [vmem:[#allocation239_spill] sm:$0xff] }
 0x34f   :  { %v2672_v20 = vmul.f32 %v9690_v11, %v9690_v11 }
 0x350   :  { %v2303_v59 = vadd.f32 %v2302_v30, %v2301_v40  ;;  %v3075_v1 = vadd.f32 %v3074_v18, %v3073_v43  ;;  %v3092_v18 = vsel %vm1972_vm3, %v2664_v24, 0.0  ;;  %v2320_v30 = vsel %vm1972_vm3, %v9683_v5, 0.0  ;;  %v9692_v5 = vld [vmem:[#allocation244_spill] sm:$0xff] }
 0x351   :  { %v2673_v24 = vmul.f32 %v9691_v28, %v9691_v28 }
 0x352   :  { %v2305_v3 = vadd.f32 %v2304_v38, %v2303_v59  ;;  %v3077_v56 = vadd.f32 %v3076_v47, %v3075_v1  ;;  %v3094_v47 = vsel %vm1972_vm3, %v2665_v51, 0.0  ;;  %v2322_v38 = vsel %vm1972_vm3, %v9684_v41, 0.0  ;;  %v9693_v41 = vld [vmem:[#allocation249_spill] sm:$0xff] }
 0x353   :  { %v2674_v51 = vmul.f32 %v9692_v5, %v9692_v5 }
 0x354   :  { %v2307_v37 = vadd.f32 %v2306_v33, %v2305_v3  ;;  %v3079_v8 = vadd.f32 %v3078_v0, %v3077_v56  ;;  %v3096_v0 = vsel %vm1972_vm3, %v2666_v44, 0.0  ;;  %v2324_v33 = vsel %vm1972_vm3, %v9685_v2, 0.0  ;;  %v9694_v2 = vld [vmem:[#allocation254_spill] sm:$0xff] }
 0x355   :  { %v2675_v44 = vmul.f32 %v9693_v41, %v9693_v41 }
 0x356   :  { %v2309_v25 = vadd.f32 %v2308_v31, %v2307_v37  ;;  %v3081_v53 = vadd.f32 %v3080_v6, %v3079_v8  ;;  %v3098_v6 = vsel %vm1972_vm3, %v2667_v21, 0.0  ;;  %v2326_v31 = vsel %vm1972_vm3, %v9686_v17, 0.0  ;;  %v9695_v17 = vld [vmem:[#allocation259_spill] sm:$0xff] }
 0x357   :  { %v2676_v21 = vmul.f32 %v9694_v2, %v9694_v2 }
 0x358   :  { %v2311_v50 = vadd.f32 %v2310_v22, %v2309_v25  ;;  %v3083_v27 = vadd.f32 %v3082_v10, %v3081_v53  ;;  %v3100_v10 = vsel %vm1972_vm3, %v2668_v46, 0.0  ;;  %v2328_v22 = vsel %vm1972_vm3, %v9687_v12, 0.0  ;;  %v9696_v12 = vld [vmem:[#allocation264_spill] sm:$0xff] }
 0x359   :  { %v2677_v46 = vmul.f32 %v9695_v17, %v9695_v17 }
 0x35a   :  { %v2313_v58 = vadd.f32 %v2312_v42, %v2311_v50  ;;  %v3085_v15 = vadd.f32 %v3084_v48, %v3083_v27  ;;  %v3102_v48 = vsel %vm1972_vm3, %v2669_v19, 0.0  ;;  %v2330_v42 = vsel %vm1972_vm3, %v9688_v63, 0.0  ;;  %v9697_v63 = vld [vmem:[#allocation269_spill] sm:$0xff] }
 0x35b   :  { %v2678_v19 = vmul.f32 %v9696_v12, %v9696_v12 }
 0x35c   :  { %v2315_v35 = vadd.f32 %v2314_v52, %v2313_v58  ;;  %v3087_v55 = vadd.f32 %v3086_v34, %v3085_v15  ;;  %v3104_v34 = vsel %vm1972_vm3, %v2670_v32, 0.0  ;;  %v2332_v52 = vsel %vm1972_vm3, %v9689_v54, 0.0 }
 0x35d   :  { %v2679_v32 = vmul.f32 %v9697_v63, %v9697_v63  ;;  %v2680_v54 = vmul.f32 %v6541_v13, %v6541_v13 }
 0x35e   :  { %v2317_v36 = vadd.f32 %v2316_v9, %v2315_v35  ;;  %v3089_v14 = vadd.f32 %v3088_v29, %v3087_v55  ;;  %v3106_v29 = vsel %vm1972_vm3, %v2671_v23, 0.0  ;;  %v2334_v9 = vsel %vm1972_vm3, %v9690_v11, 0.0  ;;  %v7216_v11 = vpop.f32.mrf.mxu2 }
 0x360   :  { %v2319_v40 = vadd.f32 %v2318_v57, %v2317_v36  ;;  %v3091_v43 = vadd.f32 %v3090_v60, %v3089_v14  ;;  %v3108_v60 = vsel %vm1972_vm3, %v2672_v20, 0.0  ;;  %v2336_v57 = vsel %vm1972_vm3, %v9691_v28, 0.0 }
 0x362   :  { %v2321_v59 = vadd.f32 %v2320_v30, %v2319_v40  ;;  %v3093_v1 = vadd.f32 %v3092_v18, %v3091_v43  ;;  %v3110_v18 = vsel %vm1972_vm3, %v2673_v24, 0.0  ;;  %v2338_v30 = vsel %vm1972_vm3, %v9692_v5, 0.0 }
 0x364   :  { %v2323_v3 = vadd.f32 %v2322_v38, %v2321_v59  ;;  %v3095_v56 = vadd.f32 %v3094_v47, %v3093_v1  ;;  %v3112_v47 = vsel %vm1972_vm3, %v2674_v51, 0.0  ;;  %v2340_v38 = vsel %vm1972_vm3, %v9693_v41, 0.0 }
 0x366   :  { %v2325_v37 = vadd.f32 %v2324_v33, %v2323_v3  ;;  %v3097_v8 = vadd.f32 %v3096_v0, %v3095_v56  ;;  %v3114_v0 = vsel %vm1972_vm3, %v2675_v44, 0.0  ;;  %v2342_v33 = vsel %vm1972_vm3, %v9694_v2, 0.0 }
 0x368   :  { %v2327_v25 = vadd.f32 %v2326_v31, %v2325_v37  ;;  %v3099_v53 = vadd.f32 %v3098_v6, %v3097_v8  ;;  %v3116_v6 = vsel %vm1972_vm3, %v2676_v21, 0.0  ;;  %v2344_v31 = vsel %vm1972_vm3, %v9695_v17, 0.0 }
 0x36a   :  { %v2329_v50 = vadd.f32 %v2328_v22, %v2327_v25  ;;  %v3101_v27 = vadd.f32 %v3100_v10, %v3099_v53  ;;  %v3118_v10 = vsel %vm1972_vm3, %v2677_v46, 0.0  ;;  %v2346_v22 = vsel %vm1972_vm3, %v9696_v12, 0.0 }
 0x36c   :  { %v2331_v58 = vadd.f32 %v2330_v42, %v2329_v50  ;;  %v3103_v15 = vadd.f32 %v3102_v48, %v3101_v27  ;;  %v3120_v48 = vsel %vm1972_vm3, %v2678_v19, 0.0  ;;  %v2348_v42 = vsel %vm1972_vm3, %v9697_v63, 0.0 }
 0x36e   :  { %v2333_v35 = vadd.f32 %v2332_v52, %v2331_v58  ;;  %v3105_v55 = vadd.f32 %v3104_v34, %v3103_v15  ;;  %v3122_v15 = vsel %vm1972_vm3, %v2679_v32, 0.0  ;;  %v2350_v34 = vsel %vm1972_vm3, %v6541_v13, 0.0 }
 0x36f   :  { %v2681_v52 = vmul.f32 %v6564_v39, %v6564_v39 }
 0x370   :  { %v2335_v36 = vadd.f32 %v2334_v9, %v2333_v35  ;;  %v3107_v14 = vadd.f32 %v3106_v29, %v3105_v55  ;;  %v3124_v55 = vsel %vm1972_vm3, %v2680_v54, 0.0  ;;  %v2352_v29 = vsel %vm1972_vm3, %v6564_v39, 0.0 }
 0x371   :  { %v2682_v9 = vmul.f32 %v7216_v11, %v7216_v11 }
 0x372   :  { %v2337_v40 = vadd.f32 %v2336_v57, %v2335_v36  ;;  %v3109_v43 = vadd.f32 %v3108_v60, %v3107_v14  ;;  %v9698_v36 = vld [vmem:[#allocation3_spill] sm:$0xff]  ;;  %v3126_v14 = vsel %vm1972_vm3, %v2681_v52, 0.0  ;;  %v2354_v60 = vsel %vm1972_vm3, %v7216_v11, 0.0 }
 0x373   :  { %v2683_v13 = vmul.f32 %v9698_v36, %v9698_v36  ;;  %v2356_v51 = vsel %vm1972_vm3, %v9698_v36, 0.0 }
 0x374   :  { %v2339_v59 = vadd.f32 %v2338_v30, %v2337_v40  ;;  %v3111_v1 = vadd.f32 %v3110_v18, %v3109_v43  ;;  %v9699_v40 = vld [vmem:[#allocation7_spill] sm:$0xff]  ;;  %v3128_v43 = vsel %vm1972_vm3, %v2682_v9, 0.0 }
 0x375   :  { %v2684_v39 = vmul.f32 %v9699_v40, %v9699_v40  ;;  %v3130_v41 = vsel %vm1972_vm3, %v2683_v13, 0.0  ;;  %v2358_v44 = vsel %vm1972_vm3, %v9699_v40, 0.0  ;;  %v9707_v13 = vld [vmem:[#allocation39_spill] sm:$0xff] }
 0x376   :  { %v2341_v3 = vadd.f32 %v2340_v38, %v2339_v59  ;;  %v3113_v56 = vadd.f32 %v3112_v47, %v3111_v1  ;;  %v9700_v59 = vld [vmem:[#allocation11_spill] sm:$0xff] }
 0x377   :  { %v2685_v1 = vmul.f32 %v9700_v59, %v9700_v59  ;;  %v3132_v2 = vsel %vm1972_vm3, %v2684_v39, 0.0  ;;  %v2360_v21 = vsel %vm1972_vm3, %v9700_v59, 0.0  ;;  %v9708_v40 = vld [vmem:[#allocation43_spill] sm:$0xff] }
 0x378   :  { %v2343_v37 = vadd.f32 %v2342_v33, %v2341_v3  ;;  %v3115_v8 = vadd.f32 %v3114_v0, %v3113_v56  ;;  %v9701_v3 = vld [vmem:[#allocation15_spill] sm:$0xff]  ;;  %v2693_v39 = vmul.f32 %v9708_v40, %v9708_v40 }
 0x379   :  { %v2686_v56 = vmul.f32 %v9701_v3, %v9701_v3  ;;  %v3134_v17 = vsel %vm1972_vm3, %v2685_v1, 0.0  ;;  %v2362_v46 = vsel %vm1972_vm3, %v9701_v3, 0.0 }
 0x37a   :  { %v2345_v25 = vadd.f32 %v2344_v31, %v2343_v37  ;;  %v3117_v53 = vadd.f32 %v3116_v6, %v3115_v8  ;;  %v9702_v37 = vld [vmem:[#allocation19_spill] sm:$0xff] }
 0x37b   :  { %v2687_v8 = vmul.f32 %v9702_v37, %v9702_v37  ;;  %v3136_v12 = vsel %vm1972_vm3, %v2686_v56, 0.0  ;;  %v2364_v19 = vsel %vm1972_vm3, %v9702_v37, 0.0 }
 0x37c   :  { %v2347_v50 = vadd.f32 %v2346_v22, %v2345_v25  ;;  %v3119_v27 = vadd.f32 %v3118_v10, %v3117_v53  ;;  %v9703_v25 = vld [vmem:[#allocation23_spill] sm:$0xff] }
 0x37d   :  { %v2688_v53 = vmul.f32 %v9703_v25, %v9703_v25  ;;  %v3138_v63 = vsel %vm1972_vm3, %v2687_v8, 0.0  ;;  %v2366_v32 = vsel %vm1972_vm3, %v9703_v25, 0.0 }
 0x37e   :  { %v2349_v23 = vadd.f32 %v2348_v42, %v2347_v50  ;;  %v3121_v58 = vadd.f32 %v3120_v48, %v3119_v27  ;;  %v9704_v50 = vld [vmem:[#allocation27_spill] sm:$0xff] }
 0x37f   :  { %v2689_v27 = vmul.f32 %v9704_v50, %v9704_v50  ;;  %v3140_v54 = vsel %vm1972_vm3, %v2688_v53, 0.0 }
 0x380   :  { %v2351_v20 = vadd.f32 %v2350_v34, %v2349_v23  ;;  %v3123_v35 = vadd.f32 %v3122_v15, %v3121_v58  ;;  %v2368_v23 = vsel %vm1972_vm3, %v9704_v50, 0.0  ;;  %v9705_v58 = vld [vmem:[#allocation31_spill] sm:$0xff] }
 0x381   :  { %v2690_v15 = vmul.f32 %v9705_v58, %v9705_v58 }
 0x382   :  { %v2353_v28 = vadd.f32 %v2352_v29, %v2351_v20  ;;  %v3125_v24 = vadd.f32 %v3124_v55, %v3123_v35  ;;  %v3142_v20 = vsel %vm1972_vm3, %v2689_v27, 0.0  ;;  %v2370_v35 = vsel %vm1972_vm3, %v9705_v58, 0.0  ;;  %v9706_v55 = vld [vmem:[#allocation35_spill] sm:$0xff] }
 0x383   :  { %v2691_v29 = vmul.f32 %v9706_v55, %v9706_v55  ;;  %v2372_v36 = vsel %vm1972_vm3, %v9706_v55, 0.0 }
 0x384   :  { %v2355_v57 = vadd.f32 %v2354_v60, %v2353_v28  ;;  %v3127_v5 = vadd.f32 %v3126_v14, %v3125_v24  ;;  %v3144_v24 = vsel %vm1972_vm3, %v2690_v15, 0.0  ;;  %v2692_v14 = vmul.f32 %v9707_v13, %v9707_v13 }
 0x386   :  { %v2357_v18 = vadd.f32 %v2356_v51, %v2355_v57  ;;  %v3129_v30 = vadd.f32 %v3128_v43, %v3127_v5  ;;  %v3146_v5 = vsel %vm1972_vm3, %v2691_v29, 0.0  ;;  %v2374_v51 = vsel %vm1972_vm3, %v9707_v13, 0.0 }
 0x388   :  { %v2359_v47 = vadd.f32 %v2358_v44, %v2357_v18  ;;  %v3131_v38 = vadd.f32 %v3130_v41, %v3129_v30  ;;  %v3148_v30 = vsel %vm1972_vm3, %v2692_v14, 0.0  ;;  %v2376_v41 = vsel %vm1972_vm3, %v9708_v40, 0.0  ;;  %v9709_v44 = vld [vmem:[#allocation47_spill] sm:$0xff] }
 0x389   :  { %v2694_v59 = vmul.f32 %v9709_v44, %v9709_v44 }
 0x38a   :  { %v2361_v0 = vadd.f32 %v2360_v21, %v2359_v47  ;;  %v3133_v33 = vadd.f32 %v3132_v2, %v3131_v38  ;;  %v3150_v38 = vsel %vm1972_vm3, %v2693_v39, 0.0  ;;  %v2378_v2 = vsel %vm1972_vm3, %v9709_v44, 0.0  ;;  %v9710_v21 = vld [vmem:[#allocation51_spill] sm:$0xff] }
 0x38b   :  { %v2695_v3 = vmul.f32 %v9710_v21, %v9710_v21 }
 0x38c   :  { %v2363_v6 = vadd.f32 %v2362_v46, %v2361_v0  ;;  %v3135_v31 = vadd.f32 %v3134_v17, %v3133_v33  ;;  %v3152_v33 = vsel %vm1972_vm3, %v2694_v59, 0.0  ;;  %v2380_v17 = vsel %vm1972_vm3, %v9710_v21, 0.0  ;;  %v9711_v46 = vld [vmem:[#allocation55_spill] sm:$0xff] }
 0x38d   :  { %v2696_v37 = vmul.f32 %v9711_v46, %v9711_v46 }
 0x38e   :  { %v2365_v10 = vadd.f32 %v2364_v19, %v2363_v6  ;;  %v3137_v22 = vadd.f32 %v3136_v12, %v3135_v31  ;;  %v3154_v31 = vsel %vm1972_vm3, %v2695_v3, 0.0  ;;  %v2382_v12 = vsel %vm1972_vm3, %v9711_v46, 0.0  ;;  %v9712_v19 = vld [vmem:[#allocation59_spill] sm:$0xff] }
 0x38f   :  { %v2697_v25 = vmul.f32 %v9712_v19, %v9712_v19 }
 0x390   :  { %v2367_v48 = vadd.f32 %v2366_v32, %v2365_v10  ;;  %v3139_v42 = vadd.f32 %v3138_v63, %v3137_v22  ;;  %v3156_v22 = vsel %vm1972_vm3, %v2696_v37, 0.0  ;;  %v2384_v63 = vsel %vm1972_vm3, %v9712_v19, 0.0  ;;  %v9713_v32 = vld [vmem:[#allocation63_spill] sm:$0xff] }
 0x391   :  { %v2698_v50 = vmul.f32 %v9713_v32, %v9713_v32 }
 0x392   :  { %v2369_v34 = vadd.f32 %v2368_v23, %v2367_v48  ;;  %v3141_v52 = vadd.f32 %v3140_v54, %v3139_v42  ;;  %v3158_v42 = vsel %vm1972_vm3, %v2697_v25, 0.0  ;;  %v2386_v54 = vsel %vm1972_vm3, %v9713_v32, 0.0  ;;  %v9714_v23 = vld [vmem:[#allocation67_spill] sm:$0xff] }
 0x393   :  { %v2699_v58 = vmul.f32 %v9714_v23, %v9714_v23 }
 0x394   :  { %v2371_v9 = vadd.f32 %v2370_v35, %v2369_v34  ;;  %v3143_v28 = vadd.f32 %v3142_v20, %v3141_v52  ;;  %v3160_v52 = vsel %vm1972_vm3, %v2698_v50, 0.0  ;;  %v2388_v20 = vsel %vm1972_vm3, %v9714_v23, 0.0  ;;  %v9715_v35 = vld [vmem:[#allocation71_spill] sm:$0xff] }
 0x395   :  { %v2700_v55 = vmul.f32 %v9715_v35, %v9715_v35 }
 0x396   :  { %v2373_v60 = vadd.f32 %v2372_v36, %v2371_v9  ;;  %v3145_v57 = vadd.f32 %v3144_v24, %v3143_v28  ;;  %v3162_v28 = vsel %vm1972_vm3, %v2699_v58, 0.0  ;;  %v2390_v24 = vsel %vm1972_vm3, %v9715_v35, 0.0  ;;  %v9716_v36 = vld [vmem:[#allocation75_spill] sm:$0xff] }
 0x397   :  { %v2701_v13 = vmul.f32 %v9716_v36, %v9716_v36 }
 0x398   :  { %v2375_v43 = vadd.f32 %v2374_v51, %v2373_v60  ;;  %v3147_v18 = vadd.f32 %v3146_v5, %v3145_v57  ;;  %v3164_v57 = vsel %vm1972_vm3, %v2700_v55, 0.0  ;;  %v2392_v5 = vsel %vm1972_vm3, %v9716_v36, 0.0  ;;  %v9717_v51 = vld [vmem:[#allocation79_spill] sm:$0xff] }
 0x399   :  { %v2702_v40 = vmul.f32 %v9717_v51, %v9717_v51 }
 0x39a   :  { %v2377_v1 = vadd.f32 %v2376_v41, %v2375_v43  ;;  %v3149_v47 = vadd.f32 %v3148_v30, %v3147_v18  ;;  %v3166_v18 = vsel %vm1972_vm3, %v2701_v13, 0.0  ;;  %v2394_v30 = vsel %vm1972_vm3, %v9717_v51, 0.0  ;;  %v9718_v41 = vld [vmem:[#allocation83_spill] sm:$0xff] }
 0x39b   :  { %v2703_v44 = vmul.f32 %v9718_v41, %v9718_v41 }
 0x39c   :  { %v2379_v56 = vadd.f32 %v2378_v2, %v2377_v1  ;;  %v3151_v0 = vadd.f32 %v3150_v38, %v3149_v47  ;;  %v3168_v47 = vsel %vm1972_vm3, %v2702_v40, 0.0  ;;  %v2396_v38 = vsel %vm1972_vm3, %v9718_v41, 0.0  ;;  %v9719_v2 = vld [vmem:[#allocation87_spill] sm:$0xff] }
 0x39d   :  { %v2704_v21 = vmul.f32 %v9719_v2, %v9719_v2 }
 0x39e   :  { %v2381_v8 = vadd.f32 %v2380_v17, %v2379_v56  ;;  %v3153_v6 = vadd.f32 %v3152_v33, %v3151_v0  ;;  %v3170_v0 = vsel %vm1972_vm3, %v2703_v44, 0.0  ;;  %v2398_v33 = vsel %vm1972_vm3, %v9719_v2, 0.0  ;;  %v9720_v17 = vld [vmem:[#allocation91_spill] sm:$0xff] }
 0x39f   :  { %v2705_v46 = vmul.f32 %v9720_v17, %v9720_v17 }
 0x3a0   :  { %v2383_v53 = vadd.f32 %v2382_v12, %v2381_v8  ;;  %v3155_v10 = vadd.f32 %v3154_v31, %v3153_v6  ;;  %v3172_v6 = vsel %vm1972_vm3, %v2704_v21, 0.0  ;;  %v2400_v31 = vsel %vm1972_vm3, %v9720_v17, 0.0  ;;  %v9721_v12 = vld [vmem:[#allocation95_spill] sm:$0xff] }
 0x3a1   :  { %v2706_v19 = vmul.f32 %v9721_v12, %v9721_v12 }
 0x3a2   :  { %v2385_v27 = vadd.f32 %v2384_v63, %v2383_v53  ;;  %v3157_v48 = vadd.f32 %v3156_v22, %v3155_v10  ;;  %v3174_v10 = vsel %vm1972_vm3, %v2705_v46, 0.0  ;;  %v2402_v22 = vsel %vm1972_vm3, %v9721_v12, 0.0  ;;  %v9722_v63 = vld [vmem:[#allocation99_spill] sm:$0xff] }
 0x3a3   :  { %v2707_v32 = vmul.f32 %v9722_v63, %v9722_v63 }
 0x3a4   :  { %v2387_v15 = vadd.f32 %v2386_v54, %v2385_v27  ;;  %v3159_v34 = vadd.f32 %v3158_v42, %v3157_v48  ;;  %v3176_v48 = vsel %vm1972_vm3, %v2706_v19, 0.0  ;;  %v2404_v42 = vsel %vm1972_vm3, %v9722_v63, 0.0  ;;  %v9723_v54 = vld [vmem:[#allocation103_spill] sm:$0xff] }
 0x3a5   :  { %v2708_v23 = vmul.f32 %v9723_v54, %v9723_v54 }
 0x3a6   :  { %v2389_v29 = vadd.f32 %v2388_v20, %v2387_v15  ;;  %v3161_v9 = vadd.f32 %v3160_v52, %v3159_v34  ;;  %v3178_v34 = vsel %vm1972_vm3, %v2707_v32, 0.0  ;;  %v2406_v52 = vsel %vm1972_vm3, %v9723_v54, 0.0  ;;  %v9724_v20 = vld [vmem:[#allocation107_spill] sm:$0xff] }
 0x3a7   :  { %v2709_v35 = vmul.f32 %v9724_v20, %v9724_v20 }
 0x3a8   :  { %v2391_v14 = vadd.f32 %v2390_v24, %v2389_v29  ;;  %v3163_v60 = vadd.f32 %v3162_v28, %v3161_v9  ;;  %v3180_v9 = vsel %vm1972_vm3, %v2708_v23, 0.0  ;;  %v2408_v28 = vsel %vm1972_vm3, %v9724_v20, 0.0  ;;  %v9725_v24 = vld [vmem:[#allocation111_spill] sm:$0xff] }
 0x3a9   :  { %v2710_v36 = vmul.f32 %v9725_v24, %v9725_v24 }
 0x3aa   :  { %v2393_v39 = vadd.f32 %v2392_v5, %v2391_v14  ;;  %v3165_v43 = vadd.f32 %v3164_v57, %v3163_v60  ;;  %v3182_v60 = vsel %vm1972_vm3, %v2709_v35, 0.0  ;;  %v2410_v57 = vsel %vm1972_vm3, %v9725_v24, 0.0  ;;  %v9726_v5 = vld [vmem:[#allocation115_spill] sm:$0xff] }
 0x3ab   :  { %v2711_v51 = vmul.f32 %v9726_v5, %v9726_v5 }
 0x3ac   :  { %v2395_v59 = vadd.f32 %v2394_v30, %v2393_v39  ;;  %v3167_v1 = vadd.f32 %v3166_v18, %v3165_v43  ;;  %v3184_v43 = vsel %vm1972_vm3, %v2710_v36, 0.0  ;;  %v2412_v18 = vsel %vm1972_vm3, %v9726_v5, 0.0  ;;  %v9727_v30 = vld [vmem:[#allocation119_spill] sm:$0xff] }
 0x3ad   :  { %v2712_v41 = vmul.f32 %v9727_v30, %v9727_v30 }
 0x3ae   :  { %v2397_v3 = vadd.f32 %v2396_v38, %v2395_v59  ;;  %v3169_v56 = vadd.f32 %v3168_v47, %v3167_v1  ;;  %v3186_v1 = vsel %vm1972_vm3, %v2711_v51, 0.0  ;;  %v2414_v47 = vsel %vm1972_vm3, %v9727_v30, 0.0  ;;  %v9728_v38 = vld [vmem:[#allocation123_spill] sm:$0xff] }
 0x3af   :  { %v2713_v2 = vmul.f32 %v9728_v38, %v9728_v38 }
 0x3b0   :  { %v2399_v37 = vadd.f32 %v2398_v33, %v2397_v3  ;;  %v3171_v8 = vadd.f32 %v3170_v0, %v3169_v56  ;;  %v3188_v56 = vsel %vm1972_vm3, %v2712_v41, 0.0  ;;  %v2416_v0 = vsel %vm1972_vm3, %v9728_v38, 0.0  ;;  %v9729_v33 = vld [vmem:[#allocation127_spill] sm:$0xff] }
 0x3b1   :  { %v2714_v17 = vmul.f32 %v9729_v33, %v9729_v33 }
 0x3b2   :  { %v2401_v25 = vadd.f32 %v2400_v31, %v2399_v37  ;;  %v3173_v53 = vadd.f32 %v3172_v6, %v3171_v8  ;;  %v3190_v8 = vsel %vm1972_vm3, %v2713_v2, 0.0  ;;  %v2418_v6 = vsel %vm1972_vm3, %v9729_v33, 0.0  ;;  %v9730_v31 = vld [vmem:[#allocation131_spill] sm:$0xff] }
 0x3b3   :  { %v2715_v12 = vmul.f32 %v9730_v31, %v9730_v31 }
 0x3b4   :  { %v2403_v50 = vadd.f32 %v2402_v22, %v2401_v25  ;;  %v3175_v27 = vadd.f32 %v3174_v10, %v3173_v53  ;;  %v3192_v53 = vsel %vm1972_vm3, %v2714_v17, 0.0  ;;  %v2420_v10 = vsel %vm1972_vm3, %v9730_v31, 0.0  ;;  %v9731_v22 = vld [vmem:[#allocation135_spill] sm:$0xff] }
 0x3b5   :  { %v2716_v63 = vmul.f32 %v9731_v22, %v9731_v22 }
 0x3b6   :  { %v2405_v58 = vadd.f32 %v2404_v42, %v2403_v50  ;;  %v3177_v15 = vadd.f32 %v3176_v48, %v3175_v27  ;;  %v3194_v27 = vsel %vm1972_vm3, %v2715_v12, 0.0  ;;  %v2422_v48 = vsel %vm1972_vm3, %v9731_v22, 0.0  ;;  %v9732_v42 = vld [vmem:[#allocation140_spill] sm:$0xff] }
 0x3b7   :  { %v2717_v54 = vmul.f32 %v9732_v42, %v9732_v42 }
 0x3b8   :  { %v2407_v55 = vadd.f32 %v2406_v52, %v2405_v58  ;;  %v3179_v29 = vadd.f32 %v3178_v34, %v3177_v15  ;;  %v3196_v15 = vsel %vm1972_vm3, %v2716_v63, 0.0  ;;  %v2424_v34 = vsel %vm1972_vm3, %v9732_v42, 0.0  ;;  %v9733_v52 = vld [vmem:[#allocation145_spill] sm:$0xff] }
 0x3b9   :  { %v2718_v20 = vmul.f32 %v9733_v52, %v9733_v52 }
 0x3ba   :  { %v2409_v13 = vadd.f32 %v2408_v28, %v2407_v55  ;;  %v3181_v14 = vadd.f32 %v3180_v9, %v3179_v29  ;;  %v3198_v29 = vsel %vm1972_vm3, %v2717_v54, 0.0  ;;  %v2426_v9 = vsel %vm1972_vm3, %v9733_v52, 0.0  ;;  %v9734_v28 = vld [vmem:[#allocation150_spill] sm:$0xff] }
 0x3bb   :  { %v2719_v24 = vmul.f32 %v9734_v28, %v9734_v28 }
 0x3bc   :  { %v2411_v40 = vadd.f32 %v2410_v57, %v2409_v13  ;;  %v3183_v39 = vadd.f32 %v3182_v60, %v3181_v14  ;;  %v3200_v14 = vsel %vm1972_vm3, %v2718_v20, 0.0  ;;  %v2428_v60 = vsel %vm1972_vm3, %v9734_v28, 0.0  ;;  %v9735_v57 = vld [vmem:[#allocation155_spill] sm:$0xff] }
 0x3bd   :  { %v2720_v5 = vmul.f32 %v9735_v57, %v9735_v57 }
 0x3be   :  { %v2413_v44 = vadd.f32 %v2412_v18, %v2411_v40  ;;  %v3185_v59 = vadd.f32 %v3184_v43, %v3183_v39  ;;  %v3202_v39 = vsel %vm1972_vm3, %v2719_v24, 0.0  ;;  %v2430_v43 = vsel %vm1972_vm3, %v9735_v57, 0.0  ;;  %v9736_v18 = vld [vmem:[#allocation160_spill] sm:$0xff] }
 0x3bf   :  { %v2721_v30 = vmul.f32 %v9736_v18, %v9736_v18 }
 0x3c0   :  { %v2415_v21 = vadd.f32 %v2414_v47, %v2413_v44  ;;  %v3187_v3 = vadd.f32 %v3186_v1, %v3185_v59  ;;  %v3204_v59 = vsel %vm1972_vm3, %v2720_v5, 0.0  ;;  %v2432_v1 = vsel %vm1972_vm3, %v9736_v18, 0.0  ;;  %v9737_v47 = vld [vmem:[#allocation165_spill] sm:$0xff] }
 0x3c1   :  { %v2722_v38 = vmul.f32 %v9737_v47, %v9737_v47 }
 0x3c2   :  { %v2417_v46 = vadd.f32 %v2416_v0, %v2415_v21  ;;  %v3189_v37 = vadd.f32 %v3188_v56, %v3187_v3  ;;  %v3206_v3 = vsel %vm1972_vm3, %v2721_v30, 0.0  ;;  %v2434_v56 = vsel %vm1972_vm3, %v9737_v47, 0.0  ;;  %v9738_v0 = vld [vmem:[#allocation170_spill] sm:$0xff] }
 0x3c3   :  { %v2723_v33 = vmul.f32 %v9738_v0, %v9738_v0 }
 0x3c4   :  { %v3191_v19 = vadd.f32 %v3190_v8, %v3189_v37  ;;  %v2419_v25 = vadd.f32 %v2418_v6, %v2417_v46  ;;  %v3208_v37 = vsel %vm1972_vm3, %v2722_v38, 0.0  ;;  %v2436_v8 = vsel %vm1972_vm3, %v9738_v0, 0.0  ;;  %v9739_v6 = vld [vmem:[#allocation175_spill] sm:$0xff] }
 0x3c5   :  { %v2724_v31 = vmul.f32 %v9739_v6, %v9739_v6 }
 0x3c6   :  { %v2421_v32 = vadd.f32 %v2420_v10, %v2419_v25  ;;  %v3193_v50 = vadd.f32 %v3192_v53, %v3191_v19  ;;  %v3210_v25 = vsel %vm1972_vm3, %v2723_v33, 0.0  ;;  %v2438_v53 = vsel %vm1972_vm3, %v9739_v6, 0.0  ;;  %v9740_v10 = vld [vmem:[#allocation180_spill] sm:$0xff] }
 0x3c7   :  { %v2725_v22 = vmul.f32 %v9740_v10, %v9740_v10 }
 0x3c8   :  { %v2423_v23 = vadd.f32 %v2422_v48, %v2421_v32  ;;  %v3195_v58 = vadd.f32 %v3194_v27, %v3193_v50  ;;  %v3212_v50 = vsel %vm1972_vm3, %v2724_v31, 0.0  ;;  %v2440_v27 = vsel %vm1972_vm3, %v9740_v10, 0.0  ;;  %v9741_v48 = vld [vmem:[#allocation185_spill] sm:$0xff] }
 0x3c9   :  { %v2726_v42 = vmul.f32 %v9741_v48, %v9741_v48 }
 0x3ca   :  { %v2425_v35 = vadd.f32 %v2424_v34, %v2423_v23  ;;  %v3197_v55 = vadd.f32 %v3196_v15, %v3195_v58  ;;  %v3214_v58 = vsel %vm1972_vm3, %v2725_v22, 0.0  ;;  %v2442_v15 = vsel %vm1972_vm3, %v9741_v48, 0.0  ;;  %v9742_v34 = vld [vmem:[#allocation190_spill] sm:$0xff] }
 0x3cb   :  { %v2727_v52 = vmul.f32 %v9742_v34, %v9742_v34 }
 0x3cc   :  { %v2427_v36 = vadd.f32 %v2426_v9, %v2425_v35  ;;  %v3199_v13 = vadd.f32 %v3198_v29, %v3197_v55  ;;  %v3216_v55 = vsel %vm1972_vm3, %v2726_v42, 0.0  ;;  %v2444_v29 = vsel %vm1972_vm3, %v9742_v34, 0.0  ;;  %v9743_v9 = vld [vmem:[#allocation195_spill] sm:$0xff] }
 0x3cd   :  { %v2728_v28 = vmul.f32 %v9743_v9, %v9743_v9 }
 0x3ce   :  { %v2429_v51 = vadd.f32 %v2428_v60, %v2427_v36  ;;  %v3201_v40 = vadd.f32 %v3200_v14, %v3199_v13  ;;  %v3218_v13 = vsel %vm1972_vm3, %v2727_v52, 0.0  ;;  %v2446_v14 = vsel %vm1972_vm3, %v9743_v9, 0.0  ;;  %v9744_v60 = vld [vmem:[#allocation200_spill] sm:$0xff] }
 0x3cf   :  { %v2729_v57 = vmul.f32 %v9744_v60, %v9744_v60 }
 0x3d0   :  { %v2431_v41 = vadd.f32 %v2430_v43, %v2429_v51  ;;  %v3203_v44 = vadd.f32 %v3202_v39, %v3201_v40  ;;  %v3220_v40 = vsel %vm1972_vm3, %v2728_v28, 0.0  ;;  %v2448_v39 = vsel %vm1972_vm3, %v9744_v60, 0.0  ;;  %v9745_v43 = vld [vmem:[#allocation205_spill] sm:$0xff] }
 0x3d1   :  { %v2730_v18 = vmul.f32 %v9745_v43, %v9745_v43 }
 0x3d2   :  { %v2433_v2 = vadd.f32 %v2432_v1, %v2431_v41  ;;  %v3205_v21 = vadd.f32 %v3204_v59, %v3203_v44  ;;  %v3222_v44 = vsel %vm1972_vm3, %v2729_v57, 0.0  ;;  %v2450_v59 = vsel %vm1972_vm3, %v9745_v43, 0.0  ;;  %v9746_v1 = vld [vmem:[#allocation210_spill] sm:$0xff] }
 0x3d3   :  { %v2731_v47 = vmul.f32 %v9746_v1, %v9746_v1 }
 0x3d4   :  { %v2435_v17 = vadd.f32 %v2434_v56, %v2433_v2  ;;  %v3207_v46 = vadd.f32 %v3206_v3, %v3205_v21  ;;  %v3224_v21 = vsel %vm1972_vm3, %v2730_v18, 0.0  ;;  %v2452_v3 = vsel %vm1972_vm3, %v9746_v1, 0.0  ;;  %v9747_v56 = vld [vmem:[#allocation215_spill] sm:$0xff] }
 0x3d5   :  { %v2732_v0 = vmul.f32 %v9747_v56, %v9747_v56 }
 0x3d6   :  { %v2437_v12 = vadd.f32 %v2436_v8, %v2435_v17  ;;  %v3209_v19 = vadd.f32 %v3208_v37, %v3207_v46  ;;  %v3226_v46 = vsel %vm1972_vm3, %v2731_v47, 0.0  ;;  %v2454_v37 = vsel %vm1972_vm3, %v9747_v56, 0.0  ;;  %v9748_v8 = vld [vmem:[#allocation220_spill] sm:$0xff] }
 0x3d7   :  { %v2733_v6 = vmul.f32 %v9748_v8, %v9748_v8 }
 0x3d8   :  { %v2439_v63 = vadd.f32 %v2438_v53, %v2437_v12  ;;  %v3211_v32 = vadd.f32 %v3210_v25, %v3209_v19  ;;  %v3228_v19 = vsel %vm1972_vm3, %v2732_v0, 0.0  ;;  %v2456_v25 = vsel %vm1972_vm3, %v9748_v8, 0.0  ;;  %v9749_v53 = vld [vmem:[#allocation225_spill] sm:$0xff] }
 0x3d9   :  { %v2734_v10 = vmul.f32 %v9749_v53, %v9749_v53 }
 0x3da   :  { %v2441_v54 = vadd.f32 %v2440_v27, %v2439_v63  ;;  %v3213_v23 = vadd.f32 %v3212_v50, %v3211_v32  ;;  %v3230_v32 = vsel %vm1972_vm3, %v2733_v6, 0.0  ;;  %v2458_v50 = vsel %vm1972_vm3, %v9749_v53, 0.0  ;;  %v9750_v27 = vld [vmem:[#allocation230_spill] sm:$0xff] }
 0x3db   :  { %v2735_v48 = vmul.f32 %v9750_v27, %v9750_v27 }
 0x3dc   :  { %v2443_v20 = vadd.f32 %v2442_v15, %v2441_v54  ;;  %v3215_v35 = vadd.f32 %v3214_v58, %v3213_v23  ;;  %v3232_v23 = vsel %vm1972_vm3, %v2734_v10, 0.0  ;;  %v2460_v58 = vsel %vm1972_vm3, %v9750_v27, 0.0  ;;  %v9751_v15 = vld [vmem:[#allocation235_spill] sm:$0xff] }
 0x3dd   :  { %v2736_v34 = vmul.f32 %v9751_v15, %v9751_v15 }
 0x3de   :  { %v2445_v24 = vadd.f32 %v2444_v29, %v2443_v20  ;;  %v3217_v36 = vadd.f32 %v3216_v55, %v3215_v35  ;;  %v3234_v35 = vsel %vm1972_vm3, %v2735_v48, 0.0  ;;  %v2462_v55 = vsel %vm1972_vm3, %v9751_v15, 0.0  ;;  %v9752_v29 = vld [vmem:[#allocation240_spill] sm:$0xff] }
 0x3df   :  { %v2737_v9 = vmul.f32 %v9752_v29, %v9752_v29 }
 0x3e0   :  { %v2447_v5 = vadd.f32 %v2446_v14, %v2445_v24  ;;  %v3219_v51 = vadd.f32 %v3218_v13, %v3217_v36  ;;  %v3236_v36 = vsel %vm1972_vm3, %v2736_v34, 0.0  ;;  %v2464_v13 = vsel %vm1972_vm3, %v9752_v29, 0.0  ;;  %v9753_v14 = vld [vmem:[#allocation245_spill] sm:$0xff] }
 0x3e1   :  { %v2738_v60 = vmul.f32 %v9753_v14, %v9753_v14 }
 0x3e2   :  { %v2449_v30 = vadd.f32 %v2448_v39, %v2447_v5  ;;  %v3221_v41 = vadd.f32 %v3220_v40, %v3219_v51  ;;  %v3238_v51 = vsel %vm1972_vm3, %v2737_v9, 0.0  ;;  %v2466_v40 = vsel %vm1972_vm3, %v9753_v14, 0.0  ;;  %v9754_v39 = vld [vmem:[#allocation250_spill] sm:$0xff] }
 0x3e3   :  { %v2739_v43 = vmul.f32 %v9754_v39, %v9754_v39 }
 0x3e4   :  { %v2451_v38 = vadd.f32 %v2450_v59, %v2449_v30  ;;  %v3223_v2 = vadd.f32 %v3222_v44, %v3221_v41  ;;  %v3240_v41 = vsel %vm1972_vm3, %v2738_v60, 0.0  ;;  %v2468_v44 = vsel %vm1972_vm3, %v9754_v39, 0.0  ;;  %v9755_v59 = vld [vmem:[#allocation255_spill] sm:$0xff] }
 0x3e5   :  { %v2740_v1 = vmul.f32 %v9755_v59, %v9755_v59 }
 0x3e6   :  { %v2453_v33 = vadd.f32 %v2452_v3, %v2451_v38  ;;  %v3225_v17 = vadd.f32 %v3224_v21, %v3223_v2  ;;  %v3242_v2 = vsel %vm1972_vm3, %v2739_v43, 0.0  ;;  %v2470_v21 = vsel %vm1972_vm3, %v9755_v59, 0.0  ;;  %v9756_v3 = vld [vmem:[#allocation260_spill] sm:$0xff] }
 0x3e7   :  { %v2741_v56 = vmul.f32 %v9756_v3, %v9756_v3 }
 0x3e8   :  { %v2455_v31 = vadd.f32 %v2454_v37, %v2453_v33  ;;  %v3227_v12 = vadd.f32 %v3226_v46, %v3225_v17  ;;  %v3244_v17 = vsel %vm1972_vm3, %v2740_v1, 0.0  ;;  %v2472_v46 = vsel %vm1972_vm3, %v9756_v3, 0.0  ;;  %v9757_v37 = vld [vmem:[#allocation265_spill] sm:$0xff] }
 0x3e9   :  { %v2742_v8 = vmul.f32 %v9757_v37, %v9757_v37 }
 0x3ea   :  { %v2457_v22 = vadd.f32 %v2456_v25, %v2455_v31  ;;  %v3229_v63 = vadd.f32 %v3228_v19, %v3227_v12  ;;  %v3246_v12 = vsel %vm1972_vm3, %v2741_v56, 0.0  ;;  %v2474_v19 = vsel %vm1972_vm3, %v9757_v37, 0.0  ;;  %v9758_v25 = vld [vmem:[#allocation270_spill] sm:$0xff] }
 0x3eb   :  { %v2743_v53 = vmul.f32 %v9758_v25, %v9758_v25 }
 0x3ec   :  { %v2459_v42 = vadd.f32 %v2458_v50, %v2457_v22  ;;  %v3231_v54 = vadd.f32 %v3230_v32, %v3229_v63  ;;  %v3248_v63 = vsel %vm1972_vm3, %v2742_v8, 0.0  ;;  %v2476_v32 = vsel %vm1972_vm3, %v9758_v25, 0.0 }
 0x3ed   :  { %v2744_v50 = vmul.f32 %v6543_v16, %v6543_v16  ;;  %v3345_v25 = vmax.f32 %v6570_v45, %v6894_v7 }
 0x3ee   :  { %v2461_v52 = vadd.f32 %v2460_v58, %v2459_v42  ;;  %v3233_v20 = vadd.f32 %v3232_v23, %v3231_v54  ;;  %v3250_v42 = vsel %vm1972_vm3, %v2743_v53, 0.0  ;;  %v2478_v54 = vsel %vm1972_vm3, %v6543_v16, 0.0  ;;  %v1967_v58 = vpop.f32.mrf.mxu3 }
 0x3ef   :  { %v2745_v23 = vmul.f32 %v6566_v4, %v6566_v4  ;;  %v4854_v53 = vmov 0  }
 0x3f0   :  { %v2463_v28 = vadd.f32 %v2462_v55, %v2461_v52  ;;  %v3235_v24 = vadd.f32 %v3234_v35, %v3233_v20  ;;  %v3252_v52 = vsel %vm1972_vm3, %v2744_v50, 0.0  ;;  %v2480_v20 = vsel %vm1972_vm3, %v6566_v4, 0.0 }
 0x3f1   :  { %v2746_v35 = vmul.f32 %v1967_v58, %v1967_v58  ;;  %v3254_v9 = vsel %vm1972_vm3, %v2745_v23, 0.0  ;;  %v9764_v23 = vld [vmem:[#allocation4_spill] sm:$0xff] }
 0x3f2   :  { %v2465_v57 = vadd.f32 %v2464_v13, %v2463_v28  ;;  %v3237_v5 = vadd.f32 %v3236_v36, %v3235_v24  ;;  %v2482_v28 = vsel %vm1972_vm3, %v1967_v58, 0.0 }
 0x3f3   :  { %v3256_v36 = vsel %vm1972_vm3, %v2746_v35, 0.0  ;;  %v9769_v35 = vld [vmem:[#allocation17_spill] sm:$0xff] }
 0x3f4   :  { %v2467_v18 = vadd.f32 %v2466_v40, %v2465_v57  ;;  %v3239_v30 = vadd.f32 %v3238_v51, %v3237_v5 }
 0x3f6   :  { %v2469_v47 = vadd.f32 %v2468_v44, %v2467_v18  ;;  %v3241_v38 = vadd.f32 %v3240_v41, %v3239_v30 }
 0x3f8   :  { %v2471_v0 = vadd.f32 %v2470_v21, %v2469_v47  ;;  %v3243_v33 = vadd.f32 %v3242_v2, %v3241_v38 }
 0x3fa   :  { %v2473_v6 = vadd.f32 %v2472_v46, %v2471_v0  ;;  %v3245_v31 = vadd.f32 %v3244_v17, %v3243_v33  ;;  %v1970_v17 = vld [vmem:[%s8914_s2] sm:$0x1] }
 0x3fc   :  { %v2475_v10 = vadd.f32 %v2474_v19, %v2473_v6  ;;  %v3247_v22 = vadd.f32 %v3246_v12, %v3245_v31  ;;  %v1971_v6 = vld [vmem:[%s8915_s3] sm:$0x1]  ;;  %v3409_v31 = vmax.f32 %v7216_v11, %v1967_v58  ;;  %v3601_v19 = vmin.f32 %v7216_v11, %v1967_v58 }
 0x3fe   :  { %v2477_v27 = vadd.f32 %v2476_v32, %v2475_v10  ;;  %v3249_v48 = vadd.f32 %v3248_v63, %v3247_v22  ;;  %v3537_v22 = vmin.f32 %v6570_v45, %v6894_v7  ;;  %v7556_v50 = vmax.f32 %v3345_v25, %v3409_v31  ;;  %v9765_v45 = vld [vmem:[#allocation9_spill] sm:$0xff]  ;;  %v9766_v7 = vld [vmem:[#allocation8_spill] sm:$0xff] }
 0x3ff   :  { %v9794_v31 = vld [vmem:[#allocation64_spill] sm:$0xff] }
 0x400   :  { %v2479_v15 = vadd.f32 %v2478_v54, %v2477_v27  ;;  %v3251_v34 = vadd.f32 %v3250_v42, %v3249_v48  ;;  %v7558_v27 = vmin.f32 %v3537_v22, %v3601_v19  ;;  %v9763_v54 = vld [vmem:[#allocation5_spill] sm:$0xff]  ;;  %v9796_v25 = vld [vmem:[#allocation68_spill] sm:$0xff] }
 0x401   :  { %v9795_v19 = vld [vmem:[#allocation69_spill] sm:$0xff]  ;;  %v9798_v22 = vld [vmem:[#allocation72_spill] sm:$0xff] }
 0x402   :  { %v2481_v55 = vadd.f32 %v2480_v20, %v2479_v15  ;;  %v3253_v29 = vadd.f32 %v3252_v52, %v3251_v34  ;;  %9759 = vst [vmem:[#allocation136_spill] sm:$0xff] %v7558_v27  ;;  %v9767_v34 = vld [vmem:[#allocation13_spill] sm:$0xff]  ;;  %v9768_v52 = vld [vmem:[#allocation12_spill] sm:$0xff]  ;;  %v9882_v15 = vld [vmem:[#allocation267_spill] sm:$0xff] }
 0x403   :  { %v9881_v20 = vld [vmem:[#allocation268_spill] sm:$0xff] }
 0x404   :  { %v2483_v24 = vadd.f32 %v2482_v28, %v2481_v55  ;;  %v3255_v16 = vadd.f32 %v3254_v9, %v3253_v29  ;;  %v9770_v55 = vld [vmem:[#allocation16_spill] sm:$0xff]  ;;  %v9771_v9 = vld [vmem:[#allocation21_spill] sm:$0xff]  ;;  %v9880_v29 = vld [vmem:[#allocation262_spill] sm:$0xff] }
 0x405   :  { %v9772_v28 = vld [vmem:[#allocation20_spill] sm:$0xff] }
 0x406   :  { %v2484_v13 = vrot.slane %v2483_v24, 4  ;;  %v3257_v14 = vadd.f32 %v3256_v36, %v3255_v16  ;;  %v9773_v16 = vld [vmem:[#allocation25_spill] sm:$0xff]  ;;  %v9774_v36 = vld [vmem:[#allocation24_spill] sm:$0xff] }
 0x408   :  { %v2485_v60 = vadd.f32 %v2484_v13, %v2483_v24  ;;  %v3258_v57 = vrot.slane %v3257_v14, 4  ;;  %v9878_v13 = vld [vmem:[#allocation257_spill] sm:$0xff]  ;;  %v9879_v24 = vld [vmem:[#allocation263_spill] sm:$0xff] }
 0x40a   :  { %v2486_v5 = vrot.slane %v2485_v60, 2  ;;  %v3259_v51 = vadd.f32 %v3258_v57, %v3257_v14  ;;  %v9775_v14 = vld [vmem:[#allocation29_spill] sm:$0xff]  ;;  %v9877_v57 = vld [vmem:[#allocation258_spill] sm:$0xff] }
 0x40c   :  { %v2487_v40 = vadd.f32 %v2486_v5, %v2485_v60  ;;  %v3260_v39 = vrot.slane %v3259_v51, 2  ;;  %v9776_v60 = vld [vmem:[#allocation28_spill] sm:$0xff]  ;;  %v9777_v5 = vld [vmem:[#allocation33_spill] sm:$0xff] }
 0x40e   :  { %v2488_v4 = vrot.slane %v2487_v40, 1  ;;  %v3261_v43 = vadd.f32 %v3260_v39, %v3259_v51  ;;  %v9778_v51 = vld [vmem:[#allocation32_spill] sm:$0xff]  ;;  %v9779_v39 = vld [vmem:[#allocation37_spill] sm:$0xff] }
 0x410   :  { %v2489_v18 = vadd.f32 %v2488_v4, %v2487_v40  ;;  %v3262_v30 = vrot.slane %v3261_v43, 1  ;;  %v9780_v4 = vld [vmem:[#allocation36_spill] sm:$0xff] }
 0x411   :  { %v9876_v40 = vld [vmem:[#allocation252_spill] sm:$0xff] }
 0x412   :  { %v2490_v41 = vmul.f32 0.00048828125, %v2489_v18  ;;  %v3263_v44 = vadd.f32 %v3262_v30, %v3261_v43  ;;  %v9781_v18 = vld [vmem:[#allocation41_spill] sm:$0xff]  ;;  %v9782_v30 = vld [vmem:[#allocation40_spill] sm:$0xff] }
 0x413   :  { %v9875_v43 = vld [vmem:[#allocation253_spill] sm:$0xff] }
 0x414   :  { %v3264_v59 = vmul.f32 0.00048828125, %v3263_v44  ;;  %v3265_v1 = vmul.f32 %v2490_v41, %v2490_v41  ;;  %v9783_v44 = vld [vmem:[#allocation45_spill] sm:$0xff] }
 0x416   :  { %v3266_v47 = vsub.f32 %v3264_v59, %v3265_v1  ;;  %v9784_v59 = vld [vmem:[#allocation44_spill] sm:$0xff]  ;;  %v9803_v1 = vld [vmem:[#allocation85_spill] sm:$0xff] }
 0x418   :  { %v3267_v38 = vmax.f32 %v3266_v47, 0.0  ;;  %v9785_v47 = vld [vmem:[#allocation49_spill] sm:$0xff] }
 0x41a   :  { %v3268_v2 = vadd.f32 1e-05, %v3267_v38  ;;  %v9786_v38 = vld [vmem:[#allocation48_spill] sm:$0xff] }
 0x41c   :  { %4851 = vrsqrt.f32 %v3268_v2  ;;  %vm3275_vm5 = vweird.f32 %v3268_v2 }
 0x422   :  { %v4852_v21 = vpop.eup %4851 }
 0x423   :  { %v3270_v3 = vmul.f32 %v4852_v21, %v3268_v2  ;;  %vm3276_vm4 = vweird.f32 %v4852_v21  ;;  %v9802_v2 = vld [vmem:[#allocation80_spill] sm:$0xff] }
 0x424   :  { %vm3277_vm6 = vmor %vm3275_vm5, %vm3276_vm4 }
 0x425   :  { %v3271_v56 = vmul.f32 %v4852_v21, %v3270_v3  ;;  %v9788_v3 = vld [vmem:[#allocation52_spill] sm:$0xff] }
 0x427   :  { %v3272_v0 = vmul.f32 0.5, %v3271_v56  ;;  %v9801_v56 = vld [vmem:[#allocation81_spill] sm:$0xff] }
 0x429   :  { %v3273_v33 = vsub.f32 1.5, %v3272_v0  ;;  %v9789_v0 = vld [vmem:[#allocation57_spill] sm:$0xff] }
 0x42b   :  { %v3274_v46 = vmul.f32 %v4852_v21, %v3273_v33  ;;  %v9790_v33 = vld [vmem:[#allocation56_spill] sm:$0xff] }
 0x42d   :  { %v3278_v37 = vsel %vm3277_vm6, %v4852_v21, %v3274_v46  ;;  %v9787_v21 = vld [vmem:[#allocation53_spill] sm:$0xff] }
 0x42e   :  { %v3279_v8 = vmul.f32 %v3278_v37, %v1970_v17  ;;  %v9791_v46 = vld [vmem:[#allocation61_spill] sm:$0xff]  ;;  %v9792_v37 = vld [vmem:[#allocation60_spill] sm:$0xff] }
 0x42f   :  { %v9800_v17 = vld [vmem:[#allocation76_spill] sm:$0xff] }
 0x430   :  { %v3280_v12 = vmul.f32 %v3279_v8, %v2490_v41  ;;  %vm3666_vm7 = vcmp.ge.f32.partialorder %v3279_v8, 0.0  ;;  %v7564_v11 = vperm.slane %v3279_v8, 0  ;;  %v9804_v41 = vld [vmem:[#allocation84_spill] sm:$0xff] }
 0x431   :  { %v3667_v10 = vsel %vm3666_vm7, 1, %v4854_v53 }
 0x432   :  { %v3281_v63 = vsub.f32 %v1971_v6, %v3280_v12  ;;  %v3668_v32 = vperm.slane %v3667_v10, 0  ;;  %v9793_v6 = vld [vmem:[#allocation65_spill] sm:$0xff] }
 0x433   :  { %v9797_v10 = vld [vmem:[#allocation73_spill] sm:$0xff] }
 0x434   :  { %vm7560_vm8 = vcmp.eq.s32.totalorder %v3668_v32, 1  ;;  %v7566_v42 = vperm.slane %v3281_v63, 0  ;;  %v9799_v32 = vld [vmem:[#allocation77_spill] sm:$0xff] }
 0x435   :  { %v9885_v53 = vsel %vm7560_vm8, %v9764_v23, %v9763_v54  ;;  %v9886_v63 = vsel %vm7560_vm8, %v9766_v7, %v9765_v45  ;;  %v9887_v12 = vsel %vm7560_vm8, %v9768_v52, %v9767_v34  ;;  %v9888_v54 = vsel %vm7560_vm8, %v9770_v55, %v9769_v35 }
 0x436   :  { %9762 = vst [vmem:[#allocation141_spill] sm:$0xff] %v7566_v42  ;;  %v9884_v42 = vld [vmem:[#allocation271_spill] sm:$0xff]  ;;  %v7830_v58 = vmul.f32 %v7564_v11, %v9885_v53  ;;  %v7838_v8 = vmul.f32 %v7564_v11, %v9886_v63  ;;  %v7846_v27 = vmul.f32 %v7564_v11, %v9887_v12  ;;  %v7854_v23 = vmul.f32 %v7564_v11, %v9888_v54 }
 0x437   :  { %v9889_v45 = vsel %vm7560_vm8, %v9772_v28, %v9771_v9  ;;  %v9890_v34 = vsel %vm7560_vm8, %v9774_v36, %v9773_v16  ;;  %v9891_v35 = vsel %vm7560_vm8, %v9776_v60, %v9775_v14  ;;  %v9892_v9 = vsel %vm7560_vm8, %v9778_v51, %v9777_v5 }
 0x438   :  { %v7862_v7 = vmul.f32 %v7564_v11, %v9889_v45  ;;  %v7870_v52 = vmul.f32 %v7564_v11, %v9890_v34  ;;  %v7878_v55 = vmul.f32 %v7564_v11, %v9891_v35  ;;  %v7886_v28 = vmul.f32 %v7564_v11, %v9892_v9  ;;  %v9915_v35 = vld [vmem:[#allocation100_spill] sm:$0xff]  ;;  %v9916_v9 = vld [vmem:[#allocation101_spill] sm:$0xff] }
 0x439   :  { %v9893_v16 = vsel %vm7560_vm8, %v9780_v4, %v9779_v39  ;;  %v9894_v14 = vsel %vm7560_vm8, %v9782_v30, %v9781_v18  ;;  %v9895_v5 = vsel %vm7560_vm8, %v9784_v59, %v9783_v44  ;;  %v9896_v39 = vsel %vm7560_vm8, %v9786_v38, %v9785_v47 }
 0x43a   :  { %v7894_v36 = vmul.f32 %v7564_v11, %v9893_v16  ;;  %v7902_v60 = vmul.f32 %v7564_v11, %v9894_v14  ;;  %v7910_v51 = vmul.f32 %v7564_v11, %v9895_v5  ;;  %v7918_v4 = vmul.f32 %v7564_v11, %v9896_v39  ;;  %v9918_v5 = vld [vmem:[#allocation104_spill] sm:$0xff]  ;;  %v9919_v39 = vld [vmem:[#allocation105_spill] sm:$0xff] }
 0x43b   :  { %v9897_v18 = vsel %vm7560_vm8, %v9788_v3, %v9787_v21  ;;  %v9898_v44 = vsel %vm7560_vm8, %v9790_v33, %v9789_v0  ;;  %v9899_v47 = vsel %vm7560_vm8, %v9792_v37, %v9791_v46  ;;  %v9900_v21 = vsel %vm7560_vm8, %v9794_v31, %v9793_v6 }
 0x43c   :  { %v7926_v30 = vmul.f32 %v7564_v11, %v9897_v18  ;;  %v7934_v59 = vmul.f32 %v7564_v11, %v9898_v44  ;;  %v7942_v38 = vmul.f32 %v7564_v11, %v9899_v47  ;;  %v7950_v3 = vmul.f32 %v7564_v11, %v9900_v21  ;;  %v9921_v47 = vld [vmem:[#allocation108_spill] sm:$0xff]  ;;  %v9922_v21 = vld [vmem:[#allocation109_spill] sm:$0xff] }
 0x43d   :  { %v9901_v0 = vsel %vm7560_vm8, %v9796_v25, %v9795_v19  ;;  %v9902_v46 = vsel %vm7560_vm8, %v9798_v22, %v9797_v10  ;;  %v9903_v6 = vsel %vm7560_vm8, %v9800_v17, %v9799_v32  ;;  %v9904_v12 = vsel %vm7560_vm8, %v9802_v2, %v9801_v56  ;;  %v9906_v17 = vld [vmem:[#allocation88_spill] sm:$0xff]  ;;  %v9907_v10 = vld [vmem:[#allocation89_spill] sm:$0xff] }
 0x43e   :  { %v7958_v33 = vmul.f32 %v7564_v11, %v9901_v0  ;;  %v7966_v37 = vmul.f32 %v7564_v11, %v9902_v46  ;;  %v7974_v31 = vmul.f32 %v7564_v11, %v9903_v6  ;;  %v7982_v19 = vmul.f32 %v7564_v11, %v9904_v12  ;;  %v9909_v2 = vld [vmem:[#allocation92_spill] sm:$0xff]  ;;  %v9910_v56 = vld [vmem:[#allocation93_spill] sm:$0xff] }
 0x43f   :  { %v9905_v25 = vsel %vm7560_vm8, %v9804_v41, %v9803_v1  ;;  %v9908_v22 = vsel %vm7560_vm8, %v9906_v17, %v9907_v10  ;;  %v9911_v32 = vsel %vm7560_vm8, %v9909_v2, %v9910_v56  ;;  %v9912_v41 = vld [vmem:[#allocation96_spill] sm:$0xff]  ;;  %v9913_v1 = vld [vmem:[#allocation97_spill] sm:$0xff]  ;;  %v9917_v16 = vsel %vm7560_vm8, %v9915_v35, %v9916_v9 }
 0x440   :  { %v7990_v53 = vmul.f32 %v7564_v11, %v9905_v25  ;;  %v7998_v63 = vmul.f32 %v7564_v11, %v9908_v22  ;;  %v8006_v54 = vmul.f32 %v7564_v11, %v9911_v32  ;;  %v9914_v45 = vsel %vm7560_vm8, %v9912_v41, %v9913_v1  ;;  %v9924_v6 = vld [vmem:[#allocation112_spill] sm:$0xff]  ;;  %v9925_v12 = vld [vmem:[#allocation113_spill] sm:$0xff] }
 0x441   :  { %v8014_v34 = vmul.f32 %v7564_v11, %v9914_v45  ;;  %v8022_v14 = vmul.f32 %v7564_v11, %v9917_v16  ;;  %v9920_v18 = vsel %vm7560_vm8, %v9918_v5, %v9919_v39  ;;  %v9923_v0 = vsel %vm7560_vm8, %v9921_v47, %v9922_v21  ;;  %v9927_v10 = vld [vmem:[#allocation116_spill] sm:$0xff]  ;;  %v9928_v22 = vld [vmem:[#allocation117_spill] sm:$0xff] }
 0x442   :  { %v8030_v44 = vmul.f32 %v7564_v11, %v9920_v18  ;;  %v8038_v46 = vmul.f32 %v7564_v11, %v9923_v0  ;;  %v9926_v25 = vsel %vm7560_vm8, %v9924_v6, %v9925_v12  ;;  %v9929_v2 = vsel %vm7560_vm8, %v9927_v10, %v9928_v22  ;;  %v9930_v32 = vld [vmem:[#allocation120_spill] sm:$0xff]  ;;  %v9931_v41 = vld [vmem:[#allocation121_spill] sm:$0xff]  ;;  %v9943_v22 = vld [vmem:[#allocation138_spill] sm:$0xff] }
 0x443   :  { %v8046_v17 = vmul.f32 %v7564_v11, %v9926_v25  ;;  %v8054_v56 = vmul.f32 %v7564_v11, %v9929_v2  ;;  %v9932_v1 = vsel %vm7560_vm8, %v9930_v32, %v9931_v41  ;;  %v9933_v35 = vld [vmem:[#allocation124_spill] sm:$0xff]  ;;  %v9934_v9 = vld [vmem:[#allocation125_spill] sm:$0xff]  ;;  %v9945_v41 = vld [vmem:[#allocation142_spill] sm:$0xff] }
 0x444   :  { %v8062_v45 = vmul.f32 %v7564_v11, %v9932_v1  ;;  %v9935_v16 = vsel %vm7560_vm8, %v9933_v35, %v9934_v9  ;;  %v9936_v39 = vld [vmem:[#allocation128_spill] sm:$0xff]  ;;  %v9937_v18 = vld [vmem:[#allocation129_spill] sm:$0xff]  ;;  %v9946_v1 = vld [vmem:[#allocation143_spill] sm:$0xff] }
 0x445   :  { %v8070_v5 = vmul.f32 %v7564_v11, %v9935_v16  ;;  %v9938_v47 = vsel %vm7560_vm8, %v9936_v39, %v9937_v18  ;;  %v9939_v0 = vld [vmem:[#allocation132_spill] sm:$0xff]  ;;  %v9940_v6 = vld [vmem:[#allocation133_spill] sm:$0xff]  ;;  %v9947_v35 = vsel %vm7560_vm8, %v9945_v41, %v9946_v1  ;;  %v9948_v16 = vld [vmem:[#allocation147_spill] sm:$0xff] }
 0x446   :  { %v8078_v21 = vmul.f32 %v7564_v11, %v9938_v47  ;;  %v9941_v12 = vsel %vm7560_vm8, %v9939_v0, %v9940_v6  ;;  %v9942_v10 = vld [vmem:[#allocation137_spill] sm:$0xff]  ;;  %v8102_v9 = vmul.f32 %v7564_v11, %v9947_v35  ;;  %v9949_v39 = vld [vmem:[#allocation148_spill] sm:$0xff]  ;;  %v9959_v35 = vld [vmem:[#allocation162_spill] sm:$0xff] }
 0x447   :  { %v8086_v25 = vmul.f32 %v7564_v11, %v9941_v12  ;;  %v9944_v2 = vsel %vm7560_vm8, %v9942_v10, %v9943_v22  ;;  %v9950_v18 = vsel %vm7560_vm8, %v9948_v16, %v9949_v39  ;;  %v9951_v0 = vld [vmem:[#allocation152_spill] sm:$0xff]  ;;  %v9952_v6 = vld [vmem:[#allocation153_spill] sm:$0xff]  ;;  %v9960_v16 = vld [vmem:[#allocation163_spill] sm:$0xff] }
 0x448   :  { %v8094_v32 = vmul.f32 %v7564_v11, %v9944_v2  ;;  %v8110_v47 = vmul.f32 %v7564_v11, %v9950_v18  ;;  %v9953_v12 = vsel %vm7560_vm8, %v9951_v0, %v9952_v6  ;;  %v9955_v22 = vld [vmem:[#allocation157_spill] sm:$0xff]  ;;  %v9956_v2 = vld [vmem:[#allocation158_spill] sm:$0xff]  ;;  %v9961_v39 = vsel %vm7560_vm8, %v9959_v35, %v9960_v16  ;;  %v9963_v0 = vld [vmem:[#allocation167_spill] sm:$0xff] }
 0x449   :  { %v8118_v10 = vmul.f32 %v7564_v11, %v9953_v12  ;;  %v9957_v41 = vsel %vm7560_vm8, %v9955_v22, %v9956_v2  ;;  %v8134_v18 = vmul.f32 %v7564_v11, %v9961_v39  ;;  %v9964_v6 = vld [vmem:[#allocation168_spill] sm:$0xff]  ;;  %v9968_v2 = vld [vmem:[#allocation173_spill] sm:$0xff]  ;;  %v9972_v16 = vld [vmem:[#allocation178_spill] sm:$0xff] }
 0x44a   :  { %v8126_v1 = vmul.f32 %v7564_v11, %v9957_v41  ;;  %v9965_v12 = vsel %vm7560_vm8, %v9963_v0, %v9964_v6  ;;  %v9967_v22 = vld [vmem:[#allocation172_spill] sm:$0xff]  ;;  %v9971_v35 = vld [vmem:[#allocation177_spill] sm:$0xff]  ;;  %v9975_v0 = vld [vmem:[#allocation182_spill] sm:$0xff] }
 0x44b   :  { %9954 = vst [vmem:[#allocation146_spill] sm:$0xff] %v8118_v10  ;;  %v8142_v10 = vmul.f32 %v7564_v11, %v9965_v12  ;;  %v9969_v41 = vsel %vm7560_vm8, %v9967_v22, %v9968_v2  ;;  %v9973_v39 = vsel %vm7560_vm8, %v9971_v35, %v9972_v16  ;;  %v9976_v6 = vld [vmem:[#allocation183_spill] sm:$0xff]  ;;  %v9980_v2 = vld [vmem:[#allocation188_spill] sm:$0xff]  ;;  %v9984_v16 = vld [vmem:[#allocation193_spill] sm:$0xff] }
 0x44c   :  { %9958 = vst [vmem:[#allocation151_spill] sm:$0xff] %v8126_v1  ;;  %v8150_v1 = vmul.f32 %v7564_v11, %v9969_v41  ;;  %v9977_v12 = vsel %vm7560_vm8, %v9975_v0, %v9976_v6  ;;  %v9979_v22 = vld [vmem:[#allocation187_spill] sm:$0xff]  ;;  %v9983_v35 = vld [vmem:[#allocation192_spill] sm:$0xff]  ;;  %v9987_v0 = vld [vmem:[#allocation197_spill] sm:$0xff] }
 0x44d   :  { %9962 = vst [vmem:[#allocation156_spill] sm:$0xff] %v8134_v18  ;;  %v8158_v18 = vmul.f32 %v7564_v11, %v9973_v39  ;;  %v9981_v41 = vsel %vm7560_vm8, %v9979_v22, %v9980_v2  ;;  %v9985_v39 = vsel %vm7560_vm8, %v9983_v35, %v9984_v16  ;;  %v9988_v6 = vld [vmem:[#allocation198_spill] sm:$0xff]  ;;  %v9992_v2 = vld [vmem:[#allocation203_spill] sm:$0xff]  ;;  %v9996_v16 = vld [vmem:[#allocation208_spill] sm:$0xff] }
 0x44e   :  { %9966 = vst [vmem:[#allocation161_spill] sm:$0xff] %v8142_v10  ;;  %v8166_v10 = vmul.f32 %v7564_v11, %v9977_v12  ;;  %v9989_v12 = vsel %vm7560_vm8, %v9987_v0, %v9988_v6  ;;  %v9991_v22 = vld [vmem:[#allocation202_spill] sm:$0xff]  ;;  %v9995_v35 = vld [vmem:[#allocation207_spill] sm:$0xff]  ;;  %v9999_v0 = vld [vmem:[#allocation212_spill] sm:$0xff] }
 0x44f   :  { %9970 = vst [vmem:[#allocation166_spill] sm:$0xff] %v8150_v1  ;;  %v8174_v1 = vmul.f32 %v7564_v11, %v9981_v41  ;;  %v9993_v41 = vsel %vm7560_vm8, %v9991_v22, %v9992_v2  ;;  %v10000_v6 = vld [vmem:[#allocation213_spill] sm:$0xff]  ;;  %v10004_v2 = vld [vmem:[#allocation218_spill] sm:$0xff] }
 0x450   :  { %9974 = vst [vmem:[#allocation171_spill] sm:$0xff] %v8158_v18  ;;  %v8182_v18 = vmul.f32 %v7564_v11, %v9985_v39  ;;  %v9997_v39 = vsel %vm7560_vm8, %v9995_v35, %v9996_v16  ;;  %v10003_v22 = vld [vmem:[#allocation217_spill] sm:$0xff]  ;;  %v10007_v35 = vld [vmem:[#allocation222_spill] sm:$0xff]  ;;  %v10008_v16 = vld [vmem:[#allocation223_spill] sm:$0xff] }
 0x451   :  { %9978 = vst [vmem:[#allocation176_spill] sm:$0xff] %v8166_v10  ;;  %v8190_v10 = vmul.f32 %v7564_v11, %v9989_v12  ;;  %v10001_v12 = vsel %vm7560_vm8, %v9999_v0, %v10000_v6  ;;  %v10011_v0 = vld [vmem:[#allocation227_spill] sm:$0xff]  ;;  %v10012_v6 = vld [vmem:[#allocation228_spill] sm:$0xff] }
 0x452   :  { %9982 = vst [vmem:[#allocation181_spill] sm:$0xff] %v8174_v1  ;;  %v8198_v1 = vmul.f32 %v7564_v11, %v9993_v41  ;;  %v10005_v41 = vsel %vm7560_vm8, %v10003_v22, %v10004_v2  ;;  %v10015_v22 = vld [vmem:[#allocation232_spill] sm:$0xff]  ;;  %v10016_v2 = vld [vmem:[#allocation233_spill] sm:$0xff] }
 0x453   :  { %9986 = vst [vmem:[#allocation186_spill] sm:$0xff] %v8182_v18  ;;  %v8206_v18 = vmul.f32 %v7564_v11, %v9997_v39  ;;  %v10009_v39 = vsel %vm7560_vm8, %v10007_v35, %v10008_v16  ;;  %v10019_v35 = vld [vmem:[#allocation237_spill] sm:$0xff]  ;;  %v10020_v16 = vld [vmem:[#allocation238_spill] sm:$0xff] }
 0x454   :  { %9990 = vst [vmem:[#allocation191_spill] sm:$0xff] %v8190_v10  ;;  %v8214_v10 = vmul.f32 %v7564_v11, %v10001_v12  ;;  %v10013_v12 = vsel %vm7560_vm8, %v10011_v0, %v10012_v6  ;;  %v10022_v0 = vld [vmem:[#allocation242_spill] sm:$0xff]  ;;  %v10023_v6 = vld [vmem:[#allocation243_spill] sm:$0xff] }
 0x455   :  { %9994 = vst [vmem:[#allocation196_spill] sm:$0xff] %v8198_v1  ;;  %v8222_v1 = vmul.f32 %v7564_v11, %v10005_v41  ;;  %v10017_v41 = vsel %vm7560_vm8, %v10015_v22, %v10016_v2  ;;  %v10025_v22 = vld [vmem:[#allocation247_spill] sm:$0xff]  ;;  %v10026_v2 = vld [vmem:[#allocation248_spill] sm:$0xff] }
 0x456   :  { %9998 = vst [vmem:[#allocation201_spill] sm:$0xff] %v8206_v18  ;;  %v8230_v18 = vmul.f32 %v7564_v11, %v10009_v39  ;;  %v10021_v39 = vsel %vm7560_vm8, %v10019_v35, %v10020_v16  ;;  %v10028_v35 = vsel %vm7560_vm8, %v9876_v40, %v9875_v43  ;;  %v10031_v40 = vsel %vm7560_vm8, %v9882_v15, %v9881_v20 }
 0x457   :  { %10002 = vst [vmem:[#allocation206_spill] sm:$0xff] %v8214_v10  ;;  %v8238_v10 = vmul.f32 %v7564_v11, %v10013_v12  ;;  %v10024_v12 = vsel %vm7560_vm8, %v10022_v0, %v10023_v6  ;;  %v8278_v16 = vmul.f32 %v7564_v11, %v10028_v35  ;;  %v10030_v6 = vsel %vm7560_vm8, %v9880_v29, %v9879_v24 }
 0x458   :  { %10006 = vst [vmem:[#allocation211_spill] sm:$0xff] %v8222_v1  ;;  %v8246_v1 = vmul.f32 %v7564_v11, %v10017_v41  ;;  %v10027_v41 = vsel %vm7560_vm8, %v10025_v22, %v10026_v2  ;;  %v8302_v43 = vmul.f32 %v7564_v11, %v10031_v40  ;;  %v10034_v29 = vsel %vm7560_vm8, %v6555_v61, %v6557_v26  ;;  %v10038_v61 = vld [vmem:[#allocation141_spill] sm:$0xff]  ;;  %v10043_v40 = vld [vmem:[#allocation166_spill] sm:$0xff] }
 0x459   :  { %10010 = vst [vmem:[#allocation216_spill] sm:$0xff] %v8230_v18  ;;  %v8254_v18 = vmul.f32 %v7564_v11, %v10021_v39  ;;  %v10029_v39 = vsel %vm7560_vm8, %v9878_v13, %v9877_v57  ;;  %v10032_v13 = vld [vmem:[#allocation272_spill] sm:$0xff]  ;;  %v8318_v24 = vmul.f32 %v7564_v11, %v10034_v29  ;;  %v10035_v15 = vsel %vm7560_vm8, %v6584_v49, %v6586_v62 }
 0x45a   :  { %10014 = vst [vmem:[#allocation221_spill] sm:$0xff] %v8238_v10  ;;  %v8262_v10 = vmul.f32 %v7564_v11, %v10024_v12  ;;  %v8286_v0 = vmul.f32 %v7564_v11, %v10029_v39  ;;  %v8294_v12 = vmul.f32 %v7564_v11, %v10030_v6  ;;  %v10033_v57 = vsel %vm7560_vm8, %v9884_v42, %v10032_v13  ;;  %v10036_v42 = vld [vmem:[#allocation136_spill] sm:$0xff]  ;;  %v10042_v6 = vld [vmem:[#allocation161_spill] sm:$0xff]  ;;  %v10044_v13 = vld [vmem:[#allocation171_spill] sm:$0xff] }
 0x45b   :  { %10018 = vst [vmem:[#allocation226_spill] sm:$0xff] %v8246_v1  ;;  %v8270_v1 = vmul.f32 %v7564_v11, %v10027_v41  ;;  %v8310_v22 = vmul.f32 %v7564_v11, %v10033_v57  ;;  %v8326_v20 = vmul.f32 %v7564_v11, %v10035_v15  ;;  %v10037_v2 = vsel %vm7560_vm8, %v7556_v50, %v10036_v42  ;;  %v10041_v39 = vld [vmem:[#allocation156_spill] sm:$0xff]  ;;  %v10048_v42 = vld [vmem:[#allocation181_spill] sm:$0xff] }
 0x45c   :  { %v8334_v41 = vmul.f32 %v7564_v11, %v10037_v2  ;;  %v8338_v26 = vadd.f32 %v10038_v61, %v7830_v58  ;;  %v8342_v35 = vadd.f32 %v10038_v61, %v7838_v8  ;;  %v8346_v49 = vadd.f32 %v10038_v61, %v7846_v27  ;;  %v10046_v29 = vld [vmem:[#allocation176_spill] sm:$0xff] }
 0x45d   :  { %v8350_v62 = vadd.f32 %v10038_v61, %v7854_v23  ;;  %v8354_v50 = vadd.f32 %v10038_v61, %v7862_v7  ;;  %v8358_v48 = vadd.f32 %v10038_v61, %v7870_v52  ;;  %v8362_v11 = vadd.f32 %v10038_v61, %v7878_v55 }
 0x45e   :  { %v8366_v27 = vadd.f32 %v10038_v61, %v7886_v28  ;;  %v8370_v58 = vadd.f32 %v10038_v61, %v7894_v36  ;;  %v8374_v8 = vadd.f32 %v10038_v61, %v7902_v60  ;;  %v8378_v23 = vadd.f32 %v10038_v61, %v7910_v51 }
 0x45f   :  { %v8382_v7 = vadd.f32 %v10038_v61, %v7918_v4  ;;  %v8386_v52 = vadd.f32 %v10038_v61, %v7926_v30  ;;  %v8390_v55 = vadd.f32 %v10038_v61, %v7934_v59  ;;  %v8394_v28 = vadd.f32 %v10038_v61, %v7942_v38 }
 0x460   :  { %v8398_v36 = vadd.f32 %v10038_v61, %v7950_v3  ;;  %v8402_v60 = vadd.f32 %v10038_v61, %v7958_v33  ;;  %v8406_v51 = vadd.f32 %v10038_v61, %v7966_v37  ;;  %v8410_v4 = vadd.f32 %v10038_v61, %v7974_v31 }
 0x461   :  { %v8414_v30 = vadd.f32 %v10038_v61, %v7982_v19  ;;  %v8418_v59 = vadd.f32 %v10038_v61, %v7990_v53  ;;  %v8422_v38 = vadd.f32 %v10038_v61, %v7998_v63  ;;  %v8426_v3 = vadd.f32 %v10038_v61, %v8006_v54 }
 0x462   :  { %v8430_v33 = vadd.f32 %v10038_v61, %v8014_v34  ;;  %v8434_v37 = vadd.f32 %v10038_v61, %v8022_v14  ;;  %v8438_v31 = vadd.f32 %v10038_v61, %v8030_v44  ;;  %v8442_v19 = vadd.f32 %v10038_v61, %v8038_v46 }
 0x463   :  { %v8446_v53 = vadd.f32 %v10038_v61, %v8046_v17  ;;  %v8450_v63 = vadd.f32 %v10038_v61, %v8054_v56  ;;  %v8454_v54 = vadd.f32 %v10038_v61, %v8062_v45  ;;  %v8458_v34 = vadd.f32 %v10038_v61, %v8070_v5  ;;  %v10039_v45 = vld [vmem:[#allocation146_spill] sm:$0xff] }
 0x464   :  { %v8462_v14 = vadd.f32 %v10038_v61, %v8078_v21  ;;  %v8466_v44 = vadd.f32 %v10038_v61, %v8086_v25  ;;  %v8470_v46 = vadd.f32 %v10038_v61, %v8094_v32  ;;  %v8474_v17 = vadd.f32 %v10038_v61, %v8102_v9  ;;  %v10040_v21 = vld [vmem:[#allocation151_spill] sm:$0xff] }
 0x465   :  { %v8478_v56 = vadd.f32 %v10038_v61, %v8110_v47  ;;  %v8482_v5 = vadd.f32 %v10038_v61, %v10039_v45  ;;  %v8486_v25 = vadd.f32 %v10038_v61, %v10040_v21  ;;  %v8490_v32 = vadd.f32 %v10038_v61, %v10041_v39  ;;  %v10050_v45 = vld [vmem:[#allocation186_spill] sm:$0xff]  ;;  %v10052_v39 = vld [vmem:[#allocation191_spill] sm:$0xff] }
 0x466   :  { %v8494_v9 = vadd.f32 %v10038_v61, %v10042_v6  ;;  %v8498_v47 = vadd.f32 %v10038_v61, %v10043_v40  ;;  %v8502_v57 = vadd.f32 %v10038_v61, %v10044_v13  ;;  %v8506_v15 = vadd.f32 %v10038_v61, %v10046_v29  ;;  %v10054_v40 = vld [vmem:[#allocation196_spill] sm:$0xff] }
 0x467   :  { %v8510_v2 = vadd.f32 %v10038_v61, %v10048_v42  ;;  %v8514_v21 = vadd.f32 %v10038_v61, %v10050_v45  ;;  %v8518_v6 = vadd.f32 %v10038_v61, %v10052_v39  ;;  %v8522_v13 = vadd.f32 %v10038_v61, %v10054_v40 }
 0x468   :  { %10045 = vst [vmem:[#allocation231_spill] sm:$0xff] %v8502_v57  ;;  %v10056_v57 = vld [vmem:[#allocation201_spill] sm:$0xff] }
 0x469   :  { %10047 = vst [vmem:[#allocation236_spill] sm:$0xff] %v8506_v15  ;;  %v8526_v29 = vadd.f32 %v10038_v61, %v10056_v57  ;;  %v10057_v15 = vld [vmem:[#allocation206_spill] sm:$0xff] }
 0x46a   :  { %10049 = vst [vmem:[#allocation241_spill] sm:$0xff] %v8510_v2  ;;  %v8530_v42 = vadd.f32 %v10038_v61, %v10057_v15  ;;  %v10058_v2 = vld [vmem:[#allocation211_spill] sm:$0xff]  ;;  %v8550_v15 = vadd.f32 %v10038_v61, %v8254_v18  ;;  %v8570_v18 = vadd.f32 %v10038_v61, %v8294_v12  ;;  %v8590_v12 = vadd.f32 %v10038_v61, %v8334_v41 }
 0x46b   :  { %10051 = vst [vmem:[#allocation246_spill] sm:$0xff] %v8514_v21  ;;  %v8534_v45 = vadd.f32 %v10038_v61, %v10058_v2  ;;  %v10059_v21 = vld [vmem:[#allocation216_spill] sm:$0xff]  ;;  %v8554_v2 = vadd.f32 %v10038_v61, %v8262_v10  ;;  %v8574_v10 = vadd.f32 %v10038_v61, %v8302_v43  ;;  %v3869_v43 = vmax.f32 %v8342_v35, 0.0 }
 0x46c   :  { %10053 = vst [vmem:[#allocation251_spill] sm:$0xff] %v8518_v6  ;;  %v8538_v39 = vadd.f32 %v10038_v61, %v10059_v21  ;;  %v10060_v6 = vld [vmem:[#allocation221_spill] sm:$0xff]  ;;  %v8558_v21 = vadd.f32 %v10038_v61, %v8270_v1  ;;  %v8578_v1 = vadd.f32 %v10038_v61, %v8310_v22  ;;  %v3871_v22 = vmax.f32 %v8350_v62, 0.0 }
 0x46d   :  { %10055 = vst [vmem:[#allocation256_spill] sm:$0xff] %v8522_v13  ;;  %v8542_v40 = vadd.f32 %v10038_v61, %v10060_v6  ;;  %v10061_v13 = vld [vmem:[#allocation226_spill] sm:$0xff]  ;;  %v8562_v6 = vadd.f32 %v10038_v61, %v8278_v16  ;;  %v8582_v16 = vadd.f32 %v10038_v61, %v8318_v24  ;;  %v3875_v41 = vmax.f32 %v8366_v27, 0.0 }
 0x46e   :  { %v8546_v57 = vadd.f32 %v10038_v61, %v10061_v13  ;;  %v8566_v13 = vadd.f32 %v10038_v61, %v8286_v0  ;;  %10063 = vst [vmem:[#allocation266_spill] sm:$0xff] %v8570_v18  ;;  %v8586_v0 = vadd.f32 %v10038_v61, %v8326_v20  ;;  %v3868_v18 = vmax.f32 %v8338_v26, 0.0 }
 0x46f   :  { %10064 = vst [vmem:[#allocation2_spill] sm:$0xff] %v8574_v10  ;;  %v3870_v10 = vmax.f32 %v8346_v49, 0.0  ;;  %v3874_v20 = vmax.f32 %v8362_v11, 0.0  ;;  %v3935_v61 = vpack.c.bf16 %v3871_v22, %v3871_v22  ;;  %v3876_v26 = vmax.f32 %v8370_v58, 0.0 }
 0x470   :  { %10062 = vst [vmem:[#allocation261_spill] sm:$0xff] %v8566_v13  ;;  %v3932_v24 = vpack.c.bf16 %v3868_v18, %v3868_v18  ;;  %v3933_v13 = vpack.c.bf16 %v3869_v43, %v3869_v43  ;;  %v3877_v49 = vmax.f32 %v8374_v8, 0.0  ;;  %v3879_v11 = vmax.f32 %v8382_v7, 0.0 }
 0x471   :  { %10065 = vst [vmem:[#allocation6_spill] sm:$0xff] %v8578_v1  ;;  %v3872_v1 = vmax.f32 %v8354_v50, 0.0  ;;  %v3878_v50 = vmax.f32 %v8378_v23, 0.0  ;;  %v3939_v27 = vpack.c.bf16 %v3875_v41, %v3875_v41  ;;  %v3880_v58 = vmax.f32 %v8386_v52, 0.0 }
 0x472   :  { %10066 = vst [vmem:[#allocation10_spill] sm:$0xff] %v8582_v16  ;;  %v3873_v16 = vmax.f32 %v8358_v48, 0.0  ;;  %v3938_v48 = vpack.c.bf16 %v3874_v20, %v3874_v20  ;;  %v3940_v8 = vpack.c.bf16 %v3876_v26, %v3876_v26  ;;  %v3881_v23 = vmax.f32 %v8390_v55, 0.0 }
 0x473   :  { %10067 = vst [vmem:[#allocation14_spill] sm:$0xff] %v8586_v0  ;;  %v3934_v0 = vpack.c.bf16 %v3870_v10, %v3870_v10  ;;  %v3936_v35 = vpack.c.bf16 %v3872_v1, %v3872_v1  ;;  %v3882_v7 = vmax.f32 %v8394_v28, 0.0  ;;  %v3942_v18 = vpack.c.bf16 %v3878_v50, %v3878_v50 }
 0x474   :  { %3997 = vst.msk [vmem:[%s8916_s4] sm:$0xf] %vm3996_vm9, %v3932_v24  ;;  %v3937_v62 = vpack.c.bf16 %v3873_v16, %v3873_v16  ;;  %v3883_v52 = vmax.f32 %v8398_v36, 0.0  ;;  %v3943_v10 = vpack.c.bf16 %v3879_v11, %v3879_v11  ;;  %v3884_v55 = vmax.f32 %v8402_v60, 0.0 }
 0x475   :  { %3998 = vst.msk [vmem:[%s8916_s4 + $0x4] sm:$0xf] %vm3996_vm9, %v3933_v13  ;;  %v3941_v13 = vpack.c.bf16 %v3877_v49, %v3877_v49  ;;  %v3944_v1 = vpack.c.bf16 %v3880_v58, %v3880_v58  ;;  %v3885_v28 = vmax.f32 %v8406_v51, 0.0  ;;  %v3945_v16 = vpack.c.bf16 %v3881_v23, %v3881_v23 }
 0x476   :  { %3999 = vst.msk [vmem:[%s8916_s4 + $0x8] sm:$0xf] %vm3996_vm9, %v3934_v0  ;;  %v3886_v36 = vmax.f32 %v8410_v4, 0.0  ;;  %v3946_v0 = vpack.c.bf16 %v3882_v7, %v3882_v7  ;;  %v3887_v60 = vmax.f32 %v8414_v30, 0.0  ;;  %v3947_v43 = vpack.c.bf16 %v3883_v52, %v3883_v52 }
 0x477   :  { %4000 = vst.msk [vmem:[%s8916_s4 + $0xc] sm:$0xf] %vm3996_vm9, %v3935_v61  ;;  %v3888_v51 = vmax.f32 %v8418_v59, 0.0  ;;  %v3948_v22 = vpack.c.bf16 %v3884_v55, %v3884_v55  ;;  %v3889_v4 = vmax.f32 %v8422_v38, 0.0  ;;  %v3949_v24 = vpack.c.bf16 %v3885_v28, %v3885_v28 }
 0x478   :  { %4001 = vst.msk [vmem:[%s8916_s4 + $0x10] sm:$0xf] %vm3996_vm9, %v3936_v35  ;;  %v3890_v30 = vmax.f32 %v8426_v3, 0.0  ;;  %v3950_v20 = vpack.c.bf16 %v3886_v36, %v3886_v36  ;;  %v3891_v59 = vmax.f32 %v8430_v33, 0.0  ;;  %v3951_v41 = vpack.c.bf16 %v3887_v60, %v3887_v60  ;;  %v10071_v60 = vld [vmem:[#allocation246_spill] sm:$0xff] }
 0x479   :  { %4002 = vst.msk [vmem:[%s8916_s4 + $0x14] sm:$0xf] %vm3996_vm9, %v3937_v62  ;;  %v3892_v38 = vmax.f32 %v8434_v37, 0.0  ;;  %v3952_v61 = vpack.c.bf16 %v3888_v51, %v3888_v51  ;;  %v3893_v3 = vmax.f32 %v8438_v31, 0.0  ;;  %v3953_v26 = vpack.c.bf16 %v3889_v4, %v3889_v4 }
 0x47a   :  { %4003 = vst.msk [vmem:[%s8916_s4 + $0x18] sm:$0xf] %vm3996_vm9, %v3938_v48  ;;  %v3894_v33 = vmax.f32 %v8442_v19, 0.0  ;;  %v3954_v35 = vpack.c.bf16 %v3890_v30, %v3890_v30  ;;  %v3895_v37 = vmax.f32 %v8446_v53, 0.0  ;;  %v3955_v49 = vpack.c.bf16 %v3891_v59, %v3891_v59  ;;  %v10073_v30 = vld [vmem:[#allocation256_spill] sm:$0xff] }
 0x47b   :  { %4004 = vst.msk [vmem:[%s8916_s4 + $0x1c] sm:$0xf] %vm3996_vm9, %v3939_v27  ;;  %v3896_v31 = vmax.f32 %v8450_v63, 0.0  ;;  %v3956_v62 = vpack.c.bf16 %v3892_v38, %v3892_v38  ;;  %v3897_v19 = vmax.f32 %v8454_v54, 0.0  ;;  %v3957_v50 = vpack.c.bf16 %v3893_v3, %v3893_v3 }
 0x47c   :  { %4005 = vst.msk [vmem:[%s8916_s4 + $0x20] sm:$0xf] %vm3996_vm9, %v3940_v8  ;;  %v3898_v53 = vmax.f32 %v8458_v34, 0.0  ;;  %v3958_v48 = vpack.c.bf16 %v3894_v33, %v3894_v33  ;;  %v3899_v63 = vmax.f32 %v8462_v14, 0.0  ;;  %v3959_v11 = vpack.c.bf16 %v3895_v37, %v3895_v37 }
 0x47d   :  { %4006 = vst.msk [vmem:[%s8916_s4 + $0x24] sm:$0xf] %vm3996_vm9, %v3941_v13  ;;  %v3900_v54 = vmax.f32 %v8466_v44, 0.0  ;;  %v3960_v27 = vpack.c.bf16 %v3896_v31, %v3896_v31  ;;  %v3901_v34 = vmax.f32 %v8470_v46, 0.0  ;;  %v3961_v58 = vpack.c.bf16 %v3897_v19, %v3897_v19 }
 0x47e   :  { %4007 = vst.msk [vmem:[%s8916_s4 + $0x28] sm:$0xf] %vm3996_vm9, %v3942_v18  ;;  %v3902_v14 = vmax.f32 %v8474_v17, 0.0  ;;  %v3962_v8 = vpack.c.bf16 %v3898_v53, %v3898_v53  ;;  %v3903_v44 = vmax.f32 %v8478_v56, 0.0  ;;  %v3963_v23 = vpack.c.bf16 %v3899_v63, %v3899_v63 }
 0x47f   :  { %4008 = vst.msk [vmem:[%s8916_s4 + $0x2c] sm:$0xf] %vm3996_vm9, %v3943_v10  ;;  %v3904_v46 = vmax.f32 %v8482_v5, 0.0  ;;  %v3964_v13 = vpack.c.bf16 %v3900_v54, %v3900_v54  ;;  %v3905_v17 = vmax.f32 %v8486_v25, 0.0  ;;  %v3965_v7 = vpack.c.bf16 %v3901_v34, %v3901_v34  ;;  %v10077_v34 = vld [vmem:[#allocation6_spill] sm:$0xff] }
 0x480   :  { %4009 = vst.msk [vmem:[%s8916_s4 + $0x30] sm:$0xf] %vm3996_vm9, %v3944_v1  ;;  %v3906_v56 = vmax.f32 %v8490_v32, 0.0  ;;  %v3966_v18 = vpack.c.bf16 %v3902_v14, %v3902_v14  ;;  %v3907_v5 = vmax.f32 %v8494_v9, 0.0  ;;  %v3967_v52 = vpack.c.bf16 %v3903_v44, %v3903_v44  ;;  %v10068_v32 = vld [vmem:[#allocation231_spill] sm:$0xff]  ;;  %v10069_v9 = vld [vmem:[#allocation236_spill] sm:$0xff] }
 0x481   :  { %4010 = vst.msk [vmem:[%s8916_s4 + $0x34] sm:$0xf] %vm3996_vm9, %v3945_v16  ;;  %v3908_v25 = vmax.f32 %v8498_v47, 0.0  ;;  %v3968_v10 = vpack.c.bf16 %v3904_v46, %v3904_v46  ;;  %v3909_v55 = vmax.f32 %v10068_v32, 0.0  ;;  %v3969_v1 = vpack.c.bf16 %v3905_v17, %v3905_v17  ;;  %v10070_v47 = vld [vmem:[#allocation241_spill] sm:$0xff]  ;;  %v10079_v46 = vld [vmem:[#allocation14_spill] sm:$0xff] }
 0x482   :  { %4011 = vst.msk [vmem:[%s8916_s4 + $0x38] sm:$0xf] %vm3996_vm9, %v3946_v0  ;;  %v3910_v28 = vmax.f32 %v10069_v9, 0.0  ;;  %v3970_v16 = vpack.c.bf16 %v3906_v56, %v3906_v56  ;;  %v3911_v36 = vmax.f32 %v10070_v47, 0.0  ;;  %v3971_v0 = vpack.c.bf16 %v3907_v5, %v3907_v5 }
 0x483   :  { %4012 = vst.msk [vmem:[%s8916_s4 + $0x3c] sm:$0xf] %vm3996_vm9, %v3947_v43  ;;  %v3912_v43 = vmax.f32 %v10071_v60, 0.0  ;;  %v3972_v51 = vpack.c.bf16 %v3908_v25, %v3908_v25 }
 0x484   :  { %4013 = vst.msk [vmem:[%s8916_s4 + $0x40] sm:$0xf] %vm3996_vm9, %v3948_v22  ;;  %v10072_v22 = vld [vmem:[#allocation251_spill] sm:$0xff]  ;;  %v3974_v59 = vpack.c.bf16 %v3910_v28, %v3910_v28  ;;  %v3975_v38 = vpack.c.bf16 %v3911_v36, %v3911_v36 }
 0x485   :  { %4014 = vst.msk [vmem:[%s8916_s4 + $0x44] sm:$0xf] %vm3996_vm9, %v3949_v24  ;;  %v3913_v4 = vmax.f32 %v10072_v22, 0.0  ;;  %v3973_v24 = vpack.c.bf16 %v3909_v55, %v3909_v55  ;;  %v3976_v3 = vpack.c.bf16 %v3912_v43, %v3912_v43 }
 0x486   :  { %4015 = vst.msk [vmem:[%s8916_s4 + $0x48] sm:$0xf] %vm3996_vm9, %v3950_v20  ;;  %v3914_v20 = vmax.f32 %v10073_v30, 0.0 }
 0x487   :  { %4016 = vst.msk [vmem:[%s8916_s4 + $0x4c] sm:$0xf] %vm3996_vm9, %v3951_v41  ;;  %v3915_v41 = vmax.f32 %v8526_v29, 0.0  ;;  %v3977_v33 = vpack.c.bf16 %v3913_v4, %v3913_v4  ;;  %v3918_v29 = vmax.f32 %v8538_v39, 0.0  ;;  %v3921_v39 = vmax.f32 %v8550_v15, 0.0 }
 0x488   :  { %4017 = vst.msk [vmem:[%s8916_s4 + $0x50] sm:$0xf] %vm3996_vm9, %v3952_v61  ;;  %v3916_v61 = vmax.f32 %v8530_v42, 0.0  ;;  %v3919_v42 = vmax.f32 %v8542_v40, 0.0  ;;  %v3922_v40 = vmax.f32 %v8554_v2, 0.0  ;;  %v3924_v15 = vmax.f32 %v8562_v6, 0.0 }
 0x489   :  { %4018 = vst.msk [vmem:[%s8916_s4 + $0x54] sm:$0xf] %vm3996_vm9, %v3953_v26  ;;  %v3917_v26 = vmax.f32 %v8534_v45, 0.0  ;;  %v3979_v37 = vpack.c.bf16 %v3915_v41, %v3915_v41  ;;  %v3920_v45 = vmax.f32 %v8546_v57, 0.0  ;;  %v3923_v57 = vmax.f32 %v8558_v21, 0.0  ;;  %v10074_v2 = vld [vmem:[#allocation261_spill] sm:$0xff] }
 0x48a   :  { %4019 = vst.msk [vmem:[%s8916_s4 + $0x58] sm:$0xf] %vm3996_vm9, %v3954_v35  ;;  %v3978_v35 = vpack.c.bf16 %v3914_v20, %v3914_v20  ;;  %v3983_v19 = vpack.c.bf16 %v3919_v42, %v3919_v42  ;;  %v3925_v53 = vmax.f32 %v10074_v2, 0.0  ;;  %v10075_v21 = vld [vmem:[#allocation266_spill] sm:$0xff]  ;;  %v3988_v14 = vpack.c.bf16 %v3924_v15, %v3924_v15 }
 0x48b   :  { %4020 = vst.msk [vmem:[%s8916_s4 + $0x5c] sm:$0xf] %vm3996_vm9, %v3955_v49  ;;  %v3980_v49 = vpack.c.bf16 %v3916_v61, %v3916_v61  ;;  %v3981_v31 = vpack.c.bf16 %v3917_v26, %v3917_v26  ;;  %v3926_v63 = vmax.f32 %v10075_v21, 0.0  ;;  %v10076_v6 = vld [vmem:[#allocation2_spill] sm:$0xff] }
 0x48c   :  { %4021 = vst.msk [vmem:[%s8916_s4 + $0x60] sm:$0xf] %vm3996_vm9, %v3956_v62  ;;  %v3982_v62 = vpack.c.bf16 %v3918_v29, %v3918_v29  ;;  %v3927_v54 = vmax.f32 %v10076_v6, 0.0 }
 0x48d   :  { %4022 = vst.msk [vmem:[%s8916_s4 + $0x64] sm:$0xf] %vm3996_vm9, %v3957_v50  ;;  %v3984_v50 = vpack.c.bf16 %v3920_v45, %v3920_v45  ;;  %v3990_v17 = vpack.c.bf16 %v3926_v63, %v3926_v63 }
 0x48e   :  { %4023 = vst.msk [vmem:[%s8916_s4 + $0x68] sm:$0xf] %vm3996_vm9, %v3958_v48  ;;  %v3985_v48 = vpack.c.bf16 %v3921_v39, %v3921_v39  ;;  %v3991_v56 = vpack.c.bf16 %v3927_v54, %v3927_v54 }
 0x48f   :  { %4024 = vst.msk [vmem:[%s8916_s4 + $0x6c] sm:$0xf] %vm3996_vm9, %v3959_v11  ;;  %v3986_v11 = vpack.c.bf16 %v3922_v40, %v3922_v40 }
 0x490   :  { %4025 = vst.msk [vmem:[%s8916_s4 + $0x70] sm:$0xf] %vm3996_vm9, %v3960_v27  ;;  %v3987_v27 = vpack.c.bf16 %v3923_v57, %v3923_v57 }
 0x491   :  { %4026 = vst.msk [vmem:[%s8916_s4 + $0x74] sm:$0xf] %vm3996_vm9, %v3961_v58  ;;  %v3928_v58 = vmax.f32 %v10077_v34, 0.0 }
 0x492   :  { %4027 = vst.msk [vmem:[%s8916_s4 + $0x78] sm:$0xf] %vm3996_vm9, %v3962_v8  ;;  %v10078_v8 = vld [vmem:[#allocation10_spill] sm:$0xff] }
 0x493   :  { %4028 = vst.msk [vmem:[%s8916_s4 + $0x7c] sm:$0xf] %vm3996_vm9, %v3963_v23  ;;  %v3929_v44 = vmax.f32 %v10078_v8, 0.0  ;;  %v3989_v23 = vpack.c.bf16 %v3925_v53, %v3925_v53 }
 0x494   :  { %4029 = vst.msk [vmem:[%s8916_s4 + $0x80] sm:$0xf] %vm3996_vm9, %v3964_v13  ;;  %v3930_v13 = vmax.f32 %v10079_v46, 0.0 }
 0x495   :  { %4030 = vst.msk [vmem:[%s8916_s4 + $0x84] sm:$0xf] %vm3996_vm9, %v3965_v7  ;;  %v3931_v7 = vmax.f32 %v8590_v12, 0.0  ;;  %v3993_v5 = vpack.c.bf16 %v3929_v44, %v3929_v44 }
 0x496   :  { %4031 = vst.msk [vmem:[%s8916_s4 + $0x88] sm:$0xf] %vm3996_vm9, %v3966_v18  ;;  %v3992_v18 = vpack.c.bf16 %v3928_v58, %v3928_v58 }
 0x497   :  { %4032 = vst.msk [vmem:[%s8916_s4 + $0x8c] sm:$0xf] %vm3996_vm9, %v3967_v52  ;;  %v3994_v52 = vpack.c.bf16 %v3930_v13, %v3930_v13  ;;  %v3995_v12 = vpack.c.bf16 %v3931_v7, %v3931_v7 }
 0x498   :  { %4033 = vst.msk [vmem:[%s8916_s4 + $0x90] sm:$0xf] %vm3996_vm9, %v3968_v10 }
 0x499   :  { %4034 = vst.msk [vmem:[%s8916_s4 + $0x94] sm:$0xf] %vm3996_vm9, %v3969_v1 }
 0x49a   :  { %4035 = vst.msk [vmem:[%s8916_s4 + $0x98] sm:$0xf] %vm3996_vm9, %v3970_v16 }
 0x49b   :  { %4036 = vst.msk [vmem:[%s8916_s4 + $0x9c] sm:$0xf] %vm3996_vm9, %v3971_v0 }
 0x49c   :  { %4037 = vst.msk [vmem:[%s8916_s4 + $0xa0] sm:$0xf] %vm3996_vm9, %v3972_v51 }
 0x49d   :  { %4038 = vst.msk [vmem:[%s8916_s4 + $0xa4] sm:$0xf] %vm3996_vm9, %v3973_v24 }
 0x49e   :  { %4039 = vst.msk [vmem:[%s8916_s4 + $0xa8] sm:$0xf] %vm3996_vm9, %v3974_v59 }
 0x49f   :  { %4040 = vst.msk [vmem:[%s8916_s4 + $0xac] sm:$0xf] %vm3996_vm9, %v3975_v38 }
 0x4a0   :  { %4041 = vst.msk [vmem:[%s8916_s4 + $0xb0] sm:$0xf] %vm3996_vm9, %v3976_v3 }
 0x4a1   :  { %4042 = vst.msk [vmem:[%s8916_s4 + $0xb4] sm:$0xf] %vm3996_vm9, %v3977_v33 }
 0x4a2   :  { %4043 = vst.msk [vmem:[%s8916_s4 + $0xb8] sm:$0xf] %vm3996_vm9, %v3978_v35 }
 0x4a3   :  { %4044 = vst.msk [vmem:[%s8916_s4 + $0xbc] sm:$0xf] %vm3996_vm9, %v3979_v37 }
 0x4a4   :  { %4045 = vst.msk [vmem:[%s8916_s4 + $0xc0] sm:$0xf] %vm3996_vm9, %v3980_v49 }
 0x4a5   :  { %4046 = vst.msk [vmem:[%s8916_s4 + $0xc4] sm:$0xf] %vm3996_vm9, %v3981_v31 }
 0x4a6   :  { %4047 = vst.msk [vmem:[%s8916_s4 + $0xc8] sm:$0xf] %vm3996_vm9, %v3982_v62 }
 0x4a7   :  { %4048 = vst.msk [vmem:[%s8916_s4 + $0xcc] sm:$0xf] %vm3996_vm9, %v3983_v19 }
 0x4a8   :  { %4049 = vst.msk [vmem:[%s8916_s4 + $0xd0] sm:$0xf] %vm3996_vm9, %v3984_v50 }
 0x4a9   :  { %4050 = vst.msk [vmem:[%s8916_s4 + $0xd4] sm:$0xf] %vm3996_vm9, %v3985_v48 }
 0x4aa   :  { %4051 = vst.msk [vmem:[%s8916_s4 + $0xd8] sm:$0xf] %vm3996_vm9, %v3986_v11 }
 0x4ab   :  { %4052 = vst.msk [vmem:[%s8916_s4 + $0xdc] sm:$0xf] %vm3996_vm9, %v3987_v27 }
 0x4ac   :  { %4053 = vst.msk [vmem:[%s8916_s4 + $0xe0] sm:$0xf] %vm3996_vm9, %v3988_v14 }
 0x4ad   :  { %4054 = vst.msk [vmem:[%s8916_s4 + $0xe4] sm:$0xf] %vm3996_vm9, %v3989_v23 }
 0x4ae   :  { %4055 = vst.msk [vmem:[%s8916_s4 + $0xe8] sm:$0xf] %vm3996_vm9, %v3990_v17 }
 0x4af   :  { %4056 = vst.msk [vmem:[%s8916_s4 + $0xec] sm:$0xf] %vm3996_vm9, %v3991_v56 }
 0x4b0   :  { %4057 = vst.msk [vmem:[%s8916_s4 + $0xf0] sm:$0xf] %vm3996_vm9, %v3992_v18 }
 0x4b1   :  { %4058 = vst.msk [vmem:[%s8916_s4 + $0xf4] sm:$0xf] %vm3996_vm9, %v3993_v5 }
 0x4b2   :  { %4059 = vst.msk [vmem:[%s8916_s4 + $0xf8] sm:$0xf] %vm3996_vm9, %v3994_v52 }
 0x4b3   :  { %4060 = vst.msk [vmem:[%s8916_s4 + $0xfc] sm:$0xf] %vm3996_vm9, %v3995_v12 }

// kernel: model_cnn_forward.5
= control target key start
LH: loop header
LB: loop body
LE: loop exit
PB: predicated region body
PF: predicated region fallthrough
CT: control target
= control target key end

     0   :  { %s691_s0 = inlined_call_operand.vmem [shape: bf16[8,288], index: 0, kind: input, shape index: {}]   ;;  %s692_s1 = inlined_call_operand.vmem [shape: bf16[288,64], index: 1, kind: input, shape index: {}]   ;;  %s693_s2 = inlined_call_operand.vmem [shape: f32[1,64], index: 2, kind: input, shape index: {}]   ;;  %s694_s3 = inlined_call_operand.vmem [shape: f32[1,64], index: 3, kind: input, shape index: {}]   ;;  %s695_s4 = inlined_call_operand.vmem [shape: f32[64,10], index: 4, kind: input, shape index: {}]   ;;  %s696_s5 = inlined_call_operand.vmem [shape: f32[1,10], index: 5, kind: input, shape index: {}]   ;;  %s697_s6 = inlined_call_operand.vmem [shape: f32[10,2], index: 6, kind: input, shape index: {}]   ;;  %s698_s7 = inlined_call_operand.vmem [shape: f32[1,2], index: 7, kind: input, shape index: {}]   ;;  %s699_s8 = inlined_call_operand.hbm [shape: f32[2,2], index: 8, kind: output, shape index: {}]  }
   0x1   :  { %v489_v0 = vld [vmem:[%s692_s1 + $0x38] sm:$0xff]  ;;  %v488_v2 = vld [vmem:[%s692_s1 + $0x30] sm:$0xff]  ;;  %v499_v4 = vld [vmem:[%s692_s1 + $0x88] sm:$0xff] }
   0x2   :  { %v497_v1 = vld [vmem:[%s692_s1 + $0x78] sm:$0xff]  ;;  %191 = vmatpush.bf16.msra.mxu0 %v489_v0  ;;  %v496_v3 = vld [vmem:[%s692_s1 + $0x70] sm:$0xff]  ;;  %223 = vmatpush.bf16.msra.mxu2 %v499_v4  ;;  %v498_v5 = vld [vmem:[%s692_s1 + $0x80] sm:$0xff] }
   0x3   :  { %204 = vmatpush.bf16.msra.mxu1 %v497_v1  ;;  %v32_v6 = vld [vmem:[%s691_s0 + $0x8] sm:$0xf] }
   0x4   :  { %v73_v7 = vunpack.c.l.b16 %v32_v6  ;;  %v487_v8 = vld [vmem:[%s692_s1 + $0x28] sm:$0xff] }
   0x5   :  { %v495_v9 = vld [vmem:[%s692_s1 + $0x68] sm:$0xff] }
   0x6   :  { %192 = vmatpush.bf16.msra.mxu0 %v488_v2  ;;  %v76_v10 = vpack.c.b16 %v73_v7, %v73_v7 }
   0x7   :  { %205 = vmatpush.bf16.msra.mxu1 %v496_v3 }
   0x8   :  { %13 = vsyncpa [#allocation3], 0  ;;  %224 = vmatpush.bf16.msra.mxu2 %v498_v5  ;;  %vm187_vm0 = vcmask 261120   ;;  %v486_v11 = vld [vmem:[%s692_s1 + $0x20] sm:$0xff]  ;;  %v485_v13 = vld [vmem:[%s692_s1 + $0x18] sm:$0xff]  ;;  %vm232_vm1 = vcmask 523264  }
   0x9   :  { %v494_v12 = vld [vmem:[%s692_s1 + $0x60] sm:$0xff]  ;;  %v493_v14 = vld [vmem:[%s692_s1 + $0x58] sm:$0xff]  ;;  %v484_v15 = vld [vmem:[%s692_s1 + $0x10] sm:$0xff]  ;;  %vm329_vm7 = vcmask 74752   ;;  %vm364_vm8 = vcmask 1041408   ;;  %vm360_vm13 = vcmask 80896  }
   0xa   :  { %193 = vmatpush.bf16.msra.mxu0 %v487_v8  ;;  %v492_v16 = vld [vmem:[%s692_s1 + $0x50] sm:$0xff]  ;;  %v483_v17 = vld [vmem:[%s692_s1 + $0x8] sm:$0xff]  ;;  %v31_v19 = vld [vmem:[%s691_s0] sm:$0xff]  ;;  %s537_s22 = smov [#allocation2]   ;;  %s397_s25 = sshll.u32 %s699_s8, 4  ;;  %vm388_vm14 = vcmask 9216   ;;  %s398_s25 = int_to_ptr.hbm [resolvable:$true] %s397_s25 }
   0xb   :  { %206 = vmatpush.bf16.msra.mxu1 %v495_v9  ;;  %478 = vmatmul.msk.bf16.vlgmr.msra.gmra.mxu2 %vm187_vm0, %v76_v10  ;;  %v491_v18 = vld [vmem:[%s692_s1 + $0x48] sm:$0xff]  ;;  %v71_v20 = vunpack.c.l.b16 %v31_v19  ;;  %v72_v21 = vunpack.c.h.b16 %v31_v19  ;;  %v482_v22 = vld [vmem:[%s692_s1] sm:$0xff]  ;;  %v301_v26 = vld [vmem:[%s695_s4 + $0x38] sm:$0xff]  ;;  %s395_s23 = sshll.u32 %s537_s22, 4  ;;  %s396_s23 = int_to_ptr.vmem [resolvable:$true] %s395_s23 }
   0xc   :  { %v490_v23 = vld [vmem:[%s692_s1 + $0x40] sm:$0xff]  ;;  %v300_v27 = vld [vmem:[%s695_s4 + $0x30] sm:$0xff]  ;;  %317 = vmatpush.msra.mxu3 %v301_v26  ;;  %v299_v28 = vld [vmem:[%s695_s4 + $0x28] sm:$0xff] }
   0xd   :  { %v74_v24 = vpack.c.b16 %v71_v20, %v71_v20  ;;  %v75_v25 = vpack.c.b16 %v72_v21, %v72_v21  ;;  %v298_v29 = vld [vmem:[%s695_s4 + $0x20] sm:$0xff]  ;;  %v297_v30 = vld [vmem:[%s695_s4 + $0x18] sm:$0xff]  ;;  %v296_v32 = vld [vmem:[%s695_s4 + $0x10] sm:$0xff] }
   0xe   :  { %194 = vmatpush.bf16.msra.mxu0 %v486_v11  ;;  %318 = vmatpush.msra.mxu3 %v300_v27  ;;  %v295_v33 = vld [vmem:[%s695_s4 + $0x8] sm:$0xff]  ;;  %v294_v34 = vld [vmem:[%s695_s4] sm:$0xff] }
   0xf   :  { %207 = vmatpush.bf16.msra.mxu1 %v494_v12  ;;  %v230_v5 = vld [vmem:[%s693_s2] sm:$0x1] }
  0x10   :  { %319 = vmatpush.msra.mxu3 %v299_v28  ;;  %v231_v11 = vld [vmem:[%s694_s3] sm:$0x1] }
  0x11   :  { %v502_v27 = vld [vmem:[%s696_s5] ss:$0 sm:$0xff] }
  0x12   :  { %195 = vmatpush.bf16.msra.mxu0 %v485_v13  ;;  %320 = vmatpush.msra.mxu3 %v298_v29 }
  0x13   :  { %208 = vmatpush.bf16.msra.mxu1 %v493_v14 }
  0x14   :  { %321 = vmatpush.msra.mxu3 %v297_v30 }
  0x16   :  { %196 = vmatpush.bf16.msra.mxu0 %v484_v15  ;;  %322 = vmatpush.msra.mxu3 %v296_v32  ;;  %v536_v15 = vmov 0  }
  0x17   :  { %209 = vmatpush.bf16.msra.mxu1 %v492_v16 }
  0x18   :  { %323 = vmatpush.msra.mxu3 %v295_v33 }
  0x1a   :  { %197 = vmatpush.bf16.msra.mxu0 %v483_v17  ;;  %324 = vmatpush.msra.mxu3 %v294_v34 }
  0x1b   :  { %210 = vmatpush.bf16.msra.mxu1 %v491_v18 }
  0x1e   :  { %198 = vmatpush.bf16.msra.mxu0 %v482_v22 }
  0x1f   :  { %211 = vmatpush.bf16.msra.mxu1 %v490_v23 }
  0x21   :  { %199 = vmatmul.bf16.vlgmr.msra.gmra.mxu0 %v74_v24 }
  0x22   :  { %212 = vmatmul.bf16.vlgmr.msra.gmra.mxu1 %v75_v25 }
  0x8e   :  { %v226_v31 = vpop.f32.mrf.mxu2 }
  0x96   :  { %v228_v35 = vpop.f32.mrf.mxu2 }
  0x9e   :  { %v200_v36 = vpop.f32.mrf.mxu0 }
  0x9f   :  { %v213_v37 = vpop.f32.mrf.mxu1 }
  0xa0   :  { %v214_v38 = vadd.f32 %v213_v37, %v200_v36  ;;  %v355_v36 = vld [vmem:[%s697_s6 + $0x8] sm:$0x3]  ;;  %v354_v37 = vld [vmem:[%s697_s6] sm:$0xff] }
  0xa1   :  { %480 = vmatpush.msk.msrb.mxu2 %vm364_vm8, %v355_v36 }
  0xa2   :  { %v227_v39 = vadd.f32 %v226_v31, %v214_v38 }
  0xa3   :  { %383 = vmatpush.msrb.mxu2 %v354_v37 }
  0xa4   :  { %v233_v40 = vsel %vm232_vm1, %v227_v39, 0.0  ;;  %v241_v41 = vmul.f32 %v227_v39, %v227_v39  ;;  %v268_v2 = vrot.slane %v227_v39, 2 }
  0xa5   :  { %v234_v42 = vrot.slane %v233_v40, 4 }
  0xa6   :  { %v242_v43 = vsel %vm232_vm1, %v241_v41, 0.0  ;;  %v202_v44 = vpop.f32.mrf.mxu0  ;;  %v270_v7 = vmax.f32 %v227_v39, %v268_v2  ;;  %v275_v8 = vmin.f32 %v227_v39, %v268_v2 }
  0xa7   :  { %v215_v45 = vpop.f32.mrf.mxu1  ;;  %v235_v46 = vadd.f32 %v234_v42, %v233_v40  ;;  %v243_v47 = vrot.slane %v242_v43, 4 }
  0xa8   :  { %v272_v12 = vrot.slane %v270_v7, 4  ;;  %v277_v13 = vrot.slane %v275_v8, 4 }
  0xa9   :  { %v236_v48 = vrot.slane %v235_v46, 2  ;;  %v244_v49 = vadd.f32 %v243_v47, %v242_v43 }
  0xaa   :  { %v274_v19 = vmax.f32 %v270_v7, %v272_v12  ;;  %v279_v20 = vmin.f32 %v275_v8, %v277_v13 }
  0xab   :  { %v237_v50 = vadd.f32 %v236_v48, %v235_v46  ;;  %v245_v51 = vrot.slane %v244_v49, 2 }
  0xad   :  { %v238_v52 = vrot.slane %v237_v50, 1  ;;  %v246_v53 = vadd.f32 %v245_v51, %v244_v49 }
  0xaf   :  { %v239_v54 = vadd.f32 %v238_v52, %v237_v50  ;;  %v247_v55 = vrot.slane %v246_v53, 1  ;;  %v503_v50 = vld [vmem:[%s698_s7] ss:$0 sm:$0xff] }
  0xb1   :  { %v240_v56 = vmul.f32 0.125, %v239_v54  ;;  %v248_v57 = vadd.f32 %v247_v55, %v246_v53 }
  0xb3   :  { %v249_v58 = vmul.f32 0.125, %v248_v57  ;;  %v250_v59 = vmul.f32 %v240_v56, %v240_v56 }
  0xb5   :  { %v251_v60 = vsub.f32 %v249_v58, %v250_v59 }
  0xb7   :  { %v252_v61 = vmax.f32 %v251_v60, 0.0 }
  0xb9   :  { %v253_v62 = vadd.f32 1e-05, %v252_v61 }
  0xbb   :  { %504 = vrsqrt.f32 %v253_v62  ;;  %vm260_vm3 = vweird.f32 %v253_v62 }
  0xc1   :  { %v505_v63 = vpop.eup %504 }
  0xc2   :  { %v255_v0 = vmul.f32 %v505_v63, %v253_v62  ;;  %vm261_vm2 = vweird.f32 %v505_v63 }
  0xc3   :  { %vm262_vm4 = vmor %vm260_vm3, %vm261_vm2 }
  0xc4   :  { %v256_v1 = vmul.f32 %v505_v63, %v255_v0 }
  0xc6   :  { %v257_v3 = vmul.f32 0.5, %v256_v1 }
  0xc8   :  { %v258_v4 = vsub.f32 1.5, %v257_v3 }
  0xca   :  { %v259_v6 = vmul.f32 %v505_v63, %v258_v4 }
  0xcc   :  { %v263_v9 = vsel %vm262_vm4, %v505_v63, %v259_v6 }
  0xcd   :  { %v264_v10 = vmul.f32 %v263_v9, %v230_v5 }
  0xcf   :  { %v265_v14 = vmul.f32 %v264_v10, %v240_v56  ;;  %vm280_vm5 = vcmp.ge.f32.partialorder %v264_v10, 0.0  ;;  %v286_v21 = vperm.slane %v264_v10, 0 }
  0xd0   :  { %v281_v16 = vsel %vm280_vm5, 1, %v536_v15 }
  0xd1   :  { %v266_v17 = vsub.f32 %v231_v11, %v265_v14  ;;  %v282_v18 = vperm.slane %v281_v16, 0 }
  0xd3   :  { %vm283_vm6 = vcmp.eq.s32.totalorder %v282_v18, 1  ;;  %v290_v24 = vperm.slane %v266_v17, 0 }
  0xd4   :  { %v284_v22 = vsel %vm283_vm6, %v274_v19, %v279_v20 }
  0xd5   :  { %v288_v23 = vmul.f32 %v286_v21, %v284_v22 }
  0xd7   :  { %v292_v25 = vadd.f32 %v290_v24, %v288_v23 }
  0xd9   :  { %v293_v26 = vmax.f32 %v292_v25, 0.0 }
  0xdb   :  { %479 = vmatmul.msk.f32.vlgmr.msra.gmra.mxu3 %vm232_vm1, %v293_v26 }
 0x15e   :  { %v326_v28 = vpop.f32.mrf.mxu3 }
 0x15f   :  { %v327_v29 = vadd.f32 %v502_v27, %v326_v28 }
 0x161   :  { %v330_v30 = vsel %vm329_vm7, %v327_v29, -inf }
 0x162   :  { %331 = vmax.xlane.f32.xlu0 %v330_v30 }
 0x1d5   :  { %v332_v31 = vpop.xlane.xlu0 %331 }
 0x1d6   :  { %v333_v32 = vsub.f32 %v327_v29, %v332_v31 }
 0x1d8   :  { %v334_v33 = vmul.f32 1.442695, %v333_v32 }
 0x1da   :  { %506 = vpow2.f32 %v334_v33 }
 0x1e0   :  { %v507_v34 = vpop.eup %506 }
 0x1e1   :  { %v336_v35 = vsel %vm329_vm7, %v507_v34, 0.0 }
 0x1e2   :  { %337 = vadd.xlane.f32.xlu0 %v336_v35 }
 0x255   :  { %v338_v38 = vpop.xlane.xlu0 %337 }
 0x256   :  { %508 = vrcp.f32 %v338_v38  ;;  %v350_v42 = vand.u32 2147483648, %v338_v38  ;;  %v348_v44 = vand.u32 2147483647, %v338_v38  ;;  %vm344_vm10 = vweird.f32 %v338_v38 }
 0x258   :  { %v351_v46 = vor.u32 1.1754944e-38, %v350_v42  ;;  %vm349_vm12 = vcmp.eq.f32.partialorder %v348_v44, 8.507059e+37 }
 0x25c   :  { %v509_v39 = vpop.eup %508 }
 0x25d   :  { %v340_v40 = vmul.f32 %v509_v39, %v338_v38  ;;  %vm345_vm9 = vweird.f32 %v509_v39 }
 0x25e   :  { %vm346_vm11 = vmor %vm344_vm10, %vm345_vm9 }
 0x25f   :  { %v341_v41 = vsub.f32 1.0, %v340_v40 }
 0x261   :  { %v342_v43 = vmul.f32 %v509_v39, %v341_v41 }
 0x263   :  { %v343_v45 = vadd.f32 %v509_v39, %v342_v43 }
 0x265   :  { %v347_v47 = vsel %vm346_vm11, %v509_v39, %v343_v45 }
 0x266   :  { %v352_v48 = vsel %vm349_vm12, %v351_v46, %v347_v47 }
 0x267   :  { %v353_v49 = vmul.f32 %v507_v34, %v352_v48 }
 0x269   :  { %481 = vmatmul.msk.f32.vlgmr.msrb.gmra.mxu2 %vm360_vm13, %v353_v49 }
 0x2ec   :  { %v385_v51 = vpop.f32.mrf.mxu2 }
 0x2ed   :  { %v386_v52 = vadd.f32 %v503_v50, %v385_v51 }
 0x2ef   :  { %389 = vst.msk [vmem:[#allocation2] sm:$0x3] %vm388_vm14, %v386_v52 }
 0x2f0   :  { %400 = dma.vmem_to_hbm [thread:$0]  %s396_s23, 32, %s398_s25, [#allocation3]  }
 0x2f1   :  { %534 = dma.done.wait [#allocation3], 32  }
 0x2f2   :  { %535 = vsyncadd [#allocation3], 4294967264 }
 0x2f3   :  { %405 = vsyncpa [#allocation3], 1 }

</bundles_post_ra>
